<compile_context>
chip_gen: v7x
topology: tpu7x:2x2x1
jax: 0.10.0
libtpu: 0.0.40
codegen_flags: <defaults>
</compile_context>

<pallas_src>
import math

import jax
import jax.numpy as jnp
from jax.experimental import pallas as pl
from jax.experimental.pallas import tpu as pltpu

# ---------------- config (small synthetic BERT) ----------------
VOCAB = 64
MAXPOS = 16
H = 32            # hidden_size
NH = 4            # num_attention_heads
DH = H // NH      # head dim
INTER = 64        # intermediate_size
NUM_LAYERS = 2
NUM_LABELS = 5
LPAD = 128        # lane-dense padded label dim for the classifier output slab
B, S = 2, 8
LN_EPS = 1e-12


# ---------------- fused encoder + classifier kernel ----------------
def _encoder_kernel(x_ref, mb_ref, eg_ref, ebt_ref,
                    wqkv_ref, bqkv_ref, wo_ref, bo_ref, ln1g_ref, ln1b_ref,
                    w1_ref, b1_ref, w2_ref, b2_ref, ln2g_ref, ln2b_ref,
                    clsw_ref, clsb_ref, out_ref):
    def layer_norm(h, g, b):
        mu = jnp.mean(h, axis=-1, keepdims=True)
        var = jnp.mean((h - mu) ** 2, axis=-1, keepdims=True)
        return (h - mu) * jax.lax.rsqrt(var + LN_EPS) * g + b

    def gelu(y):
        # TODO(synk): tanh approximation of the exact erf-GELU used by HF BERT.
        return 0.5 * y * (1.0 + jnp.tanh(0.7978845608028654 * (y + 0.044715 * y * y * y)))

    scale = 1.0 / math.sqrt(DH)
    x = layer_norm(x_ref[...], eg_ref[...], ebt_ref[...])       # [B*S, H]
    bias = mb_ref[...][:, None, :]                               # [B, 1, S] additive key mask

    for l in range(NUM_LAYERS):                                  # static python loop
        # fused QKV projection: one matmul, N = 3H
        qkv = jnp.dot(x, wqkv_ref[l], preferred_element_type=jnp.float32) + bqkv_ref[l]  # [M, 3H]

        ctx_heads = []
        for hd in range(NH):                                     # static python loop over heads
            q3 = qkv[:, hd * DH:(hd + 1) * DH].reshape(B, S, DH)
            k3 = qkv[:, H + hd * DH:H + (hd + 1) * DH].reshape(B, S, DH)
            v3 = qkv[:, 2 * H + hd * DH:2 * H + (hd + 1) * DH].reshape(B, S, DH)
            s = jnp.einsum('bqd,bkd->bqk', q3, k3,
                           preferred_element_type=jnp.float32) * scale + bias            # [B, S, S]
            s = s - jnp.max(s, axis=-1, keepdims=True)
            p = jnp.exp(s)
            p = p * pl.reciprocal(jnp.sum(p, axis=-1, keepdims=True), approx=True)
            ctx = jnp.einsum('bqk,bkd->bqd', p, v3, preferred_element_type=jnp.float32)  # [B, S, DH]
            ctx_heads.append(ctx.reshape(B * S, DH))
        ctx_all = jnp.concatenate(ctx_heads, axis=-1)            # [M, H]

        # output projection + residual + LN (fused epilogue)
        attn_out = jnp.dot(ctx_all, wo_ref[l], preferred_element_type=jnp.float32) + bo_ref[l]
        x = layer_norm(attn_out + x, ln1g_ref[l], ln1b_ref[l])

        # FFN + residual + LN (fused epilogue)
        h1 = gelu(jnp.dot(x, w1_ref[l], preferred_element_type=jnp.float32) + b1_ref[l])
        h2 = jnp.dot(h1, w2_ref[l], preferred_element_type=jnp.float32) + b2_ref[l]
        x = layer_norm(h2 + x, ln2g_ref[l], ln2b_ref[l])

    # classifier (dropout = identity / eval mode); lane-dense padded output slab
    out_ref[...] = jnp.dot(x, clsw_ref[...], preferred_element_type=jnp.float32) + clsb_ref[...]


def encoder_classifier(emb2d, mask_bias, p):
    M = emb2d.shape[0]
    inputs = [emb2d, mask_bias, p["emb_ln_g"], p["emb_ln_b"],
              p["wqkv"], p["bqkv"], p["wo"], p["bo"], p["ln1_g"], p["ln1_b"],
              p["w1"], p["b1"], p["w2"], p["b2"], p["ln2_g"], p["ln2_b"],
              p["cls_w_pad"], p["cls_b_pad"]]
    return pl.pallas_call(
        _encoder_kernel,
        out_shape=jax.ShapeDtypeStruct((M, LPAD), jnp.float32),
        in_specs=[pl.BlockSpec(memory_space=pltpu.MemorySpace.VMEM)] * len(inputs),
        out_specs=pl.BlockSpec(memory_space=pltpu.MemorySpace.VMEM),
    )(*inputs)


# ---------------- batch-vectorized CRF kernel ----------------
def _crf_kernel(logits_ref, tagsoh_ref, mask_ref, trans_ref, start_ref, end_ref, out_ref):
    # torchcrf semantics, reduction='sum': out = sum_b [ score(gold path) - logZ ]
    # Inputs are time-major: logits/tags_oh [S, B, L], mask [S, B, 1].
    # Assumes mask[:, 0] == 1 and contiguous padding at the end (torchcrf requirement).
    Sv, Bv, L = logits_ref.shape
    logits = logits_ref[...]
    tags_oh = tagsoh_ref[...]
    m_all = mask_ref[...]
    trans = trans_ref[...]            # [L, L]
    start = start_ref[...]            # [1, L]
    end = end_ref[...]                # [1, L]

    # ---- numerator (gold path score): fully vectorized, no serial loop ----
    emit_b = jnp.sum(jnp.sum(logits * tags_oh * m_all, axis=2, keepdims=True), axis=0)    # [B, 1]
    start_b = jnp.sum(start * tags_oh[0], axis=1, keepdims=True)                          # [B, 1]
    prev_r = tags_oh[:-1].reshape((Sv - 1) * Bv, L)
    cur_r = (tags_oh[1:] * m_all[1:]).reshape((Sv - 1) * Bv, L)
    tsel = jnp.dot(prev_r, trans, preferred_element_type=jnp.float32) * cur_r             # [(S-1)*B, L]
    trans_b = jnp.sum(jnp.sum(tsel.reshape(Sv - 1, Bv, L), axis=2, keepdims=True), axis=0)  # [B, 1]
    # one-hot of the tag at the last valid position (contiguous mask assumption)
    last_oh = jnp.sum(tags_oh * m_all, axis=0) - jnp.sum(tags_oh[:-1] * m_all[1:], axis=0)  # [B, L]
    end_b = jnp.sum(last_oh * end, axis=1, keepdims=True)                                 # [B, 1]
    numer_b = emit_b + start_b + trans_b + end_b                                          # [B, 1]

    # ---- denominator (log partition): forward algorithm, batch-vectorized ----
    # exp(trans) matmul trick keeps alpha as a row-major [B, L] carry
    # (no per-step transposes); fine for moderate transition magnitudes.
    exp_trans = jnp.exp(trans)
    alpha0 = start + logits[0]                                                            # [B, L]

    def step(t, alpha):
        emis_t = logits_ref[t]                    # [B, L]
        mf = mask_ref[t]                          # [B, 1]
        mx = jnp.max(alpha, axis=-1, keepdims=True)
        q = jnp.dot(jnp.exp(alpha - mx), exp_trans, preferred_element_type=jnp.float32)
        nxt = jnp.log(q) + mx + emis_t
        return mf * nxt + (1.0 - mf) * alpha

    alpha = jax.lax.fori_loop(1, Sv, step, alpha0)
    final = alpha + end                                                                   # [B, L]
    fmx = jnp.max(final, axis=-1, keepdims=True)
    denom_b = fmx + jnp.log(jnp.sum(jnp.exp(final - fmx), axis=-1, keepdims=True))        # [B, 1]

    out_ref[...] = jnp.sum(numer_b - denom_b, axis=0, keepdims=True)                      # [1, 1]


def crf_log_likelihood(logits_sm, tags_oh_sm, mask_sm, trans, start, end):
    out = pl.pallas_call(
        _crf_kernel,
        out_shape=jax.ShapeDtypeStruct((1, 1), jnp.float32),
        in_specs=[pl.BlockSpec(memory_space=pltpu.MemorySpace.VMEM)] * 6,
        out_specs=pl.BlockSpec(memory_space=pltpu.MemorySpace.VMEM),
    )(logits_sm, tags_oh_sm, mask_sm, trans, start, end)
    return out[0, 0]


# ---------------- parameter init (deterministic, synthetic) ----------------
def init_params(key):
    keys = iter(jax.random.split(key, 64))

    def nrm(shape, s=0.02):
        return jax.random.normal(next(keys), shape, jnp.float32) * s

    def uni(shape):
        return jax.random.uniform(next(keys), shape, jnp.float32, -0.1, 0.1)

    cls_w = nrm((H, NUM_LABELS))
    p = {
        "word_emb": nrm((VOCAB, H)),
        "pos_emb": nrm((MAXPOS, H)),
        "type_emb": nrm((2, H)),
        "emb_ln_g": jnp.ones((1, H), jnp.float32),
        "emb_ln_b": jnp.zeros((1, H), jnp.float32),
        # per-layer weights stacked along a leading layer axis; QKV fused -> [H, 3H]
        "wqkv": nrm((NUM_LAYERS, H, 3 * H)),
        "bqkv": jnp.zeros((NUM_LAYERS, 1, 3 * H), jnp.float32),
        "wo": nrm((NUM_LAYERS, H, H)),
        "bo": jnp.zeros((NUM_LAYERS, 1, H), jnp.float32),
        "ln1_g": jnp.ones((NUM_LAYERS, 1, H), jnp.float32),
        "ln1_b": jnp.zeros((NUM_LAYERS, 1, H), jnp.float32),
        "w1": nrm((NUM_LAYERS, H, INTER)),
        "b1": jnp.zeros((NUM_LAYERS, 1, INTER), jnp.float32),
        "w2": nrm((NUM_LAYERS, INTER, H)),
        "b2": jnp.zeros((NUM_LAYERS, 1, H), jnp.float32),
        "ln2_g": jnp.ones((NUM_LAYERS, 1, H), jnp.float32),
        "ln2_b": jnp.zeros((NUM_LAYERS, 1, H), jnp.float32),
        # classifier padded to a lane-dense 128-wide output (real labels in cols [:NUM_LABELS])
        "cls_w_pad": jnp.zeros((H, LPAD), jnp.float32).at[:, :NUM_LABELS].set(cls_w),
        "cls_b_pad": jnp.zeros((1, LPAD), jnp.float32),
        "crf_start": uni((1, NUM_LABELS)),
        "crf_end": uni((1, NUM_LABELS)),
        "crf_trans": uni((NUM_LABELS, NUM_LABELS)),
    }
    return p


# ---------------- forward pass ----------------
def bert_crf_forward(params, input_ids, attention_mask, token_type_ids, labels):
    Bv, Sv = input_ids.shape
    pos = jnp.arange(Sv)
    # embedding gathers stay in the JAX wrapper (tiny table lookups)
    emb = (params["word_emb"][input_ids]
           + params["pos_emb"][pos][None, :, :]
           + params["type_emb"][token_type_ids]).reshape(Bv * Sv, H)      # [B*S, H]
    mask_f = attention_mask.astype(jnp.float32)
    mask_bias = (1.0 - mask_f) * -10000.0                                 # [B, S] additive bias

    # one fused kernel: embedding LN + all encoder layers + classifier (lane-dense output)
    logits_pad = encoder_classifier(emb, mask_bias, params)               # [B*S, 128]
    logits = logits_pad[:, :NUM_LABELS].reshape(Bv, Sv, NUM_LABELS)

    # dropout on sequence output: identity (eval mode)

    # CRF prep (time-major layout + one-hot gold tags) done in the wrapper
    logits_sm = jnp.transpose(logits, (1, 0, 2))                          # [S, B, L]
    tags_oh_sm = jnp.transpose(
        jax.nn.one_hot(labels, NUM_LABELS, dtype=jnp.float32), (1, 0, 2)) # [S, B, L]
    mask_sm = jnp.transpose(mask_f, (1, 0))[:, :, None]                   # [S, B, 1]

    llh_sum = crf_log_likelihood(logits_sm, tags_oh_sm, mask_sm,
                                 params["crf_trans"], params["crf_start"], params["crf_end"])
    # module: loss = crf(...) (log-likelihood, reduction='sum'); returns (logits, -1*loss)
    return logits, -llh_sum


if __name__ == "__main__":
    key = jax.random.PRNGKey(0)
    k_par, k_ids, k_lab = jax.random.split(key, 3)

    params = init_params(k_par)
    input_ids = jax.random.randint(k_ids, (B, S), 0, VOCAB, dtype=jnp.int32)
    labels = jax.random.randint(k_lab, (B, S), 0, NUM_LABELS, dtype=jnp.int32)
    token_type_ids = jnp.zeros((B, S), jnp.int32)
    # torchcrf requires mask[:, 0] == 1 ; padding is contiguous at the end
    attention_mask = jnp.array([[1, 1, 1, 1, 1, 1, 1, 1],
                                [1, 1, 1, 1, 1, 0, 0, 0]], jnp.int32)

    fwd = jax.jit(bert_crf_forward)
    logits, nll = fwd(params, input_ids, attention_mask, token_type_ids, labels)
    jax.block_until_ready((logits, nll))
    print("KERNEL_OK")
</pallas_src>

<mosaic_0001>
module attributes {stable_mosaic.version = 11 : i64} {
  func.func @_crf_kernel(%arg0: memref<8x2x5xf32, #tpu.memory_space<vmem>>, %arg1: memref<8x2x5xf32, #tpu.memory_space<vmem>>, %arg2: memref<8x2x1xf32, #tpu.memory_space<vmem>>, %arg3: memref<5x5xf32, #tpu.memory_space<vmem>>, %arg4: memref<1x5xf32, #tpu.memory_space<vmem>>, %arg5: memref<1x5xf32, #tpu.memory_space<vmem>>, %arg6: memref<1x1xf32, #tpu.memory_space<vmem>>) attributes {dimension_semantics = [], scalar_prefetch = 0 : i64, scratch_operands = 0 : i64, tpu.core_type = #tpu.core_type<tc>} {
    %c0 = arith.constant 0 : index
    %c0_0 = arith.constant 0 : index
    %c0_1 = arith.constant 0 : index
    %0 = vector.load %arg0[%c0, %c0_0, %c0_1] : memref<8x2x5xf32, #tpu.memory_space<vmem>>, vector<8x2x5xf32>
    %c0_2 = arith.constant 0 : index
    %c0_3 = arith.constant 0 : index
    %c0_4 = arith.constant 0 : index
    %1 = vector.load %arg1[%c0_2, %c0_3, %c0_4] : memref<8x2x5xf32, #tpu.memory_space<vmem>>, vector<8x2x5xf32>
    %c0_5 = arith.constant 0 : index
    %c0_6 = arith.constant 0 : index
    %c0_7 = arith.constant 0 : index
    %2 = vector.load %arg2[%c0_5, %c0_6, %c0_7] : memref<8x2x1xf32, #tpu.memory_space<vmem>>, vector<8x2x1xf32>
    %c0_8 = arith.constant 0 : index
    %c0_9 = arith.constant 0 : index
    %3 = vector.load %arg3[%c0_8, %c0_9] : memref<5x5xf32, #tpu.memory_space<vmem>>, vector<5x5xf32>
    %c0_10 = arith.constant 0 : index
    %c0_11 = arith.constant 0 : index
    %4 = vector.load %arg4[%c0_10, %c0_11] : memref<1x5xf32, #tpu.memory_space<vmem>>, vector<1x5xf32>
    %c0_12 = arith.constant 0 : index
    %c0_13 = arith.constant 0 : index
    %5 = vector.load %arg5[%c0_12, %c0_13] : memref<1x5xf32, #tpu.memory_space<vmem>>, vector<1x5xf32>
    %6 = arith.mulf %0, %1 : vector<8x2x5xf32>
    %7 = vector.broadcast %2 : vector<8x2x1xf32> to vector<8x2x5xf32>
    %8 = arith.mulf %6, %7 : vector<8x2x5xf32>
    %cst = arith.constant dense<0.000000e+00> : vector<8x2xf32>
    %9 = vector.multi_reduction <add>, %8, %cst [2] : vector<8x2x5xf32> to vector<8x2xf32>
    %10 = vector.shape_cast %9 : vector<8x2xf32> to vector<8x2x1xf32>
    %cst_14 = arith.constant dense<0.000000e+00> : vector<2x1xf32>
    %11 = vector.multi_reduction <add>, %10, %cst_14 [0] : vector<8x2x1xf32> to vector<2x1xf32>
    %12 = vector.extract_strided_slice %1 {offsets = [0, 0, 0], sizes = [1, 2, 5], strides = [1, 1, 1]} : vector<8x2x5xf32> to vector<1x2x5xf32>
    %13 = vector.shape_cast %12 : vector<1x2x5xf32> to vector<2x5xf32>
    %14 = vector.broadcast %4 : vector<1x5xf32> to vector<2x5xf32>
    %15 = arith.mulf %14, %13 : vector<2x5xf32>
    %cst_15 = arith.constant dense<0.000000e+00> : vector<2xf32>
    %16 = vector.multi_reduction <add>, %15, %cst_15 [1] : vector<2x5xf32> to vector<2xf32>
    %17 = vector.shape_cast %16 : vector<2xf32> to vector<2x1xf32>
    %18 = vector.extract_strided_slice %1 {offsets = [0, 0, 0], sizes = [7, 2, 5], strides = [1, 1, 1]} : vector<8x2x5xf32> to vector<7x2x5xf32>
    %19 = vector.shape_cast %18 : vector<7x2x5xf32> to vector<14x5xf32>
    %20 = vector.extract_strided_slice %1 {offsets = [1, 0, 0], sizes = [7, 2, 5], strides = [1, 1, 1]} : vector<8x2x5xf32> to vector<7x2x5xf32>
    %21 = vector.extract_strided_slice %2 {offsets = [1, 0, 0], sizes = [7, 2, 1], strides = [1, 1, 1]} : vector<8x2x1xf32> to vector<7x2x1xf32>
    %22 = vector.broadcast %21 : vector<7x2x1xf32> to vector<7x2x5xf32>
    %23 = arith.mulf %20, %22 : vector<7x2x5xf32>
    %24 = vector.shape_cast %23 : vector<7x2x5xf32> to vector<14x5xf32>
    %cst_16 = arith.constant dense<0.000000e+00> : vector<14x5xf32>
    %25 = tpu.matmul %19, %3, %cst_16 {dimension_numbers = #tpu.dot_dimension_numbers<[1], [0], [0], [1], [0, 0, 1, 1], [], []>} : vector<14x5xf32>, vector<5x5xf32>, vector<14x5xf32> -> vector<14x5xf32>
    %26 = arith.mulf %25, %24 : vector<14x5xf32>
    %27 = vector.shape_cast %26 : vector<14x5xf32> to vector<7x2x5xf32>
    %cst_17 = arith.constant dense<0.000000e+00> : vector<7x2xf32>
    %28 = vector.multi_reduction <add>, %27, %cst_17 [2] : vector<7x2x5xf32> to vector<7x2xf32>
    %29 = vector.shape_cast %28 : vector<7x2xf32> to vector<7x2x1xf32>
    %cst_18 = arith.constant dense<0.000000e+00> : vector<2x1xf32>
    %30 = vector.multi_reduction <add>, %29, %cst_18 [0] : vector<7x2x1xf32> to vector<2x1xf32>
    %31 = vector.broadcast %2 : vector<8x2x1xf32> to vector<8x2x5xf32>
    %32 = arith.mulf %1, %31 : vector<8x2x5xf32>
    %cst_19 = arith.constant dense<0.000000e+00> : vector<2x5xf32>
    %33 = vector.multi_reduction <add>, %32, %cst_19 [0] : vector<8x2x5xf32> to vector<2x5xf32>
    %34 = vector.extract_strided_slice %1 {offsets = [0, 0, 0], sizes = [7, 2, 5], strides = [1, 1, 1]} : vector<8x2x5xf32> to vector<7x2x5xf32>
    %35 = vector.extract_strided_slice %2 {offsets = [1, 0, 0], sizes = [7, 2, 1], strides = [1, 1, 1]} : vector<8x2x1xf32> to vector<7x2x1xf32>
    %36 = vector.broadcast %35 : vector<7x2x1xf32> to vector<7x2x5xf32>
    %37 = arith.mulf %34, %36 : vector<7x2x5xf32>
    %cst_20 = arith.constant dense<0.000000e+00> : vector<2x5xf32>
    %38 = vector.multi_reduction <add>, %37, %cst_20 [0] : vector<7x2x5xf32> to vector<2x5xf32>
    %39 = arith.subf %33, %38 : vector<2x5xf32>
    %40 = vector.broadcast %5 : vector<1x5xf32> to vector<2x5xf32>
    %41 = arith.mulf %39, %40 : vector<2x5xf32>
    %cst_21 = arith.constant dense<0.000000e+00> : vector<2xf32>
    %42 = vector.multi_reduction <add>, %41, %cst_21 [1] : vector<2x5xf32> to vector<2xf32>
    %43 = vector.shape_cast %42 : vector<2xf32> to vector<2x1xf32>
    %44 = arith.addf %11, %17 : vector<2x1xf32>
    %45 = arith.addf %44, %30 : vector<2x1xf32>
    %46 = arith.addf %45, %43 : vector<2x1xf32>
    %47 = math.exp %3 : vector<5x5xf32>
    %48 = vector.extract_strided_slice %0 {offsets = [0, 0, 0], sizes = [1, 2, 5], strides = [1, 1, 1]} : vector<8x2x5xf32> to vector<1x2x5xf32>
    %49 = vector.shape_cast %48 : vector<1x2x5xf32> to vector<2x5xf32>
    %50 = vector.broadcast %4 : vector<1x5xf32> to vector<2x5xf32>
    %51 = arith.addf %50, %49 : vector<2x5xf32>
    %c1_i32 = arith.constant 1 : i32
    %c7_i32 = arith.constant 7 : i32
    %52 = arith.addi %c1_i32, %c7_i32 : i32
    %c1_i32_22 = arith.constant 1 : i32
    %53 = scf.for %arg7 = %c1_i32 to %52 step %c1_i32_22 iter_args(%arg8 = %51) -> (vector<2x5xf32>)  : i32 {
      %69 = arith.index_cast %arg7 : i32 to index
      %c0_29 = arith.constant 0 : index
      %c0_30 = arith.constant 0 : index
      %70 = vector.load %arg0[%69, %c0_29, %c0_30] : memref<8x2x5xf32, #tpu.memory_space<vmem>>, vector<1x2x5xf32>
      %71 = vector.shape_cast %70 : vector<1x2x5xf32> to vector<2x5xf32>
      %72 = arith.index_cast %arg7 : i32 to index
      %c0_31 = arith.constant 0 : index
      %c0_32 = arith.constant 0 : index
      %73 = vector.load %arg2[%72, %c0_31, %c0_32] : memref<8x2x1xf32, #tpu.memory_space<vmem>>, vector<1x2x1xf32>
      %74 = vector.shape_cast %73 : vector<1x2x1xf32> to vector<2x1xf32>
      %cst_33 = arith.constant dense<0xFF800000> : vector<2xf32>
      %75 = vector.multi_reduction <maximumf>, %arg8, %cst_33 [1] : vector<2x5xf32> to vector<2xf32>
      %76 = vector.shape_cast %75 : vector<2xf32> to vector<2x1xf32>
      %77 = vector.broadcast %76 : vector<2x1xf32> to vector<2x5xf32>
      %78 = arith.subf %arg8, %77 : vector<2x5xf32>
      %79 = math.exp %78 : vector<2x5xf32>
      %cst_34 = arith.constant dense<0.000000e+00> : vector<2x5xf32>
      %80 = tpu.matmul %79, %47, %cst_34 {dimension_numbers = #tpu.dot_dimension_numbers<[1], [0], [0], [1], [0, 0, 1, 1], [], []>} : vector<2x5xf32>, vector<5x5xf32>, vector<2x5xf32> -> vector<2x5xf32>
      %81 = math.log %80 : vector<2x5xf32>
      %82 = vector.broadcast %76 : vector<2x1xf32> to vector<2x5xf32>
      %83 = arith.addf %81, %82 : vector<2x5xf32>
      %84 = arith.addf %83, %71 : vector<2x5xf32>
      %85 = vector.broadcast %74 : vector<2x1xf32> to vector<2x5xf32>
      %86 = arith.mulf %85, %84 : vector<2x5xf32>
      %cst_35 = arith.constant 1.000000e+00 : f32
      %87 = vector.broadcast %cst_35 : f32 to vector<2x1xf32>
      %88 = arith.subf %87, %74 : vector<2x1xf32>
      %89 = vector.broadcast %88 : vector<2x1xf32> to vector<2x5xf32>
      %90 = arith.mulf %89, %arg8 : vector<2x5xf32>
      %91 = arith.addf %86, %90 : vector<2x5xf32>
      scf.yield %91 : vector<2x5xf32>
    }
    %c7_i32_23 = arith.constant 7 : i32
    %54 = vector.broadcast %5 : vector<1x5xf32> to vector<2x5xf32>
    %55 = arith.addf %53, %54 : vector<2x5xf32>
    %cst_24 = arith.constant dense<0xFF800000> : vector<2xf32>
    %56 = vector.multi_reduction <maximumf>, %55, %cst_24 [1] : vector<2x5xf32> to vector<2xf32>
    %57 = vector.shape_cast %56 : vector<2xf32> to vector<2x1xf32>
    %58 = vector.broadcast %57 : vector<2x1xf32> to vector<2x5xf32>
    %59 = arith.subf %55, %58 : vector<2x5xf32>
    %60 = math.exp %59 : vector<2x5xf32>
    %cst_25 = arith.constant dense<0.000000e+00> : vector<2xf32>
    %61 = vector.multi_reduction <add>, %60, %cst_25 [1] : vector<2x5xf32> to vector<2xf32>
    %62 = vector.shape_cast %61 : vector<2xf32> to vector<2x1xf32>
    %63 = math.log %62 : vector<2x1xf32>
    %64 = arith.addf %57, %63 : vector<2x1xf32>
    %65 = arith.subf %46, %64 : vector<2x1xf32>
    %cst_26 = arith.constant dense<0.000000e+00> : vector<1xf32>
    %66 = vector.multi_reduction <add>, %65, %cst_26 [0] : vector<2x1xf32> to vector<1xf32>
    %67 = vector.shape_cast %66 : vector<1xf32> to vector<1x1xf32>
    %c0_27 = arith.constant 0 : index
    %c0_28 = arith.constant 0 : index
    %68 = vector.load %arg6[%c0_27, %c0_28] : memref<1x1xf32, #tpu.memory_space<vmem>>, vector<1x1xf32>
    tpu.vector_store %arg6[%c0_27, %c0_28], %67 {strides = array<i32>} : memref<1x1xf32, #tpu.memory_space<vmem>>, vector<1x1xf32>,
    return
  }
}

module attributes {stable_mosaic.version = 11 : i64} {
  func.func @_encoder_kernel(%arg0: memref<16x32xf32, #tpu.memory_space<vmem>>, %arg1: memref<2x8xf32, #tpu.memory_space<vmem>>, %arg2: memref<1x32xf32, #tpu.memory_space<vmem>>, %arg3: memref<1x32xf32, #tpu.memory_space<vmem>>, %arg4: memref<2x32x96xf32, #tpu.memory_space<vmem>>, %arg5: memref<2x1x96xf32, #tpu.memory_space<vmem>>, %arg6: memref<2x32x32xf32, #tpu.memory_space<vmem>>, %arg7: memref<2x1x32xf32, #tpu.memory_space<vmem>>, %arg8: memref<2x1x32xf32, #tpu.memory_space<vmem>>, %arg9: memref<2x1x32xf32, #tpu.memory_space<vmem>>, %arg10: memref<2x32x64xf32, #tpu.memory_space<vmem>>, %arg11: memref<2x1x64xf32, #tpu.memory_space<vmem>>, %arg12: memref<2x64x32xf32, #tpu.memory_space<vmem>>, %arg13: memref<2x1x32xf32, #tpu.memory_space<vmem>>, %arg14: memref<2x1x32xf32, #tpu.memory_space<vmem>>, %arg15: memref<2x1x32xf32, #tpu.memory_space<vmem>>, %arg16: memref<32x128xf32, #tpu.memory_space<vmem>>, %arg17: memref<1x128xf32, #tpu.memory_space<vmem>>, %arg18: memref<16x128xf32, #tpu.memory_space<vmem>>) attributes {dimension_semantics = [], scalar_prefetch = 0 : i64, scratch_operands = 0 : i64, tpu.core_type = #tpu.core_type<tc>} {
    %c0 = arith.constant 0 : index
    %c0_0 = arith.constant 0 : index
    %0 = vector.load %arg0[%c0, %c0_0] : memref<16x32xf32, #tpu.memory_space<vmem>>, vector<16x32xf32>
    %c0_1 = arith.constant 0 : index
    %c0_2 = arith.constant 0 : index
    %1 = vector.load %arg2[%c0_1, %c0_2] : memref<1x32xf32, #tpu.memory_space<vmem>>, vector<1x32xf32>
    %c0_3 = arith.constant 0 : index
    %c0_4 = arith.constant 0 : index
    %2 = vector.load %arg3[%c0_3, %c0_4] : memref<1x32xf32, #tpu.memory_space<vmem>>, vector<1x32xf32>
    %cst = arith.constant dense<0.000000e+00> : vector<16xf32>
    %3 = vector.multi_reduction <add>, %0, %cst [1] : vector<16x32xf32> to vector<16xf32>
    %4 = vector.shape_cast %3 : vector<16xf32> to vector<16x1xf32>
    %cst_5 = arith.constant 3.200000e+01 : f32
    %5 = vector.broadcast %cst_5 : f32 to vector<16x1xf32>
    %6 = arith.divf %4, %5 : vector<16x1xf32>
    %7 = vector.broadcast %6 : vector<16x1xf32> to vector<16x32xf32>
    %8 = arith.subf %0, %7 : vector<16x32xf32>
    %9 = arith.mulf %8, %8 : vector<16x32xf32>
    %cst_6 = arith.constant dense<0.000000e+00> : vector<16xf32>
    %10 = vector.multi_reduction <add>, %9, %cst_6 [1] : vector<16x32xf32> to vector<16xf32>
    %11 = vector.shape_cast %10 : vector<16xf32> to vector<16x1xf32>
    %cst_7 = arith.constant 3.200000e+01 : f32
    %12 = vector.broadcast %cst_7 : f32 to vector<16x1xf32>
    %13 = arith.divf %11, %12 : vector<16x1xf32>
    %14 = vector.broadcast %6 : vector<16x1xf32> to vector<16x32xf32>
    %15 = arith.subf %0, %14 : vector<16x32xf32>
    %cst_8 = arith.constant 9.99999996E-13 : f32
    %16 = vector.broadcast %cst_8 : f32 to vector<16x1xf32>
    %17 = arith.addf %13, %16 : vector<16x1xf32>
    %18 = math.rsqrt %17 : vector<16x1xf32>
    %19 = vector.broadcast %18 : vector<16x1xf32> to vector<16x32xf32>
    %20 = arith.mulf %15, %19 : vector<16x32xf32>
    %21 = vector.broadcast %1 : vector<1x32xf32> to vector<16x32xf32>
    %22 = arith.mulf %20, %21 : vector<16x32xf32>
    %23 = vector.broadcast %2 : vector<1x32xf32> to vector<16x32xf32>
    %24 = arith.addf %22, %23 : vector<16x32xf32>
    %c0_9 = arith.constant 0 : index
    %c0_10 = arith.constant 0 : index
    %25 = vector.load %arg1[%c0_9, %c0_10] : memref<2x8xf32, #tpu.memory_space<vmem>>, vector<2x8xf32>
    %26 = vector.shape_cast %25 : vector<2x8xf32> to vector<2x1x8xf32>
    %c0_11 = arith.constant 0 : index
    %c0_12 = arith.constant 0 : index
    %c0_13 = arith.constant 0 : index
    %27 = vector.load %arg4[%c0_11, %c0_12, %c0_13] : memref<2x32x96xf32, #tpu.memory_space<vmem>>, vector<1x32x96xf32>
    %28 = vector.shape_cast %27 : vector<1x32x96xf32> to vector<32x96xf32>
    %cst_14 = arith.constant dense<0.000000e+00> : vector<16x96xf32>
    %29 = tpu.matmul %24, %28, %cst_14 {dimension_numbers = #tpu.dot_dimension_numbers<[1], [0], [0], [1], [0, 0, 1, 1], [], []>} : vector<16x32xf32>, vector<32x96xf32>, vector<16x96xf32> -> vector<16x96xf32>
    %c0_15 = arith.constant 0 : index
    %c0_16 = arith.constant 0 : index
    %c0_17 = arith.constant 0 : index
    %30 = vector.load %arg5[%c0_15, %c0_16, %c0_17] : memref<2x1x96xf32, #tpu.memory_space<vmem>>, vector<1x1x96xf32>
    %31 = vector.shape_cast %30 : vector<1x1x96xf32> to vector<1x96xf32>
    %32 = vector.broadcast %31 : vector<1x96xf32> to vector<16x96xf32>
    %33 = arith.addf %29, %32 : vector<16x96xf32>
    %34 = vector.extract_strided_slice %33 {offsets = [0, 0], sizes = [16, 8], strides = [1, 1]} : vector<16x96xf32> to vector<16x8xf32>
    %35 = vector.shape_cast %34 : vector<16x8xf32> to vector<2x8x8xf32>
    %36 = vector.extract_strided_slice %33 {offsets = [0, 32], sizes = [16, 8], strides = [1, 1]} : vector<16x96xf32> to vector<16x8xf32>
    %37 = vector.shape_cast %36 : vector<16x8xf32> to vector<2x8x8xf32>
    %38 = vector.extract_strided_slice %33 {offsets = [0, 64], sizes = [16, 8], strides = [1, 1]} : vector<16x96xf32> to vector<16x8xf32>
    %39 = vector.shape_cast %38 : vector<16x8xf32> to vector<2x8x8xf32>
    "tpu.trace_start"() <{level = 10 : i32, message = "bqd,bkd->bqk"}> : () -> ()
    %cst_18 = arith.constant dense<0.000000e+00> : vector<2x8x8xf32>
    %40 = tpu.matmul %35, %37, %cst_18 {dimension_numbers = #tpu.dot_dimension_numbers<[2], [2], [1], [1], [0, 0, 0, 1, 1, 1], [0], [0]>} : vector<2x8x8xf32>, vector<2x8x8xf32>, vector<2x8x8xf32> -> vector<2x8x8xf32>
    "tpu.trace_stop"() : () -> ()
    %cst_19 = arith.constant 0.353553385 : f32
    %41 = vector.broadcast %cst_19 : f32 to vector<2x8x8xf32>
    %42 = arith.mulf %40, %41 : vector<2x8x8xf32>
    %43 = vector.broadcast %26 : vector<2x1x8xf32> to vector<2x8x8xf32>
    %44 = arith.addf %42, %43 : vector<2x8x8xf32>
    %cst_20 = arith.constant dense<0xFF800000> : vector<2x8xf32>
    %45 = vector.multi_reduction <maximumf>, %44, %cst_20 [2] : vector<2x8x8xf32> to vector<2x8xf32>
    %46 = vector.shape_cast %45 : vector<2x8xf32> to vector<2x8x1xf32>
    %47 = vector.broadcast %46 : vector<2x8x1xf32> to vector<2x8x8xf32>
    %48 = arith.subf %44, %47 : vector<2x8x8xf32>
    %49 = math.exp %48 : vector<2x8x8xf32>
    %cst_21 = arith.constant dense<0.000000e+00> : vector<2x8xf32>
    %50 = vector.multi_reduction <add>, %49, %cst_21 [2] : vector<2x8x8xf32> to vector<2x8xf32>
    %51 = vector.shape_cast %50 : vector<2x8xf32> to vector<2x8x1xf32>
    %52 = tpu.reciprocal %51 {approx = true} : vector<2x8x1xf32> -> vector<2x8x1xf32>
    %53 = vector.broadcast %52 : vector<2x8x1xf32> to vector<2x8x8xf32>
    %54 = arith.mulf %49, %53 : vector<2x8x8xf32>
    "tpu.trace_start"() <{level = 10 : i32, message = "bqk,bkd->bqd"}> : () -> ()
    %cst_22 = arith.constant dense<0.000000e+00> : vector<2x8x8xf32>
    %55 = tpu.matmul %54, %39, %cst_22 {dimension_numbers = #tpu.dot_dimension_numbers<[2], [1], [1], [2], [0, 0, 0, 1, 1, 2], [0], [0]>} : vector<2x8x8xf32>, vector<2x8x8xf32>, vector<2x8x8xf32> -> vector<2x8x8xf32>
    "tpu.trace_stop"() : () -> ()
    %56 = vector.shape_cast %55 : vector<2x8x8xf32> to vector<16x8xf32>
    %57 = vector.extract_strided_slice %33 {offsets = [0, 8], sizes = [16, 8], strides = [1, 1]} : vector<16x96xf32> to vector<16x8xf32>
    %58 = vector.shape_cast %57 : vector<16x8xf32> to vector<2x8x8xf32>
    %59 = vector.extract_strided_slice %33 {offsets = [0, 40], sizes = [16, 8], strides = [1, 1]} : vector<16x96xf32> to vector<16x8xf32>
    %60 = vector.shape_cast %59 : vector<16x8xf32> to vector<2x8x8xf32>
    %61 = vector.extract_strided_slice %33 {offsets = [0, 72], sizes = [16, 8], strides = [1, 1]} : vector<16x96xf32> to vector<16x8xf32>
    %62 = vector.shape_cast %61 : vector<16x8xf32> to vector<2x8x8xf32>
    "tpu.trace_start"() <{level = 10 : i32, message = "bqd,bkd->bqk"}> : () -> ()
    %cst_23 = arith.constant dense<0.000000e+00> : vector<2x8x8xf32>
    %63 = tpu.matmul %58, %60, %cst_23 {dimension_numbers = #tpu.dot_dimension_numbers<[2], [2], [1], [1], [0, 0, 0, 1, 1, 1], [0], [0]>} : vector<2x8x8xf32>, vector<2x8x8xf32>, vector<2x8x8xf32> -> vector<2x8x8xf32>
    "tpu.trace_stop"() : () -> ()
    %cst_24 = arith.constant 0.353553385 : f32
    %64 = vector.broadcast %cst_24 : f32 to vector<2x8x8xf32>
    %65 = arith.mulf %63, %64 : vector<2x8x8xf32>
    %66 = vector.broadcast %26 : vector<2x1x8xf32> to vector<2x8x8xf32>
    %67 = arith.addf %65, %66 : vector<2x8x8xf32>
    %cst_25 = arith.constant dense<0xFF800000> : vector<2x8xf32>
    %68 = vector.multi_reduction <maximumf>, %67, %cst_25 [2] : vector<2x8x8xf32> to vector<2x8xf32>
    %69 = vector.shape_cast %68 : vector<2x8xf32> to vector<2x8x1xf32>
    %70 = vector.broadcast %69 : vector<2x8x1xf32> to vector<2x8x8xf32>
    %71 = arith.subf %67, %70 : vector<2x8x8xf32>
    %72 = math.exp %71 : vector<2x8x8xf32>
    %cst_26 = arith.constant dense<0.000000e+00> : vector<2x8xf32>
    %73 = vector.multi_reduction <add>, %72, %cst_26 [2] : vector<2x8x8xf32> to vector<2x8xf32>
    %74 = vector.shape_cast %73 : vector<2x8xf32> to vector<2x8x1xf32>
    %75 = tpu.reciprocal %74 {approx = true} : vector<2x8x1xf32> -> vector<2x8x1xf32>
    %76 = vector.broadcast %75 : vector<2x8x1xf32> to vector<2x8x8xf32>
    %77 = arith.mulf %72, %76 : vector<2x8x8xf32>
    "tpu.trace_start"() <{level = 10 : i32, message = "bqk,bkd->bqd"}> : () -> ()
    %cst_27 = arith.constant dense<0.000000e+00> : vector<2x8x8xf32>
    %78 = tpu.matmul %77, %62, %cst_27 {dimension_numbers = #tpu.dot_dimension_numbers<[2], [1], [1], [2], [0, 0, 0, 1, 1, 2], [0], [0]>} : vector<2x8x8xf32>, vector<2x8x8xf32>, vector<2x8x8xf32> -> vector<2x8x8xf32>
    "tpu.trace_stop"() : () -> ()
    %79 = vector.shape_cast %78 : vector<2x8x8xf32> to vector<16x8xf32>
    %80 = vector.extract_strided_slice %33 {offsets = [0, 16], sizes = [16, 8], strides = [1, 1]} : vector<16x96xf32> to vector<16x8xf32>
    %81 = vector.shape_cast %80 : vector<16x8xf32> to vector<2x8x8xf32>
    %82 = vector.extract_strided_slice %33 {offsets = [0, 48], sizes = [16, 8], strides = [1, 1]} : vector<16x96xf32> to vector<16x8xf32>
    %83 = vector.shape_cast %82 : vector<16x8xf32> to vector<2x8x8xf32>
    %84 = vector.extract_strided_slice %33 {offsets = [0, 80], sizes = [16, 8], strides = [1, 1]} : vector<16x96xf32> to vector<16x8xf32>
    %85 = vector.shape_cast %84 : vector<16x8xf32> to vector<2x8x8xf32>
    "tpu.trace_start"() <{level = 10 : i32, message = "bqd,bkd->bqk"}> : () -> ()
    %cst_28 = arith.constant dense<0.000000e+00> : vector<2x8x8xf32>
    %86 = tpu.matmul %81, %83, %cst_28 {dimension_numbers = #tpu.dot_dimension_numbers<[2], [2], [1], [1], [0, 0, 0, 1, 1, 1], [0], [0]>} : vector<2x8x8xf32>, vector<2x8x8xf32>, vector<2x8x8xf32> -> vector<2x8x8xf32>
    "tpu.trace_stop"() : () -> ()
    %cst_29 = arith.constant 0.353553385 : f32
    %87 = vector.broadcast %cst_29 : f32 to vector<2x8x8xf32>
    %88 = arith.mulf %86, %87 : vector<2x8x8xf32>
    %89 = vector.broadcast %26 : vector<2x1x8xf32> to vector<2x8x8xf32>
    %90 = arith.addf %88, %89 : vector<2x8x8xf32>
    %cst_30 = arith.constant dense<0xFF800000> : vector<2x8xf32>
    %91 = vector.multi_reduction <maximumf>, %90, %cst_30 [2] : vector<2x8x8xf32> to vector<2x8xf32>
    %92 = vector.shape_cast %91 : vector<2x8xf32> to vector<2x8x1xf32>
    %93 = vector.broadcast %92 : vector<2x8x1xf32> to vector<2x8x8xf32>
    %94 = arith.subf %90, %93 : vector<2x8x8xf32>
    %95 = math.exp %94 : vector<2x8x8xf32>
    %cst_31 = arith.constant dense<0.000000e+00> : vector<2x8xf32>
    %96 = vector.multi_reduction <add>, %95, %cst_31 [2] : vector<2x8x8xf32> to vector<2x8xf32>
    %97 = vector.shape_cast %96 : vector<2x8xf32> to vector<2x8x1xf32>
    %98 = tpu.reciprocal %97 {approx = true} : vector<2x8x1xf32> -> vector<2x8x1xf32>
    %99 = vector.broadcast %98 : vector<2x8x1xf32> to vector<2x8x8xf32>
    %100 = arith.mulf %95, %99 : vector<2x8x8xf32>
    "tpu.trace_start"() <{level = 10 : i32, message = "bqk,bkd->bqd"}> : () -> ()
    %cst_32 = arith.constant dense<0.000000e+00> : vector<2x8x8xf32>
    %101 = tpu.matmul %100, %85, %cst_32 {dimension_numbers = #tpu.dot_dimension_numbers<[2], [1], [1], [2], [0, 0, 0, 1, 1, 2], [0], [0]>} : vector<2x8x8xf32>, vector<2x8x8xf32>, vector<2x8x8xf32> -> vector<2x8x8xf32>
    "tpu.trace_stop"() : () -> ()
    %102 = vector.shape_cast %101 : vector<2x8x8xf32> to vector<16x8xf32>
    %103 = vector.extract_strided_slice %33 {offsets = [0, 24], sizes = [16, 8], strides = [1, 1]} : vector<16x96xf32> to vector<16x8xf32>
    %104 = vector.shape_cast %103 : vector<16x8xf32> to vector<2x8x8xf32>
    %105 = vector.extract_strided_slice %33 {offsets = [0, 56], sizes = [16, 8], strides = [1, 1]} : vector<16x96xf32> to vector<16x8xf32>
    %106 = vector.shape_cast %105 : vector<16x8xf32> to vector<2x8x8xf32>
    %107 = vector.extract_strided_slice %33 {offsets = [0, 88], sizes = [16, 8], strides = [1, 1]} : vector<16x96xf32> to vector<16x8xf32>
    %108 = vector.shape_cast %107 : vector<16x8xf32> to vector<2x8x8xf32>
    "tpu.trace_start"() <{level = 10 : i32, message = "bqd,bkd->bqk"}> : () -> ()
    %cst_33 = arith.constant dense<0.000000e+00> : vector<2x8x8xf32>
    %109 = tpu.matmul %104, %106, %cst_33 {dimension_numbers = #tpu.dot_dimension_numbers<[2], [2], [1], [1], [0, 0, 0, 1, 1, 1], [0], [0]>} : vector<2x8x8xf32>, vector<2x8x8xf32>, vector<2x8x8xf32> -> vector<2x8x8xf32>
    "tpu.trace_stop"() : () -> ()
    %cst_34 = arith.constant 0.353553385 : f32
    %110 = vector.broadcast %cst_34 : f32 to vector<2x8x8xf32>
    %111 = arith.mulf %109, %110 : vector<2x8x8xf32>
    %112 = vector.broadcast %26 : vector<2x1x8xf32> to vector<2x8x8xf32>
    %113 = arith.addf %111, %112 : vector<2x8x8xf32>
    %cst_35 = arith.constant dense<0xFF800000> : vector<2x8xf32>
    %114 = vector.multi_reduction <maximumf>, %113, %cst_35 [2] : vector<2x8x8xf32> to vector<2x8xf32>
    %115 = vector.shape_cast %114 : vector<2x8xf32> to vector<2x8x1xf32>
    %116 = vector.broadcast %115 : vector<2x8x1xf32> to vector<2x8x8xf32>
    %117 = arith.subf %113, %116 : vector<2x8x8xf32>
    %118 = math.exp %117 : vector<2x8x8xf32>
    %cst_36 = arith.constant dense<0.000000e+00> : vector<2x8xf32>
    %119 = vector.multi_reduction <add>, %118, %cst_36 [2] : vector<2x8x8xf32> to vector<2x8xf32>
    %120 = vector.shape_cast %119 : vector<2x8xf32> to vector<2x8x1xf32>
    %121 = tpu.reciprocal %120 {approx = true} : vector<2x8x1xf32> -> vector<2x8x1xf32>
    %122 = vector.broadcast %121 : vector<2x8x1xf32> to vector<2x8x8xf32>
    %123 = arith.mulf %118, %122 : vector<2x8x8xf32>
    "tpu.trace_start"() <{level = 10 : i32, message = "bqk,bkd->bqd"}> : () -> ()
    %cst_37 = arith.constant dense<0.000000e+00> : vector<2x8x8xf32>
    %124 = tpu.matmul %123, %108, %cst_37 {dimension_numbers = #tpu.dot_dimension_numbers<[2], [1], [1], [2], [0, 0, 0, 1, 1, 2], [0], [0]>} : vector<2x8x8xf32>, vector<2x8x8xf32>, vector<2x8x8xf32> -> vector<2x8x8xf32>
    "tpu.trace_stop"() : () -> ()
    %125 = vector.shape_cast %124 : vector<2x8x8xf32> to vector<16x8xf32>
    %126 = tpu.concatenate %56, %79, %102, %125 in 1 : vector<16x8xf32>, vector<16x8xf32>, vector<16x8xf32>, vector<16x8xf32> -> vector<16x32xf32>
    %c0_38 = arith.constant 0 : index
    %c0_39 = arith.constant 0 : index
    %c0_40 = arith.constant 0 : index
    %127 = vector.load %arg6[%c0_38, %c0_39, %c0_40] : memref<2x32x32xf32, #tpu.memory_space<vmem>>, vector<1x32x32xf32>
    %128 = vector.shape_cast %127 : vector<1x32x32xf32> to vector<32x32xf32>
    %cst_41 = arith.constant dense<0.000000e+00> : vector<16x32xf32>
    %129 = tpu.matmul %126, %128, %cst_41 {dimension_numbers = #tpu.dot_dimension_numbers<[1], [0], [0], [1], [0, 0, 1, 1], [], []>} : vector<16x32xf32>, vector<32x32xf32>, vector<16x32xf32> -> vector<16x32xf32>
    %c0_42 = arith.constant 0 : index
    %c0_43 = arith.constant 0 : index
    %c0_44 = arith.constant 0 : index
    %130 = vector.load %arg7[%c0_42, %c0_43, %c0_44] : memref<2x1x32xf32, #tpu.memory_space<vmem>>, vector<1x1x32xf32>
    %131 = vector.shape_cast %130 : vector<1x1x32xf32> to vector<1x32xf32>
    %132 = vector.broadcast %131 : vector<1x32xf32> to vector<16x32xf32>
    %133 = arith.addf %129, %132 : vector<16x32xf32>
    %134 = arith.addf %133, %24 : vector<16x32xf32>
    %c0_45 = arith.constant 0 : index
    %c0_46 = arith.constant 0 : index
    %c0_47 = arith.constant 0 : index
    %135 = vector.load %arg8[%c0_45, %c0_46, %c0_47] : memref<2x1x32xf32, #tpu.memory_space<vmem>>, vector<1x1x32xf32>
    %136 = vector.shape_cast %135 : vector<1x1x32xf32> to vector<1x32xf32>
    %c0_48 = arith.constant 0 : index
    %c0_49 = arith.constant 0 : index
    %c0_50 = arith.constant 0 : index
    %137 = vector.load %arg9[%c0_48, %c0_49, %c0_50] : memref<2x1x32xf32, #tpu.memory_space<vmem>>, vector<1x1x32xf32>
    %138 = vector.shape_cast %137 : vector<1x1x32xf32> to vector<1x32xf32>
    %cst_51 = arith.constant dense<0.000000e+00> : vector<16xf32>
    %139 = vector.multi_reduction <add>, %134, %cst_51 [1] : vector<16x32xf32> to vector<16xf32>
    %140 = vector.shape_cast %139 : vector<16xf32> to vector<16x1xf32>
    %cst_52 = arith.constant 3.200000e+01 : f32
    %141 = vector.broadcast %cst_52 : f32 to vector<16x1xf32>
    %142 = arith.divf %140, %141 : vector<16x1xf32>
    %143 = vector.broadcast %142 : vector<16x1xf32> to vector<16x32xf32>
    %144 = arith.subf %134, %143 : vector<16x32xf32>
    %145 = arith.mulf %144, %144 : vector<16x32xf32>
    %cst_53 = arith.constant dense<0.000000e+00> : vector<16xf32>
    %146 = vector.multi_reduction <add>, %145, %cst_53 [1] : vector<16x32xf32> to vector<16xf32>
    %147 = vector.shape_cast %146 : vector<16xf32> to vector<16x1xf32>
    %cst_54 = arith.constant 3.200000e+01 : f32
    %148 = vector.broadcast %cst_54 : f32 to vector<16x1xf32>
    %149 = arith.divf %147, %148 : vector<16x1xf32>
    %150 = vector.broadcast %142 : vector<16x1xf32> to vector<16x32xf32>
    %151 = arith.subf %134, %150 : vector<16x32xf32>
    %cst_55 = arith.constant 9.99999996E-13 : f32
    %152 = vector.broadcast %cst_55 : f32 to vector<16x1xf32>
    %153 = arith.addf %149, %152 : vector<16x1xf32>
    %154 = math.rsqrt %153 : vector<16x1xf32>
    %155 = vector.broadcast %154 : vector<16x1xf32> to vector<16x32xf32>
    %156 = arith.mulf %151, %155 : vector<16x32xf32>
    %157 = vector.broadcast %136 : vector<1x32xf32> to vector<16x32xf32>
    %158 = arith.mulf %156, %157 : vector<16x32xf32>
    %159 = vector.broadcast %138 : vector<1x32xf32> to vector<16x32xf32>
    %160 = arith.addf %158, %159 : vector<16x32xf32>
    %c0_56 = arith.constant 0 : index
    %c0_57 = arith.constant 0 : index
    %c0_58 = arith.constant 0 : index
    %161 = vector.load %arg10[%c0_56, %c0_57, %c0_58] : memref<2x32x64xf32, #tpu.memory_space<vmem>>, vector<1x32x64xf32>
    %162 = vector.shape_cast %161 : vector<1x32x64xf32> to vector<32x64xf32>
    %cst_59 = arith.constant dense<0.000000e+00> : vector<16x64xf32>
    %163 = tpu.matmul %160, %162, %cst_59 {dimension_numbers = #tpu.dot_dimension_numbers<[1], [0], [0], [1], [0, 0, 1, 1], [], []>} : vector<16x32xf32>, vector<32x64xf32>, vector<16x64xf32> -> vector<16x64xf32>
    %c0_60 = arith.constant 0 : index
    %c0_61 = arith.constant 0 : index
    %c0_62 = arith.constant 0 : index
    %164 = vector.load %arg11[%c0_60, %c0_61, %c0_62] : memref<2x1x64xf32, #tpu.memory_space<vmem>>, vector<1x1x64xf32>
    %165 = vector.shape_cast %164 : vector<1x1x64xf32> to vector<1x64xf32>
    %166 = vector.broadcast %165 : vector<1x64xf32> to vector<16x64xf32>
    %167 = arith.addf %163, %166 : vector<16x64xf32>
    %cst_63 = arith.constant 5.000000e-01 : f32
    %168 = vector.broadcast %cst_63 : f32 to vector<16x64xf32>
    %169 = arith.mulf %168, %167 : vector<16x64xf32>
    %cst_64 = arith.constant 4.471500e-02 : f32
    %170 = vector.broadcast %cst_64 : f32 to vector<16x64xf32>
    %171 = arith.mulf %170, %167 : vector<16x64xf32>
    %172 = arith.mulf %171, %167 : vector<16x64xf32>
    %173 = arith.mulf %172, %167 : vector<16x64xf32>
    %174 = arith.addf %167, %173 : vector<16x64xf32>
    %cst_65 = arith.constant 0.797884583 : f32
    %175 = vector.broadcast %cst_65 : f32 to vector<16x64xf32>
    %176 = arith.mulf %175, %174 : vector<16x64xf32>
    %177 = math.tanh %176 : vector<16x64xf32>
    %cst_66 = arith.constant 1.000000e+00 : f32
    %178 = vector.broadcast %cst_66 : f32 to vector<16x64xf32>
    %179 = arith.addf %178, %177 : vector<16x64xf32>
    %180 = arith.mulf %169, %179 : vector<16x64xf32>
    %c0_67 = arith.constant 0 : index
    %c0_68 = arith.constant 0 : index
    %c0_69 = arith.constant 0 : index
    %181 = vector.load %arg12[%c0_67, %c0_68, %c0_69] : memref<2x64x32xf32, #tpu.memory_space<vmem>>, vector<1x64x32xf32>
    %182 = vector.shape_cast %181 : vector<1x64x32xf32> to vector<64x32xf32>
    %cst_70 = arith.constant dense<0.000000e+00> : vector<16x32xf32>
    %183 = tpu.matmul %180, %182, %cst_70 {dimension_numbers = #tpu.dot_dimension_numbers<[1], [0], [0], [1], [0, 0, 1, 1], [], []>} : vector<16x64xf32>, vector<64x32xf32>, vector<16x32xf32> -> vector<16x32xf32>
    %c0_71 = arith.constant 0 : index
    %c0_72 = arith.constant 0 : index
    %c0_73 = arith.constant 0 : index
    %184 = vector.load %arg13[%c0_71, %c0_72, %c0_73] : memref<2x1x32xf32, #tpu.memory_space<vmem>>, vector<1x1x32xf32>
    %185 = vector.shape_cast %184 : vector<1x1x32xf32> to vector<1x32xf32>
    %186 = vector.broadcast %185 : vector<1x32xf32> to vector<16x32xf32>
    %187 = arith.addf %183, %186 : vector<16x32xf32>
    %188 = arith.addf %187, %160 : vector<16x32xf32>
    %c0_74 = arith.constant 0 : index
    %c0_75 = arith.constant 0 : index
    %c0_76 = arith.constant 0 : index
    %189 = vector.load %arg14[%c0_74, %c0_75, %c0_76] : memref<2x1x32xf32, #tpu.memory_space<vmem>>, vector<1x1x32xf32>
    %190 = vector.shape_cast %189 : vector<1x1x32xf32> to vector<1x32xf32>
    %c0_77 = arith.constant 0 : index
    %c0_78 = arith.constant 0 : index
    %c0_79 = arith.constant 0 : index
    %191 = vector.load %arg15[%c0_77, %c0_78, %c0_79] : memref<2x1x32xf32, #tpu.memory_space<vmem>>, vector<1x1x32xf32>
    %192 = vector.shape_cast %191 : vector<1x1x32xf32> to vector<1x32xf32>
    %cst_80 = arith.constant dense<0.000000e+00> : vector<16xf32>
    %193 = vector.multi_reduction <add>, %188, %cst_80 [1] : vector<16x32xf32> to vector<16xf32>
    %194 = vector.shape_cast %193 : vector<16xf32> to vector<16x1xf32>
    %cst_81 = arith.constant 3.200000e+01 : f32
    %195 = vector.broadcast %cst_81 : f32 to vector<16x1xf32>
    %196 = arith.divf %194, %195 : vector<16x1xf32>
    %197 = vector.broadcast %196 : vector<16x1xf32> to vector<16x32xf32>
    %198 = arith.subf %188, %197 : vector<16x32xf32>
    %199 = arith.mulf %198, %198 : vector<16x32xf32>
    %cst_82 = arith.constant dense<0.000000e+00> : vector<16xf32>
    %200 = vector.multi_reduction <add>, %199, %cst_82 [1] : vector<16x32xf32> to vector<16xf32>
    %201 = vector.shape_cast %200 : vector<16xf32> to vector<16x1xf32>
    %cst_83 = arith.constant 3.200000e+01 : f32
    %202 = vector.broadcast %cst_83 : f32 to vector<16x1xf32>
    %203 = arith.divf %201, %202 : vector<16x1xf32>
    %204 = vector.broadcast %196 : vector<16x1xf32> to vector<16x32xf32>
    %205 = arith.subf %188, %204 : vector<16x32xf32>
    %cst_84 = arith.constant 9.99999996E-13 : f32
    %206 = vector.broadcast %cst_84 : f32 to vector<16x1xf32>
    %207 = arith.addf %203, %206 : vector<16x1xf32>
    %208 = math.rsqrt %207 : vector<16x1xf32>
    %209 = vector.broadcast %208 : vector<16x1xf32> to vector<16x32xf32>
    %210 = arith.mulf %205, %209 : vector<16x32xf32>
    %211 = vector.broadcast %190 : vector<1x32xf32> to vector<16x32xf32>
    %212 = arith.mulf %210, %211 : vector<16x32xf32>
    %213 = vector.broadcast %192 : vector<1x32xf32> to vector<16x32xf32>
    %214 = arith.addf %212, %213 : vector<16x32xf32>
    %c1 = arith.constant 1 : index
    %c0_85 = arith.constant 0 : index
    %c0_86 = arith.constant 0 : index
    %215 = vector.load %arg4[%c1, %c0_85, %c0_86] : memref<2x32x96xf32, #tpu.memory_space<vmem>>, vector<1x32x96xf32>
    %216 = vector.shape_cast %215 : vector<1x32x96xf32> to vector<32x96xf32>
    %cst_87 = arith.constant dense<0.000000e+00> : vector<16x96xf32>
    %217 = tpu.matmul %214, %216, %cst_87 {dimension_numbers = #tpu.dot_dimension_numbers<[1], [0], [0], [1], [0, 0, 1, 1], [], []>} : vector<16x32xf32>, vector<32x96xf32>, vector<16x96xf32> -> vector<16x96xf32>
    %c1_88 = arith.constant 1 : index
    %c0_89 = arith.constant 0 : index
    %c0_90 = arith.constant 0 : index
    %218 = vector.load %arg5[%c1_88, %c0_89, %c0_90] : memref<2x1x96xf32, #tpu.memory_space<vmem>>, vector<1x1x96xf32>
    %219 = vector.shape_cast %218 : vector<1x1x96xf32> to vector<1x96xf32>
    %220 = vector.broadcast %219 : vector<1x96xf32> to vector<16x96xf32>
    %221 = arith.addf %217, %220 : vector<16x96xf32>
    %222 = vector.extract_strided_slice %221 {offsets = [0, 0], sizes = [16, 8], strides = [1, 1]} : vector<16x96xf32> to vector<16x8xf32>
    %223 = vector.shape_cast %222 : vector<16x8xf32> to vector<2x8x8xf32>
    %224 = vector.extract_strided_slice %221 {offsets = [0, 32], sizes = [16, 8], strides = [1, 1]} : vector<16x96xf32> to vector<16x8xf32>
    %225 = vector.shape_cast %224 : vector<16x8xf32> to vector<2x8x8xf32>
    %226 = vector.extract_strided_slice %221 {offsets = [0, 64], sizes = [16, 8], strides = [1, 1]} : vector<16x96xf32> to vector<16x8xf32>
    %227 = vector.shape_cast %226 : vector<16x8xf32> to vector<2x8x8xf32>
    "tpu.trace_start"() <{level = 10 : i32, message = "bqd,bkd->bqk"}> : () -> ()
    %cst_91 = arith.constant dense<0.000000e+00> : vector<2x8x8xf32>
    %228 = tpu.matmul %223, %225, %cst_91 {dimension_numbers = #tpu.dot_dimension_numbers<[2], [2], [1], [1], [0, 0, 0, 1, 1, 1], [0], [0]>} : vector<2x8x8xf32>, vector<2x8x8xf32>, vector<2x8x8xf32> -> vector<2x8x8xf32>
    "tpu.trace_stop"() : () -> ()
    %cst_92 = arith.constant 0.353553385 : f32
    %229 = vector.broadcast %cst_92 : f32 to vector<2x8x8xf32>
    %230 = arith.mulf %228, %229 : vector<2x8x8xf32>
    %231 = vector.broadcast %26 : vector<2x1x8xf32> to vector<2x8x8xf32>
    %232 = arith.addf %230, %231 : vector<2x8x8xf32>
    %cst_93 = arith.constant dense<0xFF800000> : vector<2x8xf32>
    %233 = vector.multi_reduction <maximumf>, %232, %cst_93 [2] : vector<2x8x8xf32> to vector<2x8xf32>
    %234 = vector.shape_cast %233 : vector<2x8xf32> to vector<2x8x1xf32>
    %235 = vector.broadcast %234 : vector<2x8x1xf32> to vector<2x8x8xf32>
    %236 = arith.subf %232, %235 : vector<2x8x8xf32>
    %237 = math.exp %236 : vector<2x8x8xf32>
    %cst_94 = arith.constant dense<0.000000e+00> : vector<2x8xf32>
    %238 = vector.multi_reduction <add>, %237, %cst_94 [2] : vector<2x8x8xf32> to vector<2x8xf32>
    %239 = vector.shape_cast %238 : vector<2x8xf32> to vector<2x8x1xf32>
    %240 = tpu.reciprocal %239 {approx = true} : vector<2x8x1xf32> -> vector<2x8x1xf32>
    %241 = vector.broadcast %240 : vector<2x8x1xf32> to vector<2x8x8xf32>
    %242 = arith.mulf %237, %241 : vector<2x8x8xf32>
    "tpu.trace_start"() <{level = 10 : i32, message = "bqk,bkd->bqd"}> : () -> ()
    %cst_95 = arith.constant dense<0.000000e+00> : vector<2x8x8xf32>
    %243 = tpu.matmul %242, %227, %cst_95 {dimension_numbers = #tpu.dot_dimension_numbers<[2], [1], [1], [2], [0, 0, 0, 1, 1, 2], [0], [0]>} : vector<2x8x8xf32>, vector<2x8x8xf32>, vector<2x8x8xf32> -> vector<2x8x8xf32>
    "tpu.trace_stop"() : () -> ()
    %244 = vector.shape_cast %243 : vector<2x8x8xf32> to vector<16x8xf32>
    %245 = vector.extract_strided_slice %221 {offsets = [0, 8], sizes = [16, 8], strides = [1, 1]} : vector<16x96xf32> to vector<16x8xf32>
    %246 = vector.shape_cast %245 : vector<16x8xf32> to vector<2x8x8xf32>
    %247 = vector.extract_strided_slice %221 {offsets = [0, 40], sizes = [16, 8], strides = [1, 1]} : vector<16x96xf32> to vector<16x8xf32>
    %248 = vector.shape_cast %247 : vector<16x8xf32> to vector<2x8x8xf32>
    %249 = vector.extract_strided_slice %221 {offsets = [0, 72], sizes = [16, 8], strides = [1, 1]} : vector<16x96xf32> to vector<16x8xf32>
    %250 = vector.shape_cast %249 : vector<16x8xf32> to vector<2x8x8xf32>
    "tpu.trace_start"() <{level = 10 : i32, message = "bqd,bkd->bqk"}> : () -> ()
    %cst_96 = arith.constant dense<0.000000e+00> : vector<2x8x8xf32>
    %251 = tpu.matmul %246, %248, %cst_96 {dimension_numbers = #tpu.dot_dimension_numbers<[2], [2], [1], [1], [0, 0, 0, 1, 1, 1], [0], [0]>} : vector<2x8x8xf32>, vector<2x8x8xf32>, vector<2x8x8xf32> -> vector<2x8x8xf32>
    "tpu.trace_stop"() : () -> ()
    %cst_97 = arith.constant 0.353553385 : f32
    %252 = vector.broadcast %cst_97 : f32 to vector<2x8x8xf32>
    %253 = arith.mulf %251, %252 : vector<2x8x8xf32>
    %254 = vector.broadcast %26 : vector<2x1x8xf32> to vector<2x8x8xf32>
    %255 = arith.addf %253, %254 : vector<2x8x8xf32>
    %cst_98 = arith.constant dense<0xFF800000> : vector<2x8xf32>
    %256 = vector.multi_reduction <maximumf>, %255, %cst_98 [2] : vector<2x8x8xf32> to vector<2x8xf32>
    %257 = vector.shape_cast %256 : vector<2x8xf32> to vector<2x8x1xf32>
    %258 = vector.broadcast %257 : vector<2x8x1xf32> to vector<2x8x8xf32>
    %259 = arith.subf %255, %258 : vector<2x8x8xf32>
    %260 = math.exp %259 : vector<2x8x8xf32>
    %cst_99 = arith.constant dense<0.000000e+00> : vector<2x8xf32>
    %261 = vector.multi_reduction <add>, %260, %cst_99 [2] : vector<2x8x8xf32> to vector<2x8xf32>
    %262 = vector.shape_cast %261 : vector<2x8xf32> to vector<2x8x1xf32>
    %263 = tpu.reciprocal %262 {approx = true} : vector<2x8x1xf32> -> vector<2x8x1xf32>
    %264 = vector.broadcast %263 : vector<2x8x1xf32> to vector<2x8x8xf32>
    %265 = arith.mulf %260, %264 : vector<2x8x8xf32>
    "tpu.trace_start"() <{level = 10 : i32, message = "bqk,bkd->bqd"}> : () -> ()
    %cst_100 = arith.constant dense<0.000000e+00> : vector<2x8x8xf32>
    %266 = tpu.matmul %265, %250, %cst_100 {dimension_numbers = #tpu.dot_dimension_numbers<[2], [1], [1], [2], [0, 0, 0, 1, 1, 2], [0], [0]>} : vector<2x8x8xf32>, vector<2x8x8xf32>, vector<2x8x8xf32> -> vector<2x8x8xf32>
    "tpu.trace_stop"() : () -> ()
    %267 = vector.shape_cast %266 : vector<2x8x8xf32> to vector<16x8xf32>
    %268 = vector.extract_strided_slice %221 {offsets = [0, 16], sizes = [16, 8], strides = [1, 1]} : vector<16x96xf32> to vector<16x8xf32>
    %269 = vector.shape_cast %268 : vector<16x8xf32> to vector<2x8x8xf32>
    %270 = vector.extract_strided_slice %221 {offsets = [0, 48], sizes = [16, 8], strides = [1, 1]} : vector<16x96xf32> to vector<16x8xf32>
    %271 = vector.shape_cast %270 : vector<16x8xf32> to vector<2x8x8xf32>
    %272 = vector.extract_strided_slice %221 {offsets = [0, 80], sizes = [16, 8], strides = [1, 1]} : vector<16x96xf32> to vector<16x8xf32>
    %273 = vector.shape_cast %272 : vector<16x8xf32> to vector<2x8x8xf32>
    "tpu.trace_start"() <{level = 10 : i32, message = "bqd,bkd->bqk"}> : () -> ()
    %cst_101 = arith.constant dense<0.000000e+00> : vector<2x8x8xf32>
    %274 = tpu.matmul %269, %271, %cst_101 {dimension_numbers = #tpu.dot_dimension_numbers<[2], [2], [1], [1], [0, 0, 0, 1, 1, 1], [0], [0]>} : vector<2x8x8xf32>, vector<2x8x8xf32>, vector<2x8x8xf32> -> vector<2x8x8xf32>
    "tpu.trace_stop"() : () -> ()
    %cst_102 = arith.constant 0.353553385 : f32
    %275 = vector.broadcast %cst_102 : f32 to vector<2x8x8xf32>
    %276 = arith.mulf %274, %275 : vector<2x8x8xf32>
    %277 = vector.broadcast %26 : vector<2x1x8xf32> to vector<2x8x8xf32>
    %278 = arith.addf %276, %277 : vector<2x8x8xf32>
    %cst_103 = arith.constant dense<0xFF800000> : vector<2x8xf32>
    %279 = vector.multi_reduction <maximumf>, %278, %cst_103 [2] : vector<2x8x8xf32> to vector<2x8xf32>
    %280 = vector.shape_cast %279 : vector<2x8xf32> to vector<2x8x1xf32>
    %281 = vector.broadcast %280 : vector<2x8x1xf32> to vector<2x8x8xf32>
    %282 = arith.subf %278, %281 : vector<2x8x8xf32>
    %283 = math.exp %282 : vector<2x8x8xf32>
    %cst_104 = arith.constant dense<0.000000e+00> : vector<2x8xf32>
    %284 = vector.multi_reduction <add>, %283, %cst_104 [2] : vector<2x8x8xf32> to vector<2x8xf32>
    %285 = vector.shape_cast %284 : vector<2x8xf32> to vector<2x8x1xf32>
    %286 = tpu.reciprocal %285 {approx = true} : vector<2x8x1xf32> -> vector<2x8x1xf32>
    %287 = vector.broadcast %286 : vector<2x8x1xf32> to vector<2x8x8xf32>
    %288 = arith.mulf %283, %287 : vector<2x8x8xf32>
    "tpu.trace_start"() <{level = 10 : i32, message = "bqk,bkd->bqd"}> : () -> ()
    %cst_105 = arith.constant dense<0.000000e+00> : vector<2x8x8xf32>
    %289 = tpu.matmul %288, %273, %cst_105 {dimension_numbers = #tpu.dot_dimension_numbers<[2], [1], [1], [2], [0, 0, 0, 1, 1, 2], [0], [0]>} : vector<2x8x8xf32>, vector<2x8x8xf32>, vector<2x8x8xf32> -> vector<2x8x8xf32>
    "tpu.trace_stop"() : () -> ()
    %290 = vector.shape_cast %289 : vector<2x8x8xf32> to vector<16x8xf32>
    %291 = vector.extract_strided_slice %221 {offsets = [0, 24], sizes = [16, 8], strides = [1, 1]} : vector<16x96xf32> to vector<16x8xf32>
    %292 = vector.shape_cast %291 : vector<16x8xf32> to vector<2x8x8xf32>
    %293 = vector.extract_strided_slice %221 {offsets = [0, 56], sizes = [16, 8], strides = [1, 1]} : vector<16x96xf32> to vector<16x8xf32>
    %294 = vector.shape_cast %293 : vector<16x8xf32> to vector<2x8x8xf32>
    %295 = vector.extract_strided_slice %221 {offsets = [0, 88], sizes = [16, 8], strides = [1, 1]} : vector<16x96xf32> to vector<16x8xf32>
    %296 = vector.shape_cast %295 : vector<16x8xf32> to vector<2x8x8xf32>
    "tpu.trace_start"() <{level = 10 : i32, message = "bqd,bkd->bqk"}> : () -> ()
    %cst_106 = arith.constant dense<0.000000e+00> : vector<2x8x8xf32>
    %297 = tpu.matmul %292, %294, %cst_106 {dimension_numbers = #tpu.dot_dimension_numbers<[2], [2], [1], [1], [0, 0, 0, 1, 1, 1], [0], [0]>} : vector<2x8x8xf32>, vector<2x8x8xf32>, vector<2x8x8xf32> -> vector<2x8x8xf32>
    "tpu.trace_stop"() : () -> ()
    %cst_107 = arith.constant 0.353553385 : f32
    %298 = vector.broadcast %cst_107 : f32 to vector<2x8x8xf32>
    %299 = arith.mulf %297, %298 : vector<2x8x8xf32>
    %300 = vector.broadcast %26 : vector<2x1x8xf32> to vector<2x8x8xf32>
    %301 = arith.addf %299, %300 : vector<2x8x8xf32>
    %cst_108 = arith.constant dense<0xFF800000> : vector<2x8xf32>
    %302 = vector.multi_reduction <maximumf>, %301, %cst_108 [2] : vector<2x8x8xf32> to vector<2x8xf32>
    %303 = vector.shape_cast %302 : vector<2x8xf32> to vector<2x8x1xf32>
    %304 = vector.broadcast %303 : vector<2x8x1xf32> to vector<2x8x8xf32>
    %305 = arith.subf %301, %304 : vector<2x8x8xf32>
    %306 = math.exp %305 : vector<2x8x8xf32>
    %cst_109 = arith.constant dense<0.000000e+00> : vector<2x8xf32>
    %307 = vector.multi_reduction <add>, %306, %cst_109 [2] : vector<2x8x8xf32> to vector<2x8xf32>
    %308 = vector.shape_cast %307 : vector<2x8xf32> to vector<2x8x1xf32>
    %309 = tpu.reciprocal %308 {approx = true} : vector<2x8x1xf32> -> vector<2x8x1xf32>
    %310 = vector.broadcast %309 : vector<2x8x1xf32> to vector<2x8x8xf32>
    %311 = arith.mulf %306, %310 : vector<2x8x8xf32>
    "tpu.trace_start"() <{level = 10 : i32, message = "bqk,bkd->bqd"}> : () -> ()
    %cst_110 = arith.constant dense<0.000000e+00> : vector<2x8x8xf32>
    %312 = tpu.matmul %311, %296, %cst_110 {dimension_numbers = #tpu.dot_dimension_numbers<[2], [1], [1], [2], [0, 0, 0, 1, 1, 2], [0], [0]>} : vector<2x8x8xf32>, vector<2x8x8xf32>, vector<2x8x8xf32> -> vector<2x8x8xf32>
    "tpu.trace_stop"() : () -> ()
    %313 = vector.shape_cast %312 : vector<2x8x8xf32> to vector<16x8xf32>
    %314 = tpu.concatenate %244, %267, %290, %313 in 1 : vector<16x8xf32>, vector<16x8xf32>, vector<16x8xf32>, vector<16x8xf32> -> vector<16x32xf32>
    %c1_111 = arith.constant 1 : index
    %c0_112 = arith.constant 0 : index
    %c0_113 = arith.constant 0 : index
    %315 = vector.load %arg6[%c1_111, %c0_112, %c0_113] : memref<2x32x32xf32, #tpu.memory_space<vmem>>, vector<1x32x32xf32>
    %316 = vector.shape_cast %315 : vector<1x32x32xf32> to vector<32x32xf32>
    %cst_114 = arith.constant dense<0.000000e+00> : vector<16x32xf32>
    %317 = tpu.matmul %314, %316, %cst_114 {dimension_numbers = #tpu.dot_dimension_numbers<[1], [0], [0], [1], [0, 0, 1, 1], [], []>} : vector<16x32xf32>, vector<32x32xf32>, vector<16x32xf32> -> vector<16x32xf32>
    %c1_115 = arith.constant 1 : index
    %c0_116 = arith.constant 0 : index
    %c0_117 = arith.constant 0 : index
    %318 = vector.load %arg7[%c1_115, %c0_116, %c0_117] : memref<2x1x32xf32, #tpu.memory_space<vmem>>, vector<1x1x32xf32>
    %319 = vector.shape_cast %318 : vector<1x1x32xf32> to vector<1x32xf32>
    %320 = vector.broadcast %319 : vector<1x32xf32> to vector<16x32xf32>
    %321 = arith.addf %317, %320 : vector<16x32xf32>
    %322 = arith.addf %321, %214 : vector<16x32xf32>
    %c1_118 = arith.constant 1 : index
    %c0_119 = arith.constant 0 : index
    %c0_120 = arith.constant 0 : index
    %323 = vector.load %arg8[%c1_118, %c0_119, %c0_120] : memref<2x1x32xf32, #tpu.memory_space<vmem>>, vector<1x1x32xf32>
    %324 = vector.shape_cast %323 : vector<1x1x32xf32> to vector<1x32xf32>
    %c1_121 = arith.constant 1 : index
    %c0_122 = arith.constant 0 : index
    %c0_123 = arith.constant 0 : index
    %325 = vector.load %arg9[%c1_121, %c0_122, %c0_123] : memref<2x1x32xf32, #tpu.memory_space<vmem>>, vector<1x1x32xf32>
    %326 = vector.shape_cast %325 : vector<1x1x32xf32> to vector<1x32xf32>
    %cst_124 = arith.constant dense<0.000000e+00> : vector<16xf32>
    %327 = vector.multi_reduction <add>, %322, %cst_124 [1] : vector<16x32xf32> to vector<16xf32>
    %328 = vector.shape_cast %327 : vector<16xf32> to vector<16x1xf32>
    %cst_125 = arith.constant 3.200000e+01 : f32
    %329 = vector.broadcast %cst_125 : f32 to vector<16x1xf32>
    %330 = arith.divf %328, %329 : vector<16x1xf32>
    %331 = vector.broadcast %330 : vector<16x1xf32> to vector<16x32xf32>
    %332 = arith.subf %322, %331 : vector<16x32xf32>
    %333 = arith.mulf %332, %332 : vector<16x32xf32>
    %cst_126 = arith.constant dense<0.000000e+00> : vector<16xf32>
    %334 = vector.multi_reduction <add>, %333, %cst_126 [1] : vector<16x32xf32> to vector<16xf32>
    %335 = vector.shape_cast %334 : vector<16xf32> to vector<16x1xf32>
    %cst_127 = arith.constant 3.200000e+01 : f32
    %336 = vector.broadcast %cst_127 : f32 to vector<16x1xf32>
    %337 = arith.divf %335, %336 : vector<16x1xf32>
    %338 = vector.broadcast %330 : vector<16x1xf32> to vector<16x32xf32>
    %339 = arith.subf %322, %338 : vector<16x32xf32>
    %cst_128 = arith.constant 9.99999996E-13 : f32
    %340 = vector.broadcast %cst_128 : f32 to vector<16x1xf32>
    %341 = arith.addf %337, %340 : vector<16x1xf32>
    %342 = math.rsqrt %341 : vector<16x1xf32>
    %343 = vector.broadcast %342 : vector<16x1xf32> to vector<16x32xf32>
    %344 = arith.mulf %339, %343 : vector<16x32xf32>
    %345 = vector.broadcast %324 : vector<1x32xf32> to vector<16x32xf32>
    %346 = arith.mulf %344, %345 : vector<16x32xf32>
    %347 = vector.broadcast %326 : vector<1x32xf32> to vector<16x32xf32>
    %348 = arith.addf %346, %347 : vector<16x32xf32>
    %c1_129 = arith.constant 1 : index
    %c0_130 = arith.constant 0 : index
    %c0_131 = arith.constant 0 : index
    %349 = vector.load %arg10[%c1_129, %c0_130, %c0_131] : memref<2x32x64xf32, #tpu.memory_space<vmem>>, vector<1x32x64xf32>
    %350 = vector.shape_cast %349 : vector<1x32x64xf32> to vector<32x64xf32>
    %cst_132 = arith.constant dense<0.000000e+00> : vector<16x64xf32>
    %351 = tpu.matmul %348, %350, %cst_132 {dimension_numbers = #tpu.dot_dimension_numbers<[1], [0], [0], [1], [0, 0, 1, 1], [], []>} : vector<16x32xf32>, vector<32x64xf32>, vector<16x64xf32> -> vector<16x64xf32>
    %c1_133 = arith.constant 1 : index
    %c0_134 = arith.constant 0 : index
    %c0_135 = arith.constant 0 : index
    %352 = vector.load %arg11[%c1_133, %c0_134, %c0_135] : memref<2x1x64xf32, #tpu.memory_space<vmem>>, vector<1x1x64xf32>
    %353 = vector.shape_cast %352 : vector<1x1x64xf32> to vector<1x64xf32>
    %354 = vector.broadcast %353 : vector<1x64xf32> to vector<16x64xf32>
    %355 = arith.addf %351, %354 : vector<16x64xf32>
    %cst_136 = arith.constant 5.000000e-01 : f32
    %356 = vector.broadcast %cst_136 : f32 to vector<16x64xf32>
    %357 = arith.mulf %356, %355 : vector<16x64xf32>
    %cst_137 = arith.constant 4.471500e-02 : f32
    %358 = vector.broadcast %cst_137 : f32 to vector<16x64xf32>
    %359 = arith.mulf %358, %355 : vector<16x64xf32>
    %360 = arith.mulf %359, %355 : vector<16x64xf32>
    %361 = arith.mulf %360, %355 : vector<16x64xf32>
    %362 = arith.addf %355, %361 : vector<16x64xf32>
    %cst_138 = arith.constant 0.797884583 : f32
    %363 = vector.broadcast %cst_138 : f32 to vector<16x64xf32>
    %364 = arith.mulf %363, %362 : vector<16x64xf32>
    %365 = math.tanh %364 : vector<16x64xf32>
    %cst_139 = arith.constant 1.000000e+00 : f32
    %366 = vector.broadcast %cst_139 : f32 to vector<16x64xf32>
    %367 = arith.addf %366, %365 : vector<16x64xf32>
    %368 = arith.mulf %357, %367 : vector<16x64xf32>
    %c1_140 = arith.constant 1 : index
    %c0_141 = arith.constant 0 : index
    %c0_142 = arith.constant 0 : index
    %369 = vector.load %arg12[%c1_140, %c0_141, %c0_142] : memref<2x64x32xf32, #tpu.memory_space<vmem>>, vector<1x64x32xf32>
    %370 = vector.shape_cast %369 : vector<1x64x32xf32> to vector<64x32xf32>
    %cst_143 = arith.constant dense<0.000000e+00> : vector<16x32xf32>
    %371 = tpu.matmul %368, %370, %cst_143 {dimension_numbers = #tpu.dot_dimension_numbers<[1], [0], [0], [1], [0, 0, 1, 1], [], []>} : vector<16x64xf32>, vector<64x32xf32>, vector<16x32xf32> -> vector<16x32xf32>
    %c1_144 = arith.constant 1 : index
    %c0_145 = arith.constant 0 : index
    %c0_146 = arith.constant 0 : index
    %372 = vector.load %arg13[%c1_144, %c0_145, %c0_146] : memref<2x1x32xf32, #tpu.memory_space<vmem>>, vector<1x1x32xf32>
    %373 = vector.shape_cast %372 : vector<1x1x32xf32> to vector<1x32xf32>
    %374 = vector.broadcast %373 : vector<1x32xf32> to vector<16x32xf32>
    %375 = arith.addf %371, %374 : vector<16x32xf32>
    %376 = arith.addf %375, %348 : vector<16x32xf32>
    %c1_147 = arith.constant 1 : index
    %c0_148 = arith.constant 0 : index
    %c0_149 = arith.constant 0 : index
    %377 = vector.load %arg14[%c1_147, %c0_148, %c0_149] : memref<2x1x32xf32, #tpu.memory_space<vmem>>, vector<1x1x32xf32>
    %378 = vector.shape_cast %377 : vector<1x1x32xf32> to vector<1x32xf32>
    %c1_150 = arith.constant 1 : index
    %c0_151 = arith.constant 0 : index
    %c0_152 = arith.constant 0 : index
    %379 = vector.load %arg15[%c1_150, %c0_151, %c0_152] : memref<2x1x32xf32, #tpu.memory_space<vmem>>, vector<1x1x32xf32>
    %380 = vector.shape_cast %379 : vector<1x1x32xf32> to vector<1x32xf32>
    %cst_153 = arith.constant dense<0.000000e+00> : vector<16xf32>
    %381 = vector.multi_reduction <add>, %376, %cst_153 [1] : vector<16x32xf32> to vector<16xf32>
    %382 = vector.shape_cast %381 : vector<16xf32> to vector<16x1xf32>
    %cst_154 = arith.constant 3.200000e+01 : f32
    %383 = vector.broadcast %cst_154 : f32 to vector<16x1xf32>
    %384 = arith.divf %382, %383 : vector<16x1xf32>
    %385 = vector.broadcast %384 : vector<16x1xf32> to vector<16x32xf32>
    %386 = arith.subf %376, %385 : vector<16x32xf32>
    %387 = arith.mulf %386, %386 : vector<16x32xf32>
    %cst_155 = arith.constant dense<0.000000e+00> : vector<16xf32>
    %388 = vector.multi_reduction <add>, %387, %cst_155 [1] : vector<16x32xf32> to vector<16xf32>
    %389 = vector.shape_cast %388 : vector<16xf32> to vector<16x1xf32>
    %cst_156 = arith.constant 3.200000e+01 : f32
    %390 = vector.broadcast %cst_156 : f32 to vector<16x1xf32>
    %391 = arith.divf %389, %390 : vector<16x1xf32>
    %392 = vector.broadcast %384 : vector<16x1xf32> to vector<16x32xf32>
    %393 = arith.subf %376, %392 : vector<16x32xf32>
    %cst_157 = arith.constant 9.99999996E-13 : f32
    %394 = vector.broadcast %cst_157 : f32 to vector<16x1xf32>
    %395 = arith.addf %391, %394 : vector<16x1xf32>
    %396 = math.rsqrt %395 : vector<16x1xf32>
    %397 = vector.broadcast %396 : vector<16x1xf32> to vector<16x32xf32>
    %398 = arith.mulf %393, %397 : vector<16x32xf32>
    %399 = vector.broadcast %378 : vector<1x32xf32> to vector<16x32xf32>
    %400 = arith.mulf %398, %399 : vector<16x32xf32>
    %401 = vector.broadcast %380 : vector<1x32xf32> to vector<16x32xf32>
    %402 = arith.addf %400, %401 : vector<16x32xf32>
    %c0_158 = arith.constant 0 : index
    %c0_159 = arith.constant 0 : index
    %403 = vector.load %arg16[%c0_158, %c0_159] : memref<32x128xf32, #tpu.memory_space<vmem>>, vector<32x128xf32>
    %cst_160 = arith.constant dense<0.000000e+00> : vector<16x128xf32>
    %404 = tpu.matmul %402, %403, %cst_160 {dimension_numbers = #tpu.dot_dimension_numbers<[1], [0], [0], [1], [0, 0, 1, 1], [], []>} : vector<16x32xf32>, vector<32x128xf32>, vector<16x128xf32> -> vector<16x128xf32>
    %c0_161 = arith.constant 0 : index
    %c0_162 = arith.constant 0 : index
    %405 = vector.load %arg17[%c0_161, %c0_162] : memref<1x128xf32, #tpu.memory_space<vmem>>, vector<1x128xf32>
    %406 = vector.broadcast %405 : vector<1x128xf32> to vector<16x128xf32>
    %407 = arith.addf %404, %406 : vector<16x128xf32>
    %c0_163 = arith.constant 0 : index
    %c0_164 = arith.constant 0 : index
    %408 = vector.load %arg18[%c0_163, %c0_164] : memref<16x128xf32, #tpu.memory_space<vmem>>, vector<16x128xf32>
    tpu.vector_store %arg18[%c0_163, %c0_164], %407 {strides = array<i32>} : memref<16x128xf32, #tpu.memory_space<vmem>>, vector<16x128xf32>,
    return
  }
}

</mosaic_0001>

<bundles_post_ra>
// kernel: bert_crf_forward.3
= control target key start
LH: loop header
LB: loop body
LE: loop exit
PB: predicated region body
PF: predicated region fallthrough
CT: control target
= control target key end

     0   :  { %11 = vsyncpa [#allocation3], 0  ;;  %vm210_vm0 = vcmask 1044480   ;;  %v177_v1 = vlaneseq  ;;  %v722_v7 = vmov 1983009808   ;;  %v723_v17 = vmov 0   ;;  %s1002_s0 = inlined_call_operand.vmem [shape: f32[8,2,5], index: 0, kind: input, shape index: {}]   ;;  %s1003_s1 = inlined_call_operand.vmem [shape: f32[8,2,5], index: 1, kind: input, shape index: {}]   ;;  %s1004_s2 = inlined_call_operand.vmem [shape: f32[8,2,1], index: 2, kind: input, shape index: {}]   ;;  %s1005_s3 = inlined_call_operand.vmem [shape: f32[5,5], index: 3, kind: input, shape index: {}]   ;;  %s1006_s4 = inlined_call_operand.vmem [shape: f32[1,5], index: 4, kind: input, shape index: {}]   ;;  %s1007_s5 = inlined_call_operand.vmem [shape: f32[1,5], index: 5, kind: input, shape index: {}]   ;;  %s1008_s6 = inlined_call_operand.hbm [shape: f32[1,1], index: 6, kind: output, shape index: {}]  }
   0x1   :  { %v48_v0 = vld [vmem:[%s1005_s3] sm:$0x1f]  ;;  %v786_v6 = vld [vmem:[%s1003_s1 + $0x6] sm:$0x3]  ;;  %v175_v8 = vunpack.c.l.s4 %v722_v7  ;;  %v791_v10 = vld [vmem:[%s1003_s1 + $0x8] sm:$0x3]  ;;  %668 = vset.pattern.permute.xlu0 %v723_v17  ;;  %669 = vset.pattern.permute.xlu1 %v723_v17 }
   0x2   :  { %636 = vmatprep.subr.msk.mxu0 %vm210_vm0, %v48_v0  ;;  %v459_v2 = vmul.f32 1.442695, %v48_v0  ;;  %v770_v3 = vld [vmem:[%s1003_s1] sm:$0x3]  ;;  %v775_v4 = vld [vmem:[%s1003_s1 + $0x2] sm:$0x3] }
   0x3   :  { %637 = vmatpush3.msk.msra.mxu0 %vm210_vm0, %v48_v0  ;;  %v781_v5 = vld [vmem:[%s1003_s1 + $0x4] sm:$0x3]  ;;  %v178_v9 = vshrl.u32 %v177_v1, 7  ;;  %v796_v11 = vld [vmem:[%s1003_s1 + $0xa] sm:$0x3]  ;;  %v172_v13 = vcombine.low %v770_v3, %v775_v4  ;;  %v176_v15 = vunpack.c.0.s8 %v175_v8  ;;  %vm205_vm1 = vcmask 39936  }
   0x4   :  { %670 = vpow2.f32 %v459_v2  ;;  %v41_v12 = vld [vmem:[%s1004_s2 + $0x2] sm:$0x3]  ;;  %v173_v14 = vcombine.low %v781_v5, %v786_v6  ;;  %v189_v16 = vcombine.low %v791_v10, %v796_v11  ;;  %v43_v18 = vld [vmem:[%s1004_s2 + $0x6] sm:$0x3]  ;;  %v813_v19 = vld [vmem:[%s1003_s1 + $0xc] sm:$0x3] }
   0x5   :  { %66 = vperm.xlu0 %668, %v41_v12   ;;  %76 = vperm.xlu1 %669, %v43_v18   ;;  %v815_v20 = vsub.s32 %v176_v15, %v178_v9  ;;  %v42_v21 = vld [vmem:[%s1004_s2 + $0x4] sm:$0x3]  ;;  %v44_v22 = vld [vmem:[%s1004_s2 + $0x8] sm:$0x3]  ;;  %v40_v29 = vld [vmem:[%s1004_s2] sm:$0x3] }
   0x6   :  { %v45_v30 = vld [vmem:[%s1004_s2 + $0xa] sm:$0x3]  ;;  %v46_v32 = vld [vmem:[%s1004_s2 + $0xc] sm:$0x3]  ;;  %v47_v33 = vld [vmem:[%s1004_s2 + $0xe] sm:$0x3] }
   0x7   :  { %v180_v23 = vrot.slane %v172_v13, %v815_v20  ;;  %v187_v24 = vrot.slane %v173_v14, %v815_v20  ;;  %v196_v25 = vrot.slane %v189_v16, %v815_v20  ;;  %v203_v26 = vrot.slane %v813_v19, %v815_v20  ;;  %v24_v34 = vld [vmem:[%s1002_s0] sm:$0x3]  ;;  %v25_v37 = vld [vmem:[%s1002_s0 + $0x2] sm:$0x3]  ;;  %v28_v39 = vld [vmem:[%s1002_s0 + $0x8] sm:$0x3] }
   0x8   :  { %v850_v35 = vld [vmem:[%s1006_s4] ss:$0 sm:$0xff]  ;;  %v52_v38 = vmul.f32 %v775_v4, %v25_v37  ;;  %v27_v40 = vld [vmem:[%s1002_s0 + $0x6] sm:$0x3]  ;;  %v26_v43 = vld [vmem:[%s1002_s0 + $0x4] sm:$0x3]  ;;  %v55_v46 = vmul.f32 %v791_v10, %v28_v39  ;;  %v51_v49 = vmul.f32 %v770_v3, %v24_v34 }
   0x9   :  { %71 = vperm.xlu0 %668, %v42_v21   ;;  %81 = vperm.xlu1 %669, %v44_v22   ;;  %v188_v27 = vcombine.low %v180_v23, %v187_v24  ;;  %v204_v28 = vcombine.low %v196_v25, %v203_v26  ;;  %v853_v36 = vadd.f32 %v850_v35, %v24_v34   ;;  %vm107_vm2 = vcmask 33792   ;;  %v29_v51 = vld [vmem:[%s1002_s0 + $0xa] sm:$0x3] }
   0xa   :  { %v54_v47 = vmul.f32 %v786_v6, %v27_v40  ;;  %v53_v50 = vmul.f32 %v781_v5, %v26_v43  ;;  %v56_v0 = vmul.f32 %v796_v11, %v29_v51  ;;  %vm132_vm3 = vcmask 1041408  }
   0xb   :  { %638 = vmatprep.mubr.msk.f32.mxu0 %vm205_vm1, %v188_v27 }
   0xc   :  { %639 = vmatmul.mubr.msk.f32.vlgmr.msra.gmra.mrb[0].mxu0 %vm205_vm1, %v204_v28 }
   0xd   :  { %61 = vperm.xlu0 %668, %v40_v29   ;;  %86 = vperm.xlu1 %669, %v45_v30  }
   0xe   :  { %v834_v31 = vpop.eup %670 }
  0x11   :  { %91 = vperm.xlu0 %668, %v46_v32   ;;  %96 = vperm.xlu1 %669, %v47_v33  }
  0x84   :  { %v67_v41 = vpop.permute.xlu0 %66  ;;  %v77_v42 = vpop.permute.xlu1 %76 }
  0x85   :  { %v425_v44 = vmul.f32 %v67_v41, %v770_v3  ;;  %v100_v45 = vmul.f32 %v67_v41, %v52_v38  ;;  %v427_v48 = vmul.f32 %v77_v42, %v781_v5  ;;  %v158_v52 = vmul.f32 %v67_v41, %v775_v4 }
  0x86   :  { %v160_v55 = vmul.f32 %v77_v42, %v786_v6  ;;  %v102_v63 = vmul.f32 %v77_v42, %v54_v47 }
  0x87   :  { %v432_v53 = vsel %vm107_vm2, %v425_v44, 0.0  ;;  %v111_v57 = vsel %vm107_vm2, %v100_v45, 0.0  ;;  %v435_v7 = vsel %vm107_vm2, %v427_v48, 0.0  ;;  %v411_v9 = vsel %vm107_vm2, %v158_v52, 0.0 }
  0x88   :  { %v72_v54 = vpop.permute.xlu0 %71  ;;  %v82_v56 = vpop.permute.xlu1 %81  ;;  %112 = vadd.xlane.f32.xlu1 %v111_v57  ;;  %v415_v18 = vsel %vm107_vm2, %v160_v55, 0.0 }
  0x89   :  { %v159_v58 = vmul.f32 %v72_v54, %v781_v5  ;;  %v426_v59 = vmul.f32 %v72_v54, %v775_v4  ;;  %v161_v60 = vmul.f32 %v82_v56, %v791_v10  ;;  %v428_v61 = vmul.f32 %v82_v56, %v786_v6 }
  0x8a   :  { %v103_v62 = vmul.f32 %v82_v56, %v55_v46  ;;  %v101_v13 = vmul.f32 %v72_v54, %v53_v50 }
  0x8b   :  { %v296_v1 = vcombine.low %v158_v52, %v159_v58  ;;  %v433_v2 = vsel %vm107_vm2, %v426_v59, 0.0  ;;  %v297_v8 = vcombine.low %v160_v55, %v161_v60  ;;  %v437_v4 = vsel %vm107_vm2, %v428_v61, 0.0 }
  0x8c   :  { %v434_v5 = vadd.f32 %v433_v2, %v432_v53  ;;  %v62_v12 = vpop.permute.xlu0 %61  ;;  %v87_v15 = vpop.permute.xlu1 %86  ;;  %v120_v16 = vsel %vm107_vm2, %v103_v62, 0.0  ;;  %v413_v24 = vsel %vm107_vm2, %v159_v58, 0.0  ;;  %v114_v32 = vsel %vm107_vm2, %v101_v13, 0.0 }
  0x8d   :  { %v99_v14 = vmul.f32 %v62_v12, %v51_v49  ;;  %v409_v6 = vmul.f32 %v62_v12, %v770_v3  ;;  %v304_v17 = vrot.slane %v296_v1, %v815_v20  ;;  %v429_v22 = vmul.f32 %v87_v15, %v791_v10  ;;  %121 = vadd.xlane.f32.xlu1 %v120_v16  ;;  %v31_v12 = vld [vmem:[%s1002_s0 + $0xe] sm:$0x3] }
  0x8e   :  { %v436_v21 = vadd.f32 %v435_v7, %v434_v5  ;;  %v104_v23 = vmul.f32 %v87_v15, %v56_v0  ;;  %v311_v27 = vrot.slane %v297_v8, %v815_v20  ;;  %v162_v10 = vmul.f32 %v87_v15, %v796_v11  ;;  %v30_v0 = vld [vmem:[%s1002_s0 + $0xc] sm:$0x3] }
  0x8f   :  { %v410_v25 = vsel %vm107_vm2, %v409_v6, 0.0  ;;  %v108_v26 = vsel %vm107_vm2, %v99_v14, 0.0  ;;  %v439_v30 = vsel %vm107_vm2, %v429_v22, 0.0  ;;  %v417_v42 = vsel %vm107_vm2, %v161_v60, 0.0 }
  0x90   :  { %v412_v28 = vadd.f32 %v411_v9, %v410_v25  ;;  %v438_v29 = vadd.f32 %v437_v4, %v436_v21  ;;  %109 = vadd.xlane.f32.xlu0 %v108_v26  ;;  %v92_v33 = vpop.permute.xlu0 %91  ;;  %v97_v37 = vpop.permute.xlu1 %96  ;;  %v123_v38 = vsel %vm107_vm2, %v104_v23, 0.0  ;;  %v312_v39 = vcombine.low %v304_v17, %v311_v27 }
  0x91   :  { %v430_v34 = vmul.f32 %v92_v33, %v796_v11  ;;  %124 = vadd.xlane.f32.xlu1 %v123_v38  ;;  %v163_v43 = vmul.f32 %v92_v33, %v813_v19  ;;  %v431_v45 = vmul.f32 %v97_v37, %v813_v19  ;;  %v39_v11 = vld [vmem:[%s1003_s1 + $0xe] sm:$0x3]  ;;  %v419_v47 = vsel %vm107_vm2, %v162_v10, 0.0 }
  0x92   :  { %v414_v40 = vadd.f32 %v413_v24, %v412_v28  ;;  %v440_v41 = vadd.f32 %v439_v30, %v438_v29  ;;  %v164_v48 = vmul.f32 %v97_v37, %v39_v11  ;;  %v117_v49 = vsel %vm107_vm2, %v102_v63, 0.0  ;;  %v938_v28 = vld [vmem:[%s1007_s5] ss:$0 sm:$0xff]  ;;  %s966_s5 = smov 1  }
  0x93   :  { %v441_v44 = vsel %vm107_vm2, %v430_v34, 0.0  ;;  %v421_v52 = vsel %vm107_vm2, %v163_v43, 0.0  ;;  %v443_v53 = vsel %vm107_vm2, %v431_v45, 0.0  ;;  %v313_v60 = vcombine.low %v162_v10, %v163_v43 }
  0x94   :  { %v416_v46 = vadd.f32 %v415_v18, %v414_v40  ;;  %115 = vadd.xlane.f32.xlu0 %v114_v32  ;;  %v442_v51 = vadd.f32 %v441_v44, %v440_v41  ;;  %v423_v55 = vsel %vm107_vm2, %v164_v48, 0.0  ;;  %v327_v62 = vrot.slane %v164_v48, %v815_v20 }
  0x95   :  { %v320_v61 = vrot.slane %v313_v60, %v815_v20  ;;  %v57_v9 = vmul.f32 %v813_v19, %v30_v0  ;;  %v58_v17 = vmul.f32 %v39_v11, %v31_v12  ;;  %v154_v10 = vmul.f32 %v850_v35, %v770_v3 }
  0x96   :  { %v418_v50 = vadd.f32 %v417_v42, %v416_v46  ;;  %v444_v57 = vadd.f32 %v443_v53, %v442_v51 }
  0x97   :  { %v328_v63 = vcombine.low %v320_v61, %v327_v62  ;;  %v105_v16 = vmul.f32 %v92_v33, %v57_v9  ;;  %v106_v23 = vmul.f32 %v97_v37, %v58_v17  ;;  %v155_v37 = vsel %vm107_vm2, %v154_v10, 0.0 }
  0x98   :  { %v420_v54 = vadd.f32 %v419_v47, %v418_v50  ;;  %118 = vadd.xlane.f32.xlu0 %v117_v49 }
  0x99   :  { %v126_v22 = vsel %vm107_vm2, %v105_v16, 0.0  ;;  %v129_v26 = vsel %vm107_vm2, %v106_v23, 0.0  ;;  %v714_v23 = vmov %v853_v36  }
  0x9a   :  { %v422_v56 = vadd.f32 %v421_v52, %v420_v54 }
  0x9c   :  { %v424_v58 = vadd.f32 %v423_v55, %v422_v56 }
  0x9e   :  { %v445_v59 = vsub.f32 %v424_v58, %v444_v57 }
  0xa0   :  { %v452_v33 = vmul.f32 %v938_v28, %v445_v59 }
  0xa2   :  { %v453_v34 = vsel %vm107_vm2, %v452_v33, 0.0 }
  0xdf   :  { %v640_v1 = vpop.f32.mrb[0].mxu0 }
  0xe0   :  { %v332_v2 = vmul.f32 %v640_v1, %v328_v63  ;;  %v280_v7 = vpop.f32.mrb[1].mxu0 }
  0xe1   :  { %v331_v8 = vmul.f32 %v312_v39, %v280_v7 }
  0xe2   :  { %v359_v5 = vrot.slane %v332_v2, %v815_v20  ;;  %v352_v21 = vcombine.high %v332_v2, %v332_v2 }
  0xe3   :  { %v342_v4 = vrot.slane %v331_v8, %v815_v20  ;;  %v335_v13 = vcombine.high %v331_v8, %v331_v8 }
  0xe4   :  { %v387_v14 = vsel %vm107_vm2, %v359_v5, 0.0  ;;  %v366_v27 = vrot.slane %v352_v21, %v815_v20  ;;  %v367_v30 = vcombine.high %v359_v5, %v359_v5 }
  0xe5   :  { %388 = vadd.xlane.f32.xlu0 %v387_v14  ;;  %v375_v6 = vsel %vm107_vm2, %v342_v4, 0.0  ;;  %v350_v15 = vcombine.high %v342_v4, %v342_v4  ;;  %v349_v18 = vrot.slane %v335_v13, %v815_v20 }
  0xe6   :  { %376 = vadd.xlane.f32.xlu1 %v375_v6  ;;  %v393_v32 = vsel %vm107_vm2, %v366_v27, 0.0  ;;  %v390_v20 = vsel %vm107_vm2, %v367_v30, 0.0 }
  0xe7   :  { %v378_v19 = vsel %vm107_vm2, %v350_v15, 0.0  ;;  %v381_v24 = vsel %vm107_vm2, %v349_v18, 0.0  ;;  %v351_v25 = vcombine.high %v349_v18, %v349_v18 }
  0xe9   :  { %379 = vadd.xlane.f32.xlu0 %v378_v19  ;;  %v384_v29 = vsel %vm107_vm2, %v351_v25, 0.0 }
  0xea   :  { %127 = vadd.xlane.f32.xlu1 %v126_v22 }
  0xed   :  { %382 = vadd.xlane.f32.xlu0 %v381_v24 }
  0xee   :  { %130 = vadd.xlane.f32.xlu1 %v129_v26 }
  0xf1   :  { %385 = vadd.xlane.f32.xlu0 %v384_v29 }
  0xf2   :  { %394 = vadd.xlane.f32.xlu1 %v393_v32 }
  0xf5   :  { %391 = vadd.xlane.f32.xlu0 %v390_v20 }
  0xf6   :  { %454 = vadd.xlane.f32.xlu1 %v453_v34 }
  0xf9   :  { %156 = vadd.xlane.f32.xlu0 %v155_v37 }
 0x115   :  { %v113_v39 = vpop.xlane.xlu1 %112 }
 0x116   :  { %v134_v43 = vsel %vm132_vm3, %v113_v39, 0.0 }
 0x11a   :  { %v122_v41 = vpop.xlane.xlu1 %121 }
 0x11b   :  { %v140_v53 = vsel %vm132_vm3, %v122_v41, 0.0 }
 0x11d   :  { %v110_v38 = vpop.xlane.xlu0 %109 }
 0x11e   :  { %v133_v42 = vsel %vm132_vm3, %v110_v38, 0.0  ;;  %v125_v3 = vpop.xlane.xlu1 %124 }
 0x11f   :  { %v135_v35 = vadd.f32 %v134_v43, %v133_v42  ;;  %v142_v60 = vsel %vm132_vm3, %v125_v3, 0.0 }
 0x121   :  { %v116_v40 = vpop.xlane.xlu0 %115 }
 0x122   :  { %v136_v45 = vsel %vm132_vm3, %v116_v40, 0.0 }
 0x123   :  { %v137_v47 = vadd.f32 %v136_v45, %v135_v35 }
 0x125   :  { %v119_v44 = vpop.xlane.xlu0 %118 }
 0x126   :  { %v138_v48 = vsel %vm132_vm3, %v119_v44, 0.0 }
 0x127   :  { %v139_v51 = vadd.f32 %v138_v48, %v137_v47 }
 0x129   :  { %v141_v59 = vadd.f32 %v140_v53, %v139_v51 }
 0x12b   :  { %v143_v2 = vadd.f32 %v142_v60, %v141_v59 }
 0x172   :  { %v389_v46 = vpop.xlane.xlu0 %388 }
 0x173   :  { %v377_v11 = vpop.xlane.xlu1 %376  ;;  %v403_v7 = vsel %vm132_vm3, %v389_v46, 0.0 }
 0x174   :  { %v396_v55 = vsel %vm132_vm3, %v377_v11, 0.0 }
 0x176   :  { %v380_v49 = vpop.xlane.xlu0 %379 }
 0x177   :  { %v128_v50 = vpop.xlane.xlu1 %127  ;;  %v397_v52 = vsel %vm132_vm3, %v380_v49, 0.0 }
 0x178   :  { %v398_v57 = vadd.f32 %v397_v52, %v396_v55  ;;  %v144_v0 = vsel %vm132_vm3, %v128_v50, 0.0 }
 0x179   :  { %v145_v4 = vadd.f32 %v144_v0, %v143_v2 }
 0x17a   :  { %v383_v54 = vpop.xlane.xlu0 %382 }
 0x17b   :  { %v399_v56 = vsel %vm132_vm3, %v383_v54, 0.0  ;;  %v131_v58 = vpop.xlane.xlu1 %130 }
 0x17c   :  { %v400_v61 = vadd.f32 %v399_v56, %v398_v57  ;;  %v146_v8 = vsel %vm132_vm3, %v131_v58, 0.0 }
 0x17d   :  { %v147_v6 = vadd.f32 %v146_v8, %v145_v4 }
 0x17e   :  { %v386_v62 = vpop.xlane.xlu0 %385 }
 0x17f   :  { %v401_v63 = vsel %vm132_vm3, %v386_v62, 0.0  ;;  %v395_v9 = vpop.xlane.xlu1 %394 }
 0x180   :  { %v402_v1 = vadd.f32 %v401_v63, %v400_v61  ;;  %v407_v15 = vsel %vm132_vm3, %v395_v9, 0.0 }
 0x182   :  { %v404_v5 = vadd.f32 %v403_v7, %v402_v1  ;;  %v392_v12 = vpop.xlane.xlu0 %391 }
 0x183   :  { %v405_v13 = vsel %vm132_vm3, %v392_v12, 0.0  ;;  %v455_v21 = vpop.xlane.xlu1 %454 }
 0x184   :  { %v406_v14 = vadd.f32 %v405_v13, %v404_v5 }
 0x186   :  { %v408_v16 = vadd.f32 %v407_v15, %v406_v14  ;;  %v157_v17 = vpop.xlane.xlu0 %156 }
 0x187   :  { %v456_v19 = vadd.f32 %v157_v17, %v147_v6 }
 0x189   :  { %v457_v18 = vadd.f32 %v456_v19, %v408_v16 }
 0x18b   :  { %v963_v22 = vadd.f32 %v457_v18, %v455_v21 }
 0x18c LB: > { %v474_v24 = vsel %vm107_vm2, %v716_v23, -inf  ;;  %v724_v25 = vmov 0.0   ;;  %vm725_vm4 = vmmov 0   ;;  %v726_v36 = vmov 0   ;;  %s628_s23 = sshll.u32 %s720_s5, 1  ;;  %s467_s5 = sadd.s32 1, %s720_s5   ;;  %s720_s5 = sphi %s966_s5, %s467_s5   ;;  %v716_v23 = vphi %v714_v23, %v715_v23  }
 0x18d   : > { %475 = vmax.xlane.f32.xlu0 %v474_v24  ;;  %641 = vmatprep.subr.mxu0 %v724_v25  ;;  %s472_s26 = scalar_lea.vmem %s1004_s2, %s628_s23  ;;  %s470_s3 = scalar_lea.vmem %s1002_s0, %s628_s23 }
 0x18e   : > { %643 = vmatprep.mubr.msk.f32.mxu0 %vm725_vm4, %v724_v25  ;;  %642 = vmatpush3.msk.msra.mxu0 %vm210_vm0, %v834_v31  ;;  %v473_v26 = vld [vmem:[%s472_s26] sm:$0x3]  ;;  %p464_p0 = scmp.ge.s32.totalorder %s467_s5, 8  }
 0x18f   : > { %673 = vset.pattern.permute.xlu1 %v726_v36  ;;  %672 = vset.pattern.permute.xlu0 %v726_v36  ;;  %v566_v27 = vsub.f32 1.0, %v473_v26  ;;  %v471_v39 = vld [vmem:[%s470_s3] sm:$0x3]  ;;  %s727_s0 = smov (%p464_p0), [#allocation2]   ;;  %vm595_vm5 = vcmask (%p464_p0), 0  }
 0x190   :  { %s603_s2 = sshll.u32 (%p464_p0), %s727_s0, 4  ;;  %s604_s2 = int_to_ptr.vmem [resolvable:$true] %s603_s2 }
 0x191   : > { %569 = vperm.xlu1 %673, %v566_v27   ;;  %s682_s29 = scalar_lea.vmem (%p464_p0), %s604_s2, 16  ;;  %s686_s30 = scalar_lea.vmem (%p464_p0), %s604_s2, 32 }
 0x192   :  { %p683_p1 = scmp.ne.s32.totalorder (%p464_p0), %s604_s2, %s682_s29  ;;  %p687_p2 = scmp.lt.s32.totalorder (%p464_p0), %s604_s2, %s604_s2 }
 0x193   :  { %p688_p3 = scmp.lt.s32.totalorder (%p464_p0), %s686_s30, %s682_s29 }
 0x195   :  { %p689_p4 = por (%p464_p0), %p688_p3, %p687_p2 }
 0x197   :  { %p690_p5 = pnand (%p464_p0), %p689_p4, %p683_p1 }
 0x1a3   : > { %562 = vperm.xlu0 %672, %v473_v26  }
 0x210   : > { %v570_v38 = vpop.permute.xlu1 %569 }
 0x211   : > { %v572_v42 = vmul.f32 %v716_v23, %v570_v38 }
 0x21a   : > { %v476_v29 = vpop.xlane.xlu0 %475 }
 0x21b   : > { %v477_v30 = vsub.f32 %v716_v23, %v476_v29 }
 0x21d   : > { %v478_v32 = vmul.f32 1.442695, %v477_v30 }
 0x21f   : > { %674 = vpow2.f32 %v478_v32 }
 0x222   : > { %v563_v41 = vpop.permute.xlu0 %562 }
 0x229   : > { %v675_v33 = vpop.eup %674 }
 0x22a   : > { %644 = vmatmul.mubr.msk.f32.vlgmr.msra.gmra.mrb[0].mxu0 %vm205_vm1, %v675_v33 }
 0x2fd   : > { %v552_v10 = vpop.f32.mrb[0].mxu0 }
 0x2fe   : > { %676 = vlog2.f32 %v552_v10  ;;  %v645_v20 = vpop.f32.mrb[1].mxu0 }
 0x308   : > { %v677_v34 = vpop.eup %676 }
 0x309   : > { %v557_v37 = vmul.f32 0.6931472, %v677_v34 }
 0x30b   : > { %v558_v40 = vadd.f32 %v557_v37, %v476_v29 }
 0x30d   : > { %v559_v43 = vadd.f32 %v558_v40, %v471_v39  ;;  %466 = sbr.rel (!%p464_p0) target bundleno = 396 (0x18c), region = 53 }
 0x30f   : > { %v565_v44 = vmul.f32 %v563_v41, %v559_v43 }
 0x311   : > { %v573_v3 = vadd.f32 %v572_v42, %v565_v44  }
 0x313   : > { %v715_v23 = vmov %v573_v3   ;;  %v574_v35 = vadd.f32 (%p464_p0), %v938_v28, %v573_v3 }
 0x315   :  { %v575_v45 = vsel %vm107_vm2, %v574_v35, -inf }
 0x316   :  { %576 = vmax.xlane.f32.xlu0 %v575_v45 }
 0x3a3   :  { %v577_v46 = vpop.xlane.xlu0 %576 }
 0x3a4   :  { %v578_v11 = vsub.f32 %v574_v35, %v577_v46 }
 0x3a6   :  { %v579_v47 = vmul.f32 1.442695, %v578_v11 }
 0x3a8   :  { %678 = vpow2.f32 %v579_v47 }
 0x3b2   :  { %v679_v48 = vpop.eup %678 }
 0x3b3   :  { %v581_v49 = vsel %vm107_vm2, %v679_v48, 0.0 }
 0x3b4   :  { %582 = vadd.xlane.f32.xlu0 %v581_v49 }
 0x441   :  { %v583_v50 = vpop.xlane.xlu0 %582 }
 0x442   :  { %680 = vlog2.f32 %v583_v50 }
 0x44c   :  { %v681_v51 = vpop.eup %680 }
 0x44d   :  { %v585_v52 = vmul.f32 0.6931472, %v681_v51 }
 0x44f   :  { %v586_v53 = vadd.f32 %v585_v52, %v577_v46 }
 0x451   :  { %v587_v54 = vsub.f32 %v963_v22, %v586_v53 }
 0x453   :  { %v588_v31 = vsel %vm132_vm3, %v587_v54, 0.0 }
 0x454   :  { %v589_v28 = vrot.slane %v588_v31, 4 }
 0x456   :  { %v590_v55 = vadd.f32 %v589_v28, %v588_v31 }
 0x458   :  { %v591_v56 = vrot.slane %v590_v55, 2 }
 0x45a   :  { %v592_v57 = vadd.f32 %v591_v56, %v590_v55 }
 0x45c   :  { %v593_v58 = vrot.slane %v592_v57, 1 }
 0x45e   :  { %v594_v59 = vadd.f32 %v593_v58, %v592_v57 }
 0x460   :  { %596 = vst.msk [vmem:[#allocation2] sm:$0x1] %vm595_vm5, %v594_v59 }
 0x461   :  { %693 = shalt.err (!%p690_p5)
}
 0x462   :  { %s694_s9 = scalar_lea.hbm %s1008_s6, 16 }
 0x463   :  { %p695_p6 = scmp.ne.s32.totalorder %s1008_s6, %s694_s9  ;;  %p698_p7 = scmp.lt.u32.totalorder %s694_s9, %s1008_s6 }
 0x465   :  { %p700_p8 = pnand %p698_p7, %p695_p6 }
 0x467   :  { %703 = shalt.err (!%p700_p8)
}
 0x468   :  { %606 = dma.vmem_to_hbm [thread:$0]  %s604_s2, 16, %s1008_s6, [#allocation3]  }
 0x469   :  { %712 = dma.done.wait [#allocation3], 16  }
 0x46a   :  { %713 = vsyncadd [#allocation3], 4294967280 }
 0x46b   :  { %610 = vsyncpa [#allocation3], 1 }

// kernel: bert_crf_forward.2
= control target key start
LH: loop header
LB: loop body
LE: loop exit
PB: predicated region body
PF: predicated region fallthrough
CT: control target
= control target key end

     0   :  { %vm63_vm0 = vcmask 261120   ;;  %v4659_v36 = vmov 0.0   ;;  %vm4660_vm1 = vmmov 0   ;;  %s4661_s19 = smov 96   ;;  %vm226_vm2 = vcmask 64512   ;;  %s4664_s22 = smov 88   ;;  %s5377_s0 = inlined_call_operand.vmem [shape: f32[16,32], index: 0, kind: input, shape index: {}]   ;;  %s5378_s4 = inlined_call_operand.vmem [shape: f32[2,32,96], index: 4, kind: input, shape index: {}]   ;;  %s5379_s2 = inlined_call_operand.vmem [shape: f32[1,32], index: 2, kind: input, shape index: {}]   ;;  %s5380_s3 = inlined_call_operand.vmem [shape: f32[1,32], index: 3, kind: input, shape index: {}]   ;;  %s5381_s5 = inlined_call_operand.vmem [shape: f32[2,1,96], index: 5, kind: input, shape index: {}]   ;;  %s5382_s1 = inlined_call_operand.vmem [shape: f32[2,8], index: 1, kind: input, shape index: {}]   ;;  %s5383_s6 = inlined_call_operand.vmem [shape: f32[2,32,32], index: 6, kind: input, shape index: {}]   ;;  %s5384_s7 = inlined_call_operand.vmem [shape: f32[2,1,32], index: 7, kind: input, shape index: {}]   ;;  %s5385_s10 = inlined_call_operand.vmem [shape: f32[2,32,64], index: 10, kind: input, shape index: {}]   ;;  %s5386_s8 = inlined_call_operand.vmem [shape: f32[2,1,32], index: 8, kind: input, shape index: {}]   ;;  %s5387_s9 = inlined_call_operand.vmem [shape: f32[2,1,32], index: 9, kind: input, shape index: {}]   ;;  %s5388_s12 = inlined_call_operand.vmem [shape: f32[2,64,32], index: 12, kind: input, shape index: {}]   ;;  %s5389_s11 = inlined_call_operand.vmem [shape: f32[2,1,64], index: 11, kind: input, shape index: {}]   ;;  %s5390_s13 = inlined_call_operand.vmem [shape: f32[2,1,32], index: 13, kind: input, shape index: {}]   ;;  %s5391_s14 = inlined_call_operand.vmem [shape: f32[2,1,32], index: 14, kind: input, shape index: {}]   ;;  %s5392_s15 = inlined_call_operand.vmem [shape: f32[2,1,32], index: 15, kind: input, shape index: {}]   ;;  %s5393_s16 = inlined_call_operand.vmem [shape: f32[32,128], index: 16, kind: input, shape index: {}]   ;;  %s5394_s17 = inlined_call_operand.vmem [shape: f32[1,128], index: 17, kind: input, shape index: {}]   ;;  %s5395_s18 = inlined_call_operand.vmem [shape: f32[16,128], index: 18, kind: output, shape index: {}]  }
   0x1   :  { %5414 = sst [smem:[#allocation2_spill]] %s5377_s0  ;;  %v3948_v29 = vld [vmem:[%s5380_s3] ss:$0 sm:$0xff]  ;;  %4198 = vmatprep.subr.mxu1 %v4659_v36  ;;  %4200 = vmatprep.mubr.msk.f32.mxu1 %vm4660_vm1, %v4659_v36  ;;  %v4662_v44 = vmov 1966171168   ;;  %v120_v46 = vlaneseq  ;;  %s4666_s23 = smov 56  }
   0x2   :  { %5415 = sst [smem:[#allocation3_spill]] %s5378_s4  ;;  %s5417_s29 = sld [smem:[#allocation2_spill]]  ;;  %v3950_v37 = vld [vmem:[%s5381_s5] ss:$0 sm:$0xff]  ;;  %v118_v45 = vunpack.c.l.s4 %v4662_v44  ;;  %vm1597_vm3 = vcmask 195584   ;;  %vm1594_vm4 = vcmask 130048  }
   0x3   :  { %5416 = sst [smem:[#allocation4_spill]] %s5379_s2  ;;  %s5418_s20 = sld [smem:[#allocation3_spill]]  ;;  %v121_v48 = vshrl.u32 %v120_v46, 7  ;;  %vm1863_vm5 = vcmask 523264  }
   0x4   :  { %s5419_s28 = sld [smem:[#allocation4_spill]]  ;;  %v119_v47 = vunpack.c.0.s8 %v118_v45  ;;  %v3949_v50 = vld.sshfl [vmem:[%s5382_s1] sm:$0x11 pattern:$0x75316420]  ;;  %s4663_s1 = smov 64  }
   0x5   :  { %v382_v52 = vsub.s32 0, %v121_v48  ;;  %v116_v53 = vcombine.high %v3949_v50, %v3949_v50  ;;  %s4665_s2 = smov 120   ;;  %s4667_s24 = smov 80  }
   0x6   :  { %v122_v49 = vsub.s32 %v119_v47, %v121_v48  ;;  %s5412_s25 = smov 112   ;;  %s5410_s26 = smov 48  }
   0x7   :  { %s5406_s27 = smov 72   ;;  %s5400_s30 = smov 8  }
   0x8   :  { %v59_v0 = vld [vmem:[%s5417_s29] sm:$0xff]  ;;  %v60_v1 = vld [vmem:[%s5417_s29 + $0x8] sm:$0xff]  ;;  %v123_v51 = vrot.slane %v3949_v50, %v122_v49  ;;  %v130_v55 = vrot.slane %v116_v53, %v122_v49  ;;  %s5402_s29 = smov 40   ;;  %s5398_s3 = smov 16  }
   0x9   :  { %v64_v2 = vsel %vm63_vm0, %v59_v0, 0.0  ;;  %v67_v3 = vsel %vm63_vm0, %v60_v1, 0.0  ;;  %v131_v14 = vld [vmem:[%s5418_s20] sm:$0xff]  ;;  %v132_v15 = vld [vmem:[%s5418_s20 + $0x8] sm:$0xff]  ;;  %v133_v16 = vld [vmem:[%s5418_s20 + $0x10] sm:$0xff]  ;;  %s5408_s0 = smov 24  }
   0xa   :  { %65 = vadd.xlane.f32.xlu0 %v64_v2  ;;  %v4462_v17 = vpack.c.bf16 %v132_v15, %v131_v14  ;;  %v134_v18 = vld [vmem:[%s5418_s20 + $0x18] sm:$0xff]  ;;  %v3947_v27 = vld [vmem:[%s5419_s28] ss:$0 sm:$0xff]  ;;  %v4839_v54 = vrot.slane %v123_v51, %v382_v52  ;;  %v4842_v60 = vrot.slane %v130_v55, %v382_v52  ;;  %s5404_s28 = smov 104   ;;  %s5427_s4 = smov 24  }
   0xb   :  { %v4466_v19 = vpack.c.bf16 %v134_v18, %v133_v16 }
   0xc   :  { %4463 = vmatprep.subr.bf16.mxu0 %v4462_v17 }
   0xd   :  { %4465 = vmatpush3.bf16.msra.mxu0 %v4462_v17 }
   0xe   :  { %68 = vadd.xlane.f32.xlu0 %v67_v3  ;;  %4467 = vmatprep.subr.bf16.mxu0 %v4466_v19 }
  0x11   :  { %4469 = vmatpush3.bf16.msra.mxu0 %v4466_v19 }
  0x12   :  { %4218 = vmatprep.subr.mxu0 %v4659_v36 }
  0x97   :  { %v66_v4 = vpop.xlane.xlu0 %65 }
  0x98   :  { %v71_v5 = vmul.f32 0.03125, %v66_v4 }
  0x9a   :  { %v73_v6 = vsub.f32 %v59_v0, %v71_v5 }
  0x9b   :  { %v69_v7 = vpop.xlane.xlu0 %68 }
  0x9c   :  { %v72_v8 = vmul.f32 0.03125, %v69_v7  ;;  %v75_v9 = vmul.f32 %v73_v6, %v73_v6 }
  0x9e   :  { %v74_v10 = vsub.f32 %v60_v1, %v72_v8  ;;  %v77_v11 = vsel %vm63_vm0, %v75_v9, 0.0 }
  0x9f   :  { %78 = vadd.xlane.f32.xlu1 %v77_v11 }
  0xa0   :  { %v76_v12 = vmul.f32 %v74_v10, %v74_v10 }
  0xa2   :  { %v80_v13 = vsel %vm63_vm0, %v76_v12, 0.0 }
  0xa3   :  { %81 = vadd.xlane.f32.xlu1 %v80_v13 }
 0x12c   :  { %v79_v20 = vpop.xlane.xlu1 %78 }
 0x12d   :  { %v83_v21 = vmul.f32 0.03125, %v79_v20 }
 0x12f   :  { %v85_v22 = vadd.f32 1e-12, %v83_v21 }
 0x130   :  { %v82_v23 = vpop.xlane.xlu1 %81 }
 0x131   :  { %4567 = vrsqrt.f32 %v85_v22  ;;  %v84_v24 = vmul.f32 0.03125, %v82_v23 }
 0x133   :  { %v86_v25 = vadd.f32 1e-12, %v84_v24 }
 0x135   :  { %4569 = vrsqrt.f32 %v86_v25 }
 0x13b   :  { %v4568_v26 = vpop.eup %4567 }
 0x13c   :  { %v89_v28 = vmul.f32 %v4568_v26, %v73_v6 }
 0x13e   :  { %v97_v30 = vmul.f32 %v3947_v27, %v89_v28 }
 0x13f   :  { %v4570_v31 = vpop.eup %4569 }
 0x140   :  { %v90_v32 = vmul.f32 %v4570_v31, %v74_v10  ;;  %v4799_v33 = vadd.f32 %v3948_v29, %v97_v30 }
 0x142   :  { %v98_v34 = vmul.f32 %v3947_v27, %v90_v32  ;;  %4195 = vmatprep.mubr.msk.f32.mxu0 %vm63_vm0, %v4799_v33 }
 0x144   :  { %v4803_v35 = vadd.f32 %v3948_v29, %v98_v34 }
 0x146   :  { %4196 = vmatmul.mubr.msk.f32.vlgmr.msra.gmra.mrb[0].mxu0 %vm63_vm0, %v4803_v35 }
 0x147   :  { %4220 = vmatprep.mubr.msk.f32.mxu0 %vm4660_vm1, %v4659_v36 }
 0x219   :  { %v4197_v38 = vpop.f32.mrb[0].mxu0 }
 0x21a   :  { %v4816_v39 = vadd.f32 %v4197_v38, %v3950_v37  ;;  %v214_v40 = vpop.f32.mrb[1].mxu0 }
 0x21b   :  { %v4818_v41 = vadd.f32 %v3950_v37, %v214_v40 }
 0x21c   :  { %302 = vrot.lane.b32.xlu1 %v4816_v39, %s4661_s19 }
 0x21d   :  { %224 = vrot.lane.b32.xlu0 %v4818_v41, %s4661_s19 }
 0x28e   :  { %v303_v43 = vpop.permute.xlu1 %302 }
 0x28f   :  { %v225_v42 = vpop.permute.xlu0 %224 }
 0x290   :  { %4199 = vmatpush3.xpose.msk.msra.mxu1 %vm226_vm2, %v225_v42 }
 0x291   :  { %4203 = vmatprep.subr.mxu1 %v4659_v36 }
 0x293   :  { %4201 = vmatmul.mubr.msk.f32.vlgmr.msra.gmra.mrb[0].mxu1 %vm226_vm2, %v4818_v41 }
 0x294   :  { %4204 = vmatpush3.xpose.msk.msra.mxu1 %vm226_vm2, %v303_v43  ;;  %4205 = vmatprep.mubr.msk.f32.mxu1 %vm4660_vm1, %v4659_v36 }
 0x295   :  { %4208 = vmatprep.subr.mxu1 %v4659_v36 }
 0x297   :  { %4206 = vmatmul.mubr.msk.f32.vlgmr.msra.gmra.mrb[2].mxu1 %vm226_vm2, %v4816_v39 }
 0x298   :  { %4210 = vmatprep.mubr.msk.f32.mxu1 %vm4660_vm1, %v4659_v36 }
 0x366   :  { %v297_v56 = vpop.f32.mrb[0].mxu1 }
 0x367   :  { %v378_v57 = vmul.f32 0.35355338, %v297_v56  ;;  %v4202_v58 = vpop.f32.mrb[1].mxu1 }
 0x369   :  { %v390_v59 = vadd.f32 %v4839_v54, %v378_v57 }
 0x36a   :  { %v374_v61 = vpop.f32.mrb[2].mxu1 }
 0x36b   :  { %v379_v62 = vmul.f32 0.35355338, %v374_v61  ;;  %v4207_v63 = vpop.f32.mrb[3].mxu1  ;;  %v392_v0 = vsel %vm226_vm2, %v390_v59, -inf }
 0x36c   :  { %393 = vmax.xlane.f32.xlu1 %v392_v0 }
 0x36d   :  { %v391_v1 = vadd.f32 %v4842_v60, %v379_v62 }
 0x36f   :  { %v395_v2 = vsel %vm226_vm2, %v391_v1, -inf }
 0x370   :  { %396 = vmax.xlane.f32.xlu0 %v395_v2 }
 0x37d   :  { %490 = vrot.lane.b32.xlu1 %v4816_v39, %s4663_s1 }
 0x381   :  { %568 = vrot.lane.b32.xlu1 %v4818_v41, %s4664_s22 }
 0x385   :  { %646 = vrot.lane.b32.xlu1 %v4816_v39, %s4664_s22 }
 0x3f9   :  { %v394_v3 = vpop.xlane.xlu1 %393 }
 0x3fa   :  { %v398_v4 = vsub.f32 %v390_v59, %v394_v3 }
 0x3fc   :  { %v400_v5 = vmul.f32 1.442695, %v398_v4 }
 0x3fd   :  { %v491_v6 = vpop.permute.xlu1 %490  ;;  %v397_v7 = vpop.xlane.xlu0 %396 }
 0x3fe   :  { %4571 = vpow2.f32 %v400_v5  ;;  %v399_v8 = vsub.f32 %v391_v1, %v397_v7 }
 0x400   :  { %v402_v9 = vmul.f32 1.442695, %v399_v8 }
 0x401   :  { %v569_v10 = vpop.permute.xlu1 %568 }
 0x402   :  { %4573 = vpow2.f32 %v402_v9  ;;  %4219 = vmatpush3.xpose.msk.msra.mxu0 %vm226_vm2, %v569_v10 }
 0x403   :  { %4228 = vmatprep.subr.mxu0 %v4659_v36 }
 0x405   :  { %v647_v15 = vpop.permute.xlu1 %646 }
 0x408   :  { %v4572_v11 = vpop.eup %4571 }
 0x409   :  { %v404_v12 = vsel %vm226_vm2, %v4572_v11, 0.0 }
 0x40a   :  { %405 = vadd.xlane.f32.xlu0 %v404_v12 }
 0x40c   :  { %v4574_v13 = vpop.eup %4573 }
 0x40d   :  { %v407_v14 = vsel %vm226_vm2, %v4574_v13, 0.0 }
 0x40e   :  { %408 = vadd.xlane.f32.xlu1 %v407_v14 }
 0x41f   :  { %644 = vrot.lane.b32.xlu1 %v4816_v39, %s4665_s2 }
 0x420   :  { %414 = vrot.lane.b32.xlu0 %v4818_v41, %s4663_s1 }
 0x424   :  { %566 = vrot.lane.b32.xlu0 %v4818_v41, %s4665_s2 }
 0x497   :  { %v406_v16 = vpop.xlane.xlu0 %405 }
 0x498   :  { %4575 = vrcp.f32 %v406_v16 }
 0x49b   :  { %v409_v17 = vpop.xlane.xlu1 %408  ;;  %v415_v18 = vpop.permute.xlu0 %414 }
 0x49c   :  { %4577 = vrcp.f32 %v409_v17  ;;  %4209 = vmatpush3.msra.mxu1 %v415_v18 }
 0x49d   :  { %4213 = vmatprep.subr.mxu1 %v4659_v36 }
 0x49f   :  { %v567_v19 = vpop.permute.xlu0 %566  ;;  %v645_v24 = vpop.permute.xlu1 %644 }
 0x4a0   :  { %4221 = vmatmul.mubr.msk.f32.vlgmr.msra.gmra.mrb[2].mxu0 %vm226_vm2, %v567_v19 }
 0x4a1   :  { %4230 = vmatprep.mubr.msk.f32.mxu0 %vm4660_vm1, %v4659_v36 }
 0x4a2   :  { %v4576_v20 = vpop.eup %4575 }
 0x4a3   :  { %v412_v21 = vmul.f32 %v4576_v20, %v4572_v11 }
 0x4a5   :  { %4211 = vmatmul.mubr.msk.f32.vlgmr.msra.gmra.mrb[4].mxu1 %vm226_vm2, %v412_v21 }
 0x4a6   :  { %v4578_v22 = vpop.eup %4577  ;;  %4214 = vmatpush3.msra.mxu1 %v491_v6  ;;  %4215 = vmatprep.mubr.msk.f32.mxu1 %vm4660_vm1, %v4659_v36 }
 0x4a7   :  { %v413_v23 = vmul.f32 %v4578_v22, %v4574_v13  ;;  %4223 = vmatprep.subr.mxu1 %v4659_v36 }
 0x4a9   :  { %4216 = vmatmul.mubr.msk.f32.vlgmr.msra.gmra.mrb[6].mxu1 %vm226_vm2, %v413_v23 }
 0x4aa   :  { %4225 = vmatprep.mubr.msk.f32.mxu1 %vm4660_vm1, %v4659_v36 }
 0x4ad   :  { %4224 = vmatpush3.xpose.msk.msra.mxu1 %vm226_vm2, %v647_v15 }
 0x4ae   :  { %4233 = vmatprep.subr.mxu1 %v4659_v36 }
 0x4b0   :  { %4226 = vmatmul.mubr.msk.f32.vlgmr.msra.gmra.mrb[8].mxu1 %vm226_vm2, %v645_v24 }
 0x4b1   :  { %4235 = vmatprep.mubr.msk.f32.mxu1 %vm4660_vm1, %v4659_v36 }
 0x573   :  { %v640_v25 = vpop.f32.mrb[2].mxu0 }
 0x574   :  { %v722_v26 = vmul.f32 0.35355338, %v640_v25  ;;  %v4222_v27 = vpop.f32.mrb[3].mxu0 }
 0x576   :  { %v724_v28 = vadd.f32 %v722_v26, %v4839_v54 }
 0x578   :  { %v4880_v29 = vpop.f32.mrb[4].mxu1  ;;  %v726_v30 = vsel %vm226_vm2, %v724_v28, -inf }
 0x579   :  { %727 = vmax.xlane.f32.xlu0 %v726_v30  ;;  %v4212_v31 = vpop.f32.mrb[5].mxu1 }
 0x57c   :  { %v4883_v32 = vpop.f32.mrb[6].mxu1 }
 0x57d   :  { %v4217_v34 = vpop.f32.mrb[7].mxu1 }
 0x583   :  { %v718_v37 = vpop.f32.mrb[8].mxu1 }
 0x584   :  { %v723_v38 = vmul.f32 0.35355338, %v718_v37  ;;  %v4227_v40 = vpop.f32.mrb[9].mxu1 }
 0x586   :  { %v725_v42 = vadd.f32 %v723_v38, %v4842_v60 }
 0x588   :  { %v729_v43 = vsel %vm226_vm2, %v725_v42, -inf }
 0x589   :  { %730 = vmax.xlane.f32.xlu1 %v729_v43 }
 0x59a   :  { %824 = vrot.lane.b32.xlu1 %v4816_v39, %s4666_s23 }
 0x59e   :  { %902 = vrot.lane.b32.xlu1 %v4818_v41, %s4667_s24 }
 0x5a2   :  { %980 = vrot.lane.b32.xlu1 %v4816_v39, %s4667_s24 }
 0x5a6   :  { %978 = vrot.lane.b32.xlu1 %v4816_v39, %s5412_s25 }
 0x606   :  { %v728_v44 = vpop.xlane.xlu0 %727 }
 0x607   :  { %v732_v45 = vsub.f32 %v724_v28, %v728_v44 }
 0x609   :  { %v734_v46 = vmul.f32 1.442695, %v732_v45 }
 0x60b   :  { %4579 = vpow2.f32 %v734_v46 }
 0x615   :  { %v4580_v47 = vpop.eup %4579 }
 0x616   :  { %v731_v48 = vpop.xlane.xlu1 %730  ;;  %v738_v49 = vsel %vm226_vm2, %v4580_v47, 0.0 }
 0x617   :  { %739 = vadd.xlane.f32.xlu0 %v738_v49  ;;  %v733_v51 = vsub.f32 %v725_v42, %v731_v48 }
 0x619   :  { %v736_v52 = vmul.f32 1.442695, %v733_v51 }
 0x61a   :  { %v825_v50 = vpop.permute.xlu1 %824 }
 0x61b   :  { %4234 = vmatpush3.msra.mxu1 %v825_v50  ;;  %4581 = vpow2.f32 %v736_v52 }
 0x61c   :  { %4243 = vmatprep.subr.mxu1 %v4659_v36 }
 0x61e   :  { %v903_v61 = vpop.permute.xlu1 %902 }
 0x622   :  { %v981_v1 = vpop.permute.xlu1 %980 }
 0x625   :  { %v4582_v53 = vpop.eup %4581 }
 0x626   :  { %v741_v55 = vsel %vm226_vm2, %v4582_v53, 0.0  ;;  %v979_v3 = vpop.permute.xlu1 %978 }
 0x62d   :  { %748 = vrot.lane.b32.xlu0 %v4818_v41, %s4666_s23 }
 0x64c   :  { %742 = vadd.xlane.f32.xlu0 %v741_v55 }
 0x662   :  { %900 = vrot.lane.b32.xlu0 %v4818_v41, %s5412_s25 }
 0x6a4   :  { %v740_v56 = vpop.xlane.xlu0 %739 }
 0x6a5   :  { %4583 = vrcp.f32 %v740_v56 }
 0x6a8   :  { %v749_v57 = vpop.permute.xlu0 %748 }
 0x6a9   :  { %4229 = vmatpush3.msra.mxu0 %v749_v57 }
 0x6aa   :  { %4238 = vmatprep.subr.mxu0 %v4659_v36 }
 0x6af   :  { %v4584_v58 = vpop.eup %4583 }
 0x6b0   :  { %v746_v59 = vmul.f32 %v4584_v58, %v4580_v47 }
 0x6b2   :  { %4231 = vmatmul.mubr.msk.f32.vlgmr.msra.gmra.mrb[4].mxu0 %vm226_vm2, %v746_v59 }
 0x6b3   :  { %4239 = vmatpush3.xpose.msk.msra.mxu0 %vm226_vm2, %v903_v61  ;;  %4240 = vmatprep.mubr.msk.f32.mxu0 %vm4660_vm1, %v4659_v36 }
 0x6b4   :  { %4248 = vmatprep.subr.mxu0 %v4659_v36 }
 0x6d9   :  { %v743_v62 = vpop.xlane.xlu0 %742 }
 0x6da   :  { %4585 = vrcp.f32 %v743_v62 }
 0x6dd   :  { %v901_v63 = vpop.permute.xlu0 %900 }
 0x6de   :  { %4241 = vmatmul.mubr.msk.f32.vlgmr.msra.gmra.mrb[6].mxu0 %vm226_vm2, %v901_v63 }
 0x6df   :  { %4250 = vmatprep.mubr.msk.f32.mxu0 %vm4660_vm1, %v4659_v36 }
 0x6e4   :  { %v4586_v0 = vpop.eup %4585 }
 0x6e5   :  { %v747_v2 = vmul.f32 %v4586_v0, %v4582_v53 }
 0x6e7   :  { %4236 = vmatmul.mubr.msk.f32.vlgmr.msra.gmra.mrb[10].mxu1 %vm226_vm2, %v747_v2 }
 0x6e8   :  { %4244 = vmatpush3.xpose.msk.msra.mxu1 %vm226_vm2, %v981_v1  ;;  %4245 = vmatprep.mubr.msk.f32.mxu1 %vm4660_vm1, %v4659_v36 }
 0x6e9   :  { %4253 = vmatprep.subr.mxu1 %v4659_v36 }
 0x6eb   :  { %4246 = vmatmul.mubr.msk.f32.vlgmr.msra.gmra.mrb[12].mxu1 %vm226_vm2, %v979_v3 }
 0x6ec   :  { %4255 = vmatprep.mubr.msk.f32.mxu1 %vm4660_vm1, %v4659_v36 }
 0x785   :  { %v4919_v4 = vpop.f32.mrb[4].mxu0 }
 0x786   :  { %v4232_v5 = vpop.f32.mrb[5].mxu0 }
 0x7b1   :  { %v974_v6 = vpop.f32.mrb[6].mxu0 }
 0x7b2   :  { %v1056_v7 = vmul.f32 0.35355338, %v974_v6  ;;  %v4242_v8 = vpop.f32.mrb[7].mxu0 }
 0x7b4   :  { %v1058_v9 = vadd.f32 %v1056_v7, %v4839_v54 }
 0x7b6   :  { %v1060_v10 = vsel %vm226_vm2, %v1058_v9, -inf }
 0x7b7   :  { %1061 = vmax.xlane.f32.xlu0 %v1060_v10 }
 0x7ba   :  { %v4923_v11 = vpop.f32.mrb[10].mxu1 }
 0x7bb   :  { %v4237_v12 = vpop.f32.mrb[11].mxu1 }
 0x7be   :  { %v1052_v13 = vpop.f32.mrb[12].mxu1 }
 0x7bf   :  { %v1057_v14 = vmul.f32 0.35355338, %v1052_v13  ;;  %v4247_v15 = vpop.f32.mrb[13].mxu1 }
 0x7c1   :  { %v1059_v16 = vadd.f32 %v1057_v14, %v4842_v60 }
 0x7c3   :  { %v1063_v17 = vsel %vm226_vm2, %v1059_v16, -inf }
 0x7c4   :  { %1064 = vmax.xlane.f32.xlu1 %v1063_v17 }
 0x7d5   :  { %1158 = vrot.lane.b32.xlu1 %v4816_v39, %s5410_s26 }
 0x7d9   :  { %1236 = vrot.lane.b32.xlu1 %v4818_v41, %s5406_s27 }
 0x7dd   :  { %1314 = vrot.lane.b32.xlu1 %v4816_v39, %s5406_s27 }
 0x7e1   :  { %1312 = vrot.lane.b32.xlu1 %v4816_v39, %s5404_s28 }
 0x844   :  { %v1062_v18 = vpop.xlane.xlu0 %1061 }
 0x845   :  { %v1066_v19 = vsub.f32 %v1058_v9, %v1062_v18  ;;  %v1602_v18 = vld [vmem:[%s5383_s6 + $0x10] sm:$0xff] }
 0x847   :  { %v1068_v20 = vmul.f32 1.442695, %v1066_v19  ;;  %v1603_v19 = vld [vmem:[%s5383_s6 + $0x18] sm:$0xff] }
 0x849   :  { %4587 = vpow2.f32 %v1068_v20  ;;  %v4474_v20 = vpack.c.bf16 %v1603_v19, %v1602_v18  ;;  %v1849_v18 = vld [vmem:[%s5388_s12 + $0x8] sm:$0xff] }
 0x851   :  { %v1065_v21 = vpop.xlane.xlu1 %1064 }
 0x852   :  { %v1067_v25 = vsub.f32 %v1059_v16, %v1065_v21  ;;  %v1601_v16 = vld [vmem:[%s5383_s6 + $0x8] sm:$0xff] }
 0x853   :  { %v4588_v22 = vpop.eup %4587 }
 0x854   :  { %v1072_v23 = vsel %vm226_vm2, %v4588_v22, 0.0  ;;  %v1070_v26 = vmul.f32 1.442695, %v1067_v25 }
 0x855   :  { %1073 = vadd.xlane.f32.xlu0 %v1072_v23  ;;  %v1159_v24 = vpop.permute.xlu1 %1158 }
 0x856   :  { %4254 = vmatpush3.msra.mxu1 %v1159_v24  ;;  %4589 = vpow2.f32 %v1070_v26 }
 0x857   :  { %4263 = vmatprep.subr.mxu1 %v4659_v36 }
 0x859   :  { %v1237_v38 = vpop.permute.xlu1 %1236 }
 0x85d   :  { %v1315_v44 = vpop.permute.xlu1 %1314 }
 0x860   :  { %v4590_v27 = vpop.eup %4589 }
 0x861   :  { %v1075_v28 = vsel %vm226_vm2, %v4590_v27, 0.0  ;;  %v1313_v46 = vpop.permute.xlu1 %1312 }
 0x86b   :  { %1082 = vrot.lane.b32.xlu0 %v4818_v41, %s5410_s26 }
 0x88a   :  { %1076 = vadd.xlane.f32.xlu0 %v1075_v28 }
 0x8a0   :  { %1234 = vrot.lane.b32.xlu0 %v4818_v41, %s5404_s28 }
 0x8e2   :  { %v1074_v30 = vpop.xlane.xlu0 %1073 }
 0x8e3   :  { %4591 = vrcp.f32 %v1074_v30 }
 0x8e6   :  { %v1083_v31 = vpop.permute.xlu0 %1082 }
 0x8e7   :  { %4249 = vmatpush3.msra.mxu0 %v1083_v31 }
 0x8e8   :  { %4258 = vmatprep.subr.mxu0 %v4659_v36 }
 0x8ed   :  { %v4592_v34 = vpop.eup %4591 }
 0x8ee   :  { %v1080_v37 = vmul.f32 %v4592_v34, %v4588_v22 }
 0x8f0   :  { %4251 = vmatmul.mubr.msk.f32.vlgmr.msra.gmra.mrb[8].mxu0 %vm226_vm2, %v1080_v37 }
 0x8f1   :  { %4259 = vmatpush3.xpose.msk.msra.mxu0 %vm226_vm2, %v1237_v38  ;;  %4260 = vmatprep.mubr.msk.f32.mxu0 %vm4660_vm1, %v4659_v36 }
 0x8f2   :  { %4268 = vmatprep.subr.mxu0 %v4659_v36 }
 0x917   :  { %v1077_v40 = vpop.xlane.xlu0 %1076 }
 0x918   :  { %4593 = vrcp.f32 %v1077_v40 }
 0x91b   :  { %v1235_v42 = vpop.permute.xlu0 %1234 }
 0x91c   :  { %4261 = vmatmul.mubr.msk.f32.vlgmr.msra.gmra.mrb[10].mxu0 %vm226_vm2, %v1235_v42 }
 0x91d   :  { %4270 = vmatprep.mubr.msk.f32.mxu0 %vm4660_vm1, %v4659_v36 }
 0x922   :  { %v4594_v43 = vpop.eup %4593 }
 0x923   :  { %v1081_v45 = vmul.f32 %v4594_v43, %v4590_v27 }
 0x925   :  { %4256 = vmatmul.mubr.msk.f32.vlgmr.msra.gmra.mrb[14].mxu1 %vm226_vm2, %v1081_v45 }
 0x926   :  { %4264 = vmatpush3.xpose.msk.msra.mxu1 %vm226_vm2, %v1315_v44  ;;  %4265 = vmatprep.mubr.msk.f32.mxu1 %vm4660_vm1, %v4659_v36 }
 0x927   :  { %4273 = vmatprep.subr.mxu1 %v4659_v36 }
 0x929   :  { %4266 = vmatmul.mubr.msk.f32.vlgmr.msra.gmra.mrb[16].mxu1 %vm226_vm2, %v1313_v46 }
 0x92a   :  { %4275 = vmatprep.mubr.msk.f32.mxu1 %vm4660_vm1, %v4659_v36 }
 0x9c3   :  { %v1154_v47 = vpop.f32.mrb[8].mxu0 }
 0x9c4   :  { %v4252_v48 = vpop.f32.mrb[9].mxu0 }
 0x9ef   :  { %v1308_v49 = vpop.f32.mrb[10].mxu0 }
 0x9f0   :  { %v1390_v50 = vmul.f32 0.35355338, %v1308_v49  ;;  %v4262_v51 = vpop.f32.mrb[11].mxu0 }
 0x9f2   :  { %v1392_v52 = vadd.f32 %v1390_v50, %v4839_v54 }
 0x9f4   :  { %v1394_v53 = vsel %vm226_vm2, %v1392_v52, -inf }
 0x9f5   :  { %1395 = vmax.xlane.f32.xlu0 %v1394_v53 }
 0x9f8   :  { %v1230_v55 = vpop.f32.mrb[14].mxu1 }
 0x9f9   :  { %v4257_v56 = vpop.f32.mrb[15].mxu1 }
 0x9fc   :  { %v1386_v57 = vpop.f32.mrb[16].mxu1 }
 0x9fd   :  { %v1391_v58 = vmul.f32 0.35355338, %v1386_v57  ;;  %v4267_v59 = vpop.f32.mrb[17].mxu1 }
 0x9ff   :  { %v1393_v61 = vadd.f32 %v1391_v58, %v4842_v60 }
 0xa01   :  { %v1397_v62 = vsel %vm226_vm2, %v1393_v61, -inf }
 0xa02   :  { %1398 = vmax.xlane.f32.xlu1 %v1397_v62  ;;  %v1739_v62 = vld [vmem:[%s5385_s10 + $0x8] sm:$0xff] }
 0xa13   :  { %1492 = vrot.lane.b32.xlu1 %v4816_v39, %s5402_s29 }
 0xa17   :  { %1570 = vrot.lane.b32.xlu1 %v4919_v4, %s5400_s30 }
 0xa1b   :  { %1572 = vrot.lane.b32.xlu1 %v4923_v11, %s5400_s30 }
 0xa1f   :  { %1580 = vrot.lane.b32.xlu1 %v1230_v55, %s5398_s3 }
 0xa82   :  { %v1396_v63 = vpop.xlane.xlu0 %1395 }
 0xa83   :  { %v1400_v0 = vsub.f32 %v1392_v52, %v1396_v63 }
 0xa85   :  { %v1402_v1 = vmul.f32 1.442695, %v1400_v0  ;;  %v1740_v0 = vld [vmem:[%s5385_s10 + $0x10] sm:$0xff] }
 0xa87   :  { %4595 = vpow2.f32 %v1402_v1  ;;  %v1741_v1 = vld [vmem:[%s5385_s10 + $0x18] sm:$0xff] }
 0xa8f   :  { %v1399_v2 = vpop.xlane.xlu1 %1398 }
 0xa90   :  { %v1401_v3 = vsub.f32 %v1393_v61, %v1399_v2  ;;  %v4482_v2 = vpack.c.bf16 %v1741_v1, %v1740_v0 }
 0xa91   :  { %v4596_v5 = vpop.eup %4595 }
 0xa92   :  { %v1404_v6 = vmul.f32 1.442695, %v1401_v3  ;;  %v1406_v39 = vsel %vm226_vm2, %v4596_v5, 0.0 }
 0xa93   :  { %1407 = vadd.xlane.f32.xlu0 %v1406_v39  ;;  %v1493_v7 = vpop.permute.xlu1 %1492 }
 0xa94   :  { %4597 = vpow2.f32 %v1404_v6  ;;  %4274 = vmatpush3.msra.mxu1 %v1493_v7 }
 0xa97   :  { %v1571_v25 = vpop.permute.xlu1 %1570 }
 0xa98   :  { %v1592_v28 = vsel %vm226_vm2, %v4880_v29, %v1571_v25  ;;  %v3977_v29 = vld [vmem:[%s5384_s7] ss:$0 sm:$0xff] }
 0xa9b   :  { %v1573_v27 = vpop.permute.xlu1 %1572 }
 0xa9c   :  { %v1593_v38 = vsel %vm226_vm2, %v4883_v32, %v1573_v27  ;;  %v1855_v27 = vld [vmem:[%s5388_s12 + $0x38] sm:$0xff] }
 0xa9e   :  { %v4598_v4 = vpop.eup %4597 }
 0xa9f   :  { %v1409_v8 = vsel %vm226_vm2, %v4598_v4, 0.0  ;;  %v1581_v37 = vpop.permute.xlu1 %1580 }
 0xaa0   :  { %1410 = vadd.xlane.f32.xlu0 %v1409_v8  ;;  %v1596_v40 = vsel %vm1594_vm4, %v1593_v38, %v1581_v37 }
 0xab6   :  { %1416 = vrot.lane.b32.xlu0 %v4818_v41, %s5402_s29  ;;  %v1600_v41 = vld [vmem:[%s5383_s6] sm:$0xff] }
 0xab7   :  { %v4470_v17 = vpack.c.bf16 %v1601_v16, %v1600_v41 }
 0xaba   :  { %1578 = vrot.lane.b32.xlu0 %v1154_v47, %s5398_s3 }
 0xb20   :  { %v1408_v9 = vpop.xlane.xlu0 %1407 }
 0xb21   :  { %4599 = vrcp.f32 %v1408_v9  ;;  %v3980_v9 = vld [vmem:[%s5386_s8] ss:$0 sm:$0xff] }
 0xb2b   :  { %v4600_v11 = vpop.eup %4599 }
 0xb2c   :  { %v1414_v12 = vmul.f32 %v4600_v11, %v4596_v5  ;;  %v3981_v11 = vld [vmem:[%s5387_s9] ss:$0 sm:$0xff] }
 0xb2d   :  { %v1411_v10 = vpop.xlane.xlu0 %1410 }
 0xb2e   :  { %4601 = vrcp.f32 %v1411_v10 }
 0xb31   :  { %v1417_v13 = vpop.permute.xlu0 %1416 }
 0xb32   :  { %4269 = vmatpush3.msra.mxu0 %v1417_v13 }
 0xb33   :  { %4271 = vmatmul.mubr.msk.f32.vlgmr.msra.gmra.mrb[12].mxu0 %vm226_vm2, %v1414_v12  ;;  %4471 = vmatprep.subr.bf16.mxu0 %v4470_v17 }
 0xb34   :  { %4473 = vmatpush3.bf16.msra.mxu0 %v4470_v17  ;;  %v1848_v17 = vld [vmem:[%s5388_s12] sm:$0xff] }
 0xb35   :  { %4475 = vmatprep.subr.bf16.mxu0 %v4474_v20  ;;  %v1579_v26 = vpop.permute.xlu0 %1578  ;;  %v4486_v19 = vpack.c.bf16 %v1849_v18, %v1848_v17 }
 0xb36   :  { %v1595_v30 = vsel %vm1594_vm4, %v1592_v28, %v1579_v26  ;;  %v1854_v26 = vld [vmem:[%s5388_s12 + $0x30] sm:$0xff] }
 0xb37   :  { %v4498_v28 = vpack.c.bf16 %v1855_v27, %v1854_v26  ;;  %v3989_v27 = vld [vmem:[%s5392_s15] ss:$0 sm:$0xff] }
 0xb38   :  { %v4602_v14 = vpop.eup %4601  ;;  %4477 = vmatpush3.bf16.msra.mxu0 %v4474_v20  ;;  %v1850_v20 = vld [vmem:[%s5388_s12 + $0x10] sm:$0xff] }
 0xb39   :  { %v1415_v15 = vmul.f32 %v4602_v14, %v4598_v4  ;;  %4487 = vmatprep.subr.bf16.mxu0 %v4486_v19 }
 0xb3b   :  { %4276 = vmatmul.mubr.msk.f32.vlgmr.msra.gmra.mrb[18].mxu1 %vm226_vm2, %v1415_v15 }
 0xc06   :  { %v1488_v21 = vpop.f32.mrb[12].mxu0 }
 0xc07   :  { %1586 = vrot.lane.b32.xlu0 %v1488_v21, %s5408_s0  ;;  %v4272_v22 = vpop.f32.mrb[13].mxu0  ;;  %v1851_v21 = vld [vmem:[%s5388_s12 + $0x18] sm:$0xff] }
 0xc08   :  { %v4490_v22 = vpack.c.bf16 %v1851_v21, %v1850_v20 }
 0xc0e   :  { %v1564_v23 = vpop.f32.mrb[18].mxu1 }
 0xc0f   :  { %1588 = vrot.lane.b32.xlu1 %v1564_v23, %s5408_s0  ;;  %v4277_v24 = vpop.f32.mrb[19].mxu1  ;;  %v1852_v23 = vld [vmem:[%s5388_s12 + $0x20] sm:$0xff] }
 0xc10   :  { %v1853_v24 = vld [vmem:[%s5388_s12 + $0x28] sm:$0xff] }
 0xc11   :  { %v4494_v25 = vpack.c.bf16 %v1853_v24, %v1852_v23  ;;  %v3988_v23 = vld [vmem:[%s5391_s14] ss:$0 sm:$0xff] }
 0xc79   :  { %v1587_v31 = vpop.permute.xlu0 %1586 }
 0xc7a   :  { %v1598_v34 = vsel %vm1597_vm3, %v1595_v30, %v1587_v31  ;;  %v3982_v30 = vld [vmem:[%s5389_s11] ss:$0 sm:$0xff] }
 0xc7b   :  { %4286 = vmatprep.mubr.msk.f32.mxu0 %vm63_vm0, %v1598_v34 }
 0xc81   :  { %v1589_v42 = vpop.permute.xlu1 %1588 }
 0xc82   :  { %v1599_v43 = vsel %vm1597_vm3, %v1596_v40, %v1589_v42 }
 0xc83   :  { %4287 = vmatmul.mubr.msk.f32.vlgmr.msra.gmra.mrb[14].mxu0 %vm63_vm0, %v1599_v43 }
 0xc84   :  { %4489 = vmatpush3.bf16.msra.mxu0 %v4486_v19 }
 0xc85   :  { %4491 = vmatprep.subr.bf16.mxu0 %v4490_v22 }
 0xc88   :  { %4493 = vmatpush3.bf16.msra.mxu0 %v4490_v22 }
 0xc89   :  { %4495 = vmatprep.subr.bf16.mxu0 %v4494_v25 }
 0xc8c   :  { %4497 = vmatpush3.bf16.msra.mxu0 %v4494_v25 }
 0xc8d   :  { %4499 = vmatprep.subr.bf16.mxu0 %v4498_v28 }
 0xc90   :  { %4501 = vmatpush3.bf16.msra.mxu0 %v4498_v28 }
 0xc91   :  { %4340 = vmatprep.subr.mxu0 %v4659_v36 }
 0xd56   :  { %v4288_v44 = vpop.f32.mrb[14].mxu0 }
 0xd57   :  { %v1689_v45 = vadd.f32 %v4288_v44, %v3977_v29  ;;  %v1683_v46 = vpop.f32.mrb[15].mxu0 }
 0xd58   :  { %v1684_v47 = vadd.f32 %v3977_v29, %v1683_v46 }
 0xd59   :  { %v1693_v48 = vadd.f32 %v1689_v45, %v4803_v35 }
 0xd5a   :  { %v1692_v49 = vadd.f32 %v1684_v47, %v4799_v33  ;;  %v1738_v33 = vld [vmem:[%s5385_s10] sm:$0xff] }
 0xd5b   :  { %v1699_v32 = vsel %vm63_vm0, %v1693_v48, 0.0  ;;  %v4478_v63 = vpack.c.bf16 %v1739_v62, %v1738_v33 }
 0xd5c   :  { %1700 = vadd.xlane.f32.xlu1 %v1699_v32  ;;  %v1696_v50 = vsel %vm63_vm0, %v1692_v49, 0.0 }
 0xd5d   :  { %1697 = vadd.xlane.f32.xlu0 %v1696_v50  ;;  %4479 = vmatprep.subr.bf16.mxu1 %v4478_v63 }
 0xd5e   :  { %4481 = vmatpush3.bf16.msra.mxu1 %v4478_v63 }
 0xd5f   :  { %4483 = vmatprep.subr.bf16.mxu1 %v4482_v2 }
 0xd62   :  { %4485 = vmatpush3.bf16.msra.mxu1 %v4482_v2 }
 0xde9   :  { %v1701_v51 = vpop.xlane.xlu1 %1700 }
 0xdea   :  { %v1703_v52 = vmul.f32 0.03125, %v1701_v51  ;;  %v1698_v53 = vpop.xlane.xlu0 %1697 }
 0xdeb   :  { %v1702_v55 = vmul.f32 0.03125, %v1698_v53 }
 0xdec   :  { %v1705_v56 = vsub.f32 %v1693_v48, %v1703_v52 }
 0xded   :  { %v1704_v57 = vsub.f32 %v1692_v49, %v1702_v55 }
 0xdee   :  { %v1707_v61 = vmul.f32 %v1705_v56, %v1705_v56 }
 0xdef   :  { %v1706_v58 = vmul.f32 %v1704_v57, %v1704_v57 }
 0xdf0   :  { %v1711_v35 = vsel %vm63_vm0, %v1707_v61, 0.0 }
 0xdf1   :  { %v1708_v59 = vsel %vm63_vm0, %v1706_v58, 0.0  ;;  %v3985_v58 = vld [vmem:[%s5390_s13] ss:$0 sm:$0xff] }
 0xdf2   :  { %1709 = vadd.xlane.f32.xlu0 %v1708_v59 }
 0xdf6   :  { %1712 = vadd.xlane.f32.xlu0 %v1711_v35 }
 0xe7f   :  { %v1710_v3 = vpop.xlane.xlu0 %1709 }
 0xe80   :  { %v1714_v5 = vmul.f32 0.03125, %v1710_v3 }
 0xe82   :  { %v1716_v6 = vadd.f32 1e-12, %v1714_v5 }
 0xe83   :  { %v1713_v39 = vpop.xlane.xlu0 %1712 }
 0xe84   :  { %4603 = vrsqrt.f32 %v1716_v6  ;;  %v1715_v7 = vmul.f32 0.03125, %v1713_v39 }
 0xe86   :  { %v1717_v4 = vadd.f32 1e-12, %v1715_v7 }
 0xe88   :  { %4605 = vrsqrt.f32 %v1717_v4 }
 0xe8e   :  { %v4604_v8 = vpop.eup %4603 }
 0xe8f   :  { %v1720_v10 = vmul.f32 %v4604_v8, %v1704_v57 }
 0xe91   :  { %v1728_v12 = vmul.f32 %v3980_v9, %v1720_v10 }
 0xe92   :  { %v4606_v13 = vpop.eup %4605 }
 0xe93   :  { %v1721_v14 = vmul.f32 %v4606_v13, %v1705_v56  ;;  %v5028_v15 = vadd.f32 %v3981_v11, %v1728_v12  ;;  %v3991_v12 = vld [vmem:[%s5418_s20 + $0x28] sm:$0xff] }
 0xe95   :  { %v1729_v41 = vmul.f32 %v3980_v9, %v1721_v14  ;;  %4297 = vmatprep.mubr.msk.f32.mxu1 %vm63_vm0, %v5028_v15  ;;  %v3992_v14 = vld [vmem:[%s5418_s20 + $0x30] sm:$0xff] }
 0xe97   :  { %v1737_v16 = vadd.f32 %v3981_v11, %v1729_v41  ;;  %v3990_v11 = vld [vmem:[%s5418_s20 + $0x20] sm:$0xff] }
 0xe98   :  { %v4502_v13 = vpack.c.bf16 %v3991_v12, %v3990_v11 }
 0xe99   :  { %4298 = vmatmul.mubr.msk.f32.vlgmr.msra.gmra.mrb[20].mxu1 %vm63_vm0, %v1737_v16 }
 0xe9a   :  { %4503 = vmatprep.subr.bf16.mxu1 %v4502_v13 }
 0xe9b   :  { %4505 = vmatpush3.bf16.msra.mxu1 %v4502_v13 }
 0xf6c   :  { %v4299_v31 = vpop.f32.mrb[20].mxu1 }
 0xf6d   :  { %v1827_v34 = vadd.f32 %v4299_v31, %v3982_v30  ;;  %v1821_v37 = vpop.f32.mrb[21].mxu1 }
 0xf6e   :  { %v1822_v38 = vadd.f32 %v3982_v30, %v1821_v37  ;;  %v3995_v37 = vld [vmem:[%s5381_s5 + $0x1] ss:$0 sm:$0xff]  ;;  %s5420_s5 = smov 112  }
 0xf6f   :  { %v1833_v40 = vmul.f32 0.044715, %v1827_v34  ;;  %v1831_v55 = vmul.f32 0.5, %v1827_v34 }
 0xf70   :  { %v1832_v42 = vmul.f32 0.044715, %v1822_v38  ;;  %v1830_v52 = vmul.f32 0.5, %v1822_v38 }
 0xf71   :  { %v1835_v43 = vmul.f32 %v1833_v40, %v1827_v34 }
 0xf72   :  { %v1834_v29 = vmul.f32 %v1832_v42, %v1822_v38 }
 0xf73   :  { %v1837_v44 = vmul.f32 %v1835_v43, %v1827_v34 }
 0xf74   :  { %v1836_v45 = vmul.f32 %v1834_v29, %v1822_v38 }
 0xf75   :  { %v1839_v46 = vadd.f32 %v1837_v44, %v1827_v34 }
 0xf76   :  { %v1838_v47 = vadd.f32 %v1836_v45, %v1822_v38 }
 0xf77   :  { %v1841_v48 = vmul.f32 0.7978846, %v1839_v46 }
 0xf78   :  { %v1840_v49 = vmul.f32 0.7978846, %v1838_v47 }
 0xf79   :  { %4607 = vtanh.f32 %v1841_v48 }
 0xf7a   :  { %4609 = vtanh.f32 %v1840_v49 }
 0xf83   :  { %v4608_v32 = vpop.eup %4607 }
 0xf84   :  { %v4610_v50 = vpop.eup %4609  ;;  %v1845_v51 = vadd.f32 1.0, %v4608_v32 }
 0xf85   :  { %v1844_v53 = vadd.f32 1.0, %v4610_v50 }
 0xf86   :  { %v1847_v57 = vmul.f32 %v1845_v51, %v1831_v55 }
 0xf87   :  { %v1846_v56 = vmul.f32 %v1844_v53, %v1830_v52 }
 0xf89   :  { %4316 = vmatprep.mubr.msk.f32.mxu0 %vm1863_vm5, %v1846_v56 }
 0xf8a   :  { %4317 = vmatmul.mubr.msk.f32.vlgmr.msra.gmra.mrb[16].mxu0 %vm1863_vm5, %v1847_v57 }
 0xf8b   :  { %4342 = vmatprep.mubr.msk.f32.mxu0 %vm4660_vm1, %v4659_v36 }
0x105d   :  { %v4318_v59 = vpop.f32.mrb[16].mxu0 }
0x105e   :  { %v1942_v61 = vadd.f32 %v4318_v59, %v3985_v58  ;;  %v1936_v35 = vpop.f32.mrb[17].mxu0 }
0x105f   :  { %v1937_v33 = vadd.f32 %v3985_v58, %v1936_v35 }
0x1060   :  { %v1946_v62 = vadd.f32 %v1942_v61, %v1737_v16 }
0x1061   :  { %v1945_v63 = vadd.f32 %v1937_v33, %v5028_v15  ;;  %v3993_v15 = vld [vmem:[%s5418_s20 + $0x38] sm:$0xff] }
0x1062   :  { %v1952_v0 = vsel %vm63_vm0, %v1946_v62, 0.0  ;;  %v4506_v41 = vpack.c.bf16 %v3993_v15, %v3992_v14 }
0x1063   :  { %1953 = vadd.xlane.f32.xlu1 %v1952_v0  ;;  %v1949_v1 = vsel %vm63_vm0, %v1945_v63, 0.0 }
0x1064   :  { %1950 = vadd.xlane.f32.xlu0 %v1949_v1  ;;  %4507 = vmatprep.subr.bf16.mxu1 %v4506_v41 }
0x1065   :  { %4509 = vmatpush3.bf16.msra.mxu1 %v4506_v41 }
0x1066   :  { %4330 = vmatprep.subr.mxu1 %v4659_v36 }
0x10f0   :  { %v1954_v2 = vpop.xlane.xlu1 %1953 }
0x10f1   :  { %v1956_v3 = vmul.f32 0.03125, %v1954_v2  ;;  %v1951_v5 = vpop.xlane.xlu0 %1950 }
0x10f2   :  { %v1955_v6 = vmul.f32 0.03125, %v1951_v5 }
0x10f3   :  { %v1958_v39 = vsub.f32 %v1946_v62, %v1956_v3 }
0x10f4   :  { %v1957_v7 = vsub.f32 %v1945_v63, %v1955_v6 }
0x10f5   :  { %v1960_v4 = vmul.f32 %v1958_v39, %v1958_v39 }
0x10f6   :  { %v1959_v8 = vmul.f32 %v1957_v7, %v1957_v7 }
0x10f7   :  { %v1964_v9 = vsel %vm63_vm0, %v1960_v4, 0.0 }
0x10f8   :  { %1965 = vadd.xlane.f32.xlu1 %v1964_v9  ;;  %v1961_v10 = vsel %vm63_vm0, %v1959_v8, 0.0 }
0x10f9   :  { %1962 = vadd.xlane.f32.xlu0 %v1961_v10 }
0x1185   :  { %v1966_v16 = vpop.xlane.xlu1 %1965 }
0x1186   :  { %v1968_v17 = vmul.f32 0.03125, %v1966_v16  ;;  %v1963_v18 = vpop.xlane.xlu0 %1962 }
0x1187   :  { %v1967_v19 = vmul.f32 0.03125, %v1963_v18 }
0x1188   :  { %v1970_v20 = vadd.f32 1e-12, %v1968_v17 }
0x1189   :  { %v1969_v21 = vadd.f32 1e-12, %v1967_v19 }
0x118a   :  { %4611 = vrsqrt.f32 %v1970_v20 }
0x118b   :  { %4613 = vrsqrt.f32 %v1969_v21 }
0x1194   :  { %v4612_v22 = vpop.eup %4611 }
0x1195   :  { %v4614_v24 = vpop.eup %4613  ;;  %v1974_v25 = vmul.f32 %v4612_v22, %v1958_v39 }
0x1196   :  { %v1973_v26 = vmul.f32 %v4614_v24, %v1957_v7 }
0x1197   :  { %v1982_v28 = vmul.f32 %v3988_v23, %v1974_v25 }
0x1198   :  { %v1981_v30 = vmul.f32 %v3988_v23, %v1973_v26 }
0x1199   :  { %v5094_v34 = vadd.f32 %v3989_v27, %v1982_v28 }
0x119a   :  { %v5092_v31 = vadd.f32 %v3989_v27, %v1981_v30 }
0x119c   :  { %4327 = vmatprep.mubr.msk.f32.mxu1 %vm63_vm0, %v5092_v31 }
0x119d   :  { %4328 = vmatmul.mubr.msk.f32.vlgmr.msra.gmra.mrb[22].mxu1 %vm63_vm0, %v5094_v34 }
0x119e   :  { %4332 = vmatprep.mubr.msk.f32.mxu1 %vm4660_vm1, %v4659_v36 }
0x1270   :  { %v4329_v38 = vpop.f32.mrb[22].mxu1 }
0x1271   :  { %v5105_v40 = vadd.f32 %v4329_v38, %v3995_v37  ;;  %v2076_v42 = vpop.f32.mrb[23].mxu1 }
0x1272   :  { %v5107_v43 = vadd.f32 %v3995_v37, %v2076_v42 }
0x1273   :  { %2163 = vrot.lane.b32.xlu1 %v5105_v40, %s4661_s19 }
0x1274   :  { %2086 = vrot.lane.b32.xlu0 %v5107_v43, %s4661_s19  ;;  %s5421_s19 = smov 48  }
0x12e5   :  { %v2164_v44 = vpop.permute.xlu1 %2163 }
0x12e6   :  { %v2087_v29 = vpop.permute.xlu0 %2086 }
0x12e7   :  { %4331 = vmatpush3.xpose.msk.msra.mxu1 %vm226_vm2, %v2087_v29 }
0x12e8   :  { %4335 = vmatprep.subr.mxu1 %v4659_v36 }
0x12ea   :  { %4333 = vmatmul.mubr.msk.f32.vlgmr.msra.gmra.mrb[24].mxu1 %vm226_vm2, %v5107_v43 }
0x12eb   :  { %4336 = vmatpush3.xpose.msk.msra.mxu1 %vm226_vm2, %v2164_v44  ;;  %4337 = vmatprep.mubr.msk.f32.mxu1 %vm4660_vm1, %v4659_v36 }
0x12ec   :  { %4345 = vmatprep.subr.mxu1 %v4659_v36 }
0x12ee   :  { %4338 = vmatmul.mubr.msk.f32.vlgmr.msra.gmra.mrb[26].mxu1 %vm226_vm2, %v5105_v40 }
0x12ef   :  { %4347 = vmatprep.mubr.msk.f32.mxu1 %vm4660_vm1, %v4659_v36 }
0x13bd   :  { %v2158_v45 = vpop.f32.mrb[24].mxu1 }
0x13be   :  { %v2239_v46 = vmul.f32 0.35355338, %v2158_v45  ;;  %v4334_v47 = vpop.f32.mrb[25].mxu1 }
0x13c0   :  { %v2241_v48 = vadd.f32 %v2239_v46, %v4839_v54 }
0x13c1   :  { %v2235_v49 = vpop.f32.mrb[26].mxu1 }
0x13c2   :  { %v2240_v32 = vmul.f32 0.35355338, %v2235_v49  ;;  %v4339_v50 = vpop.f32.mrb[27].mxu1  ;;  %v2243_v51 = vsel %vm226_vm2, %v2241_v48, -inf }
0x13c3   :  { %2244 = vmax.xlane.f32.xlu1 %v2243_v51 }
0x13c4   :  { %v2242_v52 = vadd.f32 %v2240_v32, %v4842_v60 }
0x13c6   :  { %v2246_v53 = vsel %vm226_vm2, %v2242_v52, -inf }
0x13c7   :  { %2247 = vmax.xlane.f32.xlu0 %v2246_v53 }
0x13d4   :  { %2341 = vrot.lane.b32.xlu1 %v5105_v40, %s4663_s1 }
0x13d8   :  { %2419 = vrot.lane.b32.xlu1 %v5107_v43, %s4664_s22 }
0x13dc   :  { %2497 = vrot.lane.b32.xlu1 %v5105_v40, %s4664_s22  ;;  %s5423_s22 = smov 104  }
0x13dd   :  { %2265 = vrot.lane.b32.xlu0 %v5107_v43, %s4663_s1  ;;  %s5422_s1 = smov 72  }
0x1450   :  { %v2245_v55 = vpop.xlane.xlu1 %2244 }
0x1451   :  { %v2249_v56 = vsub.f32 %v2241_v48, %v2245_v55 }
0x1453   :  { %v2251_v57 = vmul.f32 1.442695, %v2249_v56 }
0x1454   :  { %v2342_v58 = vpop.permute.xlu1 %2341  ;;  %v2248_v59 = vpop.xlane.xlu0 %2247 }
0x1455   :  { %4615 = vpow2.f32 %v2251_v57  ;;  %v2250_v61 = vsub.f32 %v2242_v52, %v2248_v59  ;;  %4346 = vmatpush3.msra.mxu1 %v2342_v58 }
0x1456   :  { %4355 = vmatprep.subr.mxu1 %v4659_v36 }
0x1457   :  { %v2253_v35 = vmul.f32 1.442695, %v2250_v61 }
0x1458   :  { %v2266_v33 = vpop.permute.xlu0 %2265  ;;  %v2420_v2 = vpop.permute.xlu1 %2419 }
0x1459   :  { %4617 = vpow2.f32 %v2253_v35  ;;  %4341 = vmatpush3.msra.mxu0 %v2266_v33 }
0x145a   :  { %4350 = vmatprep.subr.mxu0 %v4659_v36 }
0x145c   :  { %v2498_v3 = vpop.permute.xlu1 %2497 }
0x145f   :  { %v4616_v62 = vpop.eup %4615 }
0x1460   :  { %v2255_v63 = vsel %vm226_vm2, %v4616_v62, 0.0 }
0x1461   :  { %2256 = vadd.xlane.f32.xlu0 %v2255_v63 }
0x1463   :  { %v4618_v0 = vpop.eup %4617 }
0x1464   :  { %v2258_v1 = vsel %vm226_vm2, %v4618_v0, 0.0 }
0x1465   :  { %2259 = vadd.xlane.f32.xlu1 %v2258_v1 }
0x1476   :  { %2495 = vrot.lane.b32.xlu1 %v5105_v40, %s4665_s2 }
0x1477   :  { %2417 = vrot.lane.b32.xlu0 %v5107_v43, %s4665_s2  ;;  %s5424_s2 = smov 40  }
0x14ee   :  { %v2257_v5 = vpop.xlane.xlu0 %2256 }
0x14ef   :  { %4619 = vrcp.f32 %v2257_v5 }
0x14f2   :  { %v2260_v6 = vpop.xlane.xlu1 %2259  ;;  %v2418_v9 = vpop.permute.xlu0 %2417 }
0x14f3   :  { %4621 = vrcp.f32 %v2260_v6 }
0x14f6   :  { %v2496_v10 = vpop.permute.xlu1 %2495 }
0x14f9   :  { %v4620_v39 = vpop.eup %4619 }
0x14fa   :  { %v2263_v7 = vmul.f32 %v4620_v39, %v4616_v62 }
0x14fc   :  { %4343 = vmatmul.mubr.msk.f32.vlgmr.msra.gmra.mrb[18].mxu0 %vm226_vm2, %v2263_v7 }
0x14fd   :  { %v4622_v4 = vpop.eup %4621  ;;  %4351 = vmatpush3.xpose.msk.msra.mxu0 %vm226_vm2, %v2420_v2  ;;  %4352 = vmatprep.mubr.msk.f32.mxu0 %vm4660_vm1, %v4659_v36 }
0x14fe   :  { %v2264_v8 = vmul.f32 %v4622_v4, %v4618_v0  ;;  %4360 = vmatprep.subr.mxu0 %v4659_v36 }
0x1500   :  { %4348 = vmatmul.mubr.msk.f32.vlgmr.msra.gmra.mrb[28].mxu1 %vm226_vm2, %v2264_v8  ;;  %4353 = vmatmul.mubr.msk.f32.vlgmr.msra.gmra.mrb[20].mxu0 %vm226_vm2, %v2418_v9 }
0x1501   :  { %4356 = vmatpush3.xpose.msk.msra.mxu1 %vm226_vm2, %v2498_v3  ;;  %4357 = vmatprep.mubr.msk.f32.mxu1 %vm4660_vm1, %v4659_v36 }
0x1502   :  { %4365 = vmatprep.subr.mxu1 %v4659_v36  ;;  %4362 = vmatprep.mubr.msk.f32.mxu0 %vm4660_vm1, %v4659_v36 }
0x1504   :  { %4358 = vmatmul.mubr.msk.f32.vlgmr.msra.gmra.mrb[30].mxu1 %vm226_vm2, %v2496_v10 }
0x1505   :  { %4367 = vmatprep.mubr.msk.f32.mxu1 %vm4660_vm1, %v4659_v36 }
0x15cf   :  { %v5161_v11 = vpop.f32.mrb[18].mxu0 }
0x15d0   :  { %v4344_v12 = vpop.f32.mrb[19].mxu0 }
0x15d3   :  { %v5163_v13 = vpop.f32.mrb[28].mxu1  ;;  %v2491_v14 = vpop.f32.mrb[20].mxu0 }
0x15d4   :  { %v2573_v15 = vmul.f32 0.35355338, %v2491_v14  ;;  %v4349_v41 = vpop.f32.mrb[29].mxu1  ;;  %v4354_v16 = vpop.f32.mrb[21].mxu0 }
0x15d6   :  { %v2575_v17 = vadd.f32 %v2573_v15, %v4839_v54 }
0x15d7   :  { %v2569_v18 = vpop.f32.mrb[30].mxu1 }
0x15d8   :  { %v2574_v19 = vmul.f32 0.35355338, %v2569_v18  ;;  %v4359_v20 = vpop.f32.mrb[31].mxu1  ;;  %v2577_v21 = vsel %vm226_vm2, %v2575_v17, -inf }
0x15d9   :  { %2578 = vmax.xlane.f32.xlu0 %v2577_v21 }
0x15da   :  { %v2576_v22 = vadd.f32 %v2574_v19, %v4842_v60 }
0x15dc   :  { %v2580_v23 = vsel %vm226_vm2, %v2576_v22, -inf }
0x15dd   :  { %2581 = vmax.xlane.f32.xlu1 %v2580_v23 }
0x15ee   :  { %2675 = vrot.lane.b32.xlu1 %v5105_v40, %s4666_s23 }
0x15ef   :  { %2599 = vrot.lane.b32.xlu0 %v5107_v43, %s4666_s23  ;;  %s5425_s23 = smov 8  }
0x15f2   :  { %2753 = vrot.lane.b32.xlu1 %v5107_v43, %s4667_s24 }
0x15f6   :  { %2831 = vrot.lane.b32.xlu1 %v5105_v40, %s4667_s24  ;;  %s5426_s24 = smov 16  }
0x15fa   :  { %2829 = vrot.lane.b32.xlu1 %v5105_v40, %s5420_s5 }
0x1666   :  { %v2579_v24 = vpop.xlane.xlu0 %2578 }
0x1667   :  { %v2583_v25 = vsub.f32 %v2575_v17, %v2579_v24 }
0x1669   :  { %v2585_v26 = vmul.f32 1.442695, %v2583_v25 }
0x166a   :  { %v2600_v27 = vpop.permute.xlu0 %2599  ;;  %v2582_v28 = vpop.xlane.xlu1 %2581 }
0x166b   :  { %4623 = vpow2.f32 %v2585_v26  ;;  %v2584_v30 = vsub.f32 %v2576_v22, %v2582_v28  ;;  %4361 = vmatpush3.msra.mxu0 %v2600_v27 }
0x166c   :  { %4370 = vmatprep.subr.mxu0 %v4659_v36 }
0x166d   :  { %v2587_v37 = vmul.f32 1.442695, %v2584_v30 }
0x166e   :  { %v2676_v38 = vpop.permute.xlu1 %2675 }
0x166f   :  { %4625 = vpow2.f32 %v2587_v37  ;;  %4366 = vmatpush3.msra.mxu1 %v2676_v38 }
0x1670   :  { %4375 = vmatprep.subr.mxu1 %v4659_v36 }
0x1672   :  { %v2754_v48 = vpop.permute.xlu1 %2753 }
0x1675   :  { %v4624_v42 = vpop.eup %4623 }
0x1676   :  { %v2589_v29 = vsel %vm226_vm2, %v4624_v42, 0.0  ;;  %v2832_v51 = vpop.permute.xlu1 %2831 }
0x1677   :  { %2590 = vadd.xlane.f32.xlu0 %v2589_v29 }
0x1679   :  { %v4626_v44 = vpop.eup %4625 }
0x167a   :  { %v2592_v45 = vsel %vm226_vm2, %v4626_v44, 0.0  ;;  %v2830_v55 = vpop.permute.xlu1 %2829 }
0x167b   :  { %2593 = vadd.xlane.f32.xlu0 %v2592_v45 }
0x1691   :  { %2751 = vrot.lane.b32.xlu0 %v5107_v43, %s5420_s5 }
0x1704   :  { %v2591_v46 = vpop.xlane.xlu0 %2590 }
0x1705   :  { %4627 = vrcp.f32 %v2591_v46 }
0x1708   :  { %v2594_v47 = vpop.xlane.xlu0 %2593 }
0x1709   :  { %4629 = vrcp.f32 %v2594_v47 }
0x170c   :  { %v2752_v53 = vpop.permute.xlu0 %2751 }
0x170f   :  { %v4628_v49 = vpop.eup %4627 }
0x1710   :  { %v2597_v32 = vmul.f32 %v4628_v49, %v4624_v42 }
0x1712   :  { %4363 = vmatmul.mubr.msk.f32.vlgmr.msra.gmra.mrb[22].mxu0 %vm226_vm2, %v2597_v32 }
0x1713   :  { %v4630_v50 = vpop.eup %4629  ;;  %4371 = vmatpush3.xpose.msk.msra.mxu0 %vm226_vm2, %v2754_v48  ;;  %4372 = vmatprep.mubr.msk.f32.mxu0 %vm4660_vm1, %v4659_v36 }
0x1714   :  { %v2598_v52 = vmul.f32 %v4630_v50, %v4626_v44  ;;  %4380 = vmatprep.subr.mxu0 %v4659_v36 }
0x1716   :  { %4368 = vmatmul.mubr.msk.f32.vlgmr.msra.gmra.mrb[32].mxu1 %vm226_vm2, %v2598_v52  ;;  %4373 = vmatmul.mubr.msk.f32.vlgmr.msra.gmra.mrb[24].mxu0 %vm226_vm2, %v2752_v53 }
0x1717   :  { %4376 = vmatpush3.xpose.msk.msra.mxu1 %vm226_vm2, %v2832_v51  ;;  %4377 = vmatprep.mubr.msk.f32.mxu1 %vm4660_vm1, %v4659_v36 }
0x1718   :  { %4385 = vmatprep.subr.mxu1 %v4659_v36  ;;  %4382 = vmatprep.mubr.msk.f32.mxu0 %vm4660_vm1, %v4659_v36 }
0x171a   :  { %4378 = vmatmul.mubr.msk.f32.vlgmr.msra.gmra.mrb[34].mxu1 %vm226_vm2, %v2830_v55 }
0x171b   :  { %4387 = vmatprep.mubr.msk.f32.mxu1 %vm4660_vm1, %v4659_v36 }
0x17e5   :  { %v5201_v56 = vpop.f32.mrb[22].mxu0 }
0x17e6   :  { %v4364_v57 = vpop.f32.mrb[23].mxu0 }
0x17e9   :  { %v5203_v58 = vpop.f32.mrb[32].mxu1  ;;  %v2825_v59 = vpop.f32.mrb[24].mxu0 }
0x17ea   :  { %v2907_v61 = vmul.f32 0.35355338, %v2825_v59  ;;  %v4369_v35 = vpop.f32.mrb[33].mxu1  ;;  %v4374_v33 = vpop.f32.mrb[25].mxu0 }
0x17ec   :  { %v2909_v62 = vadd.f32 %v2907_v61, %v4839_v54 }
0x17ed   :  { %v2903_v63 = vpop.f32.mrb[34].mxu1 }
0x17ee   :  { %v2908_v0 = vmul.f32 0.35355338, %v2903_v63  ;;  %v4379_v1 = vpop.f32.mrb[35].mxu1  ;;  %v2911_v2 = vsel %vm226_vm2, %v2909_v62, -inf }
0x17ef   :  { %2912 = vmax.xlane.f32.xlu0 %v2911_v2  ;;  %v4024_v2 = vld [vmem:[%s5383_s6 + $0x30] sm:$0xff] }
0x17f0   :  { %v2910_v3 = vadd.f32 %v2908_v0, %v4842_v60  ;;  %v4023_v0 = vld [vmem:[%s5383_s6 + $0x28] sm:$0xff] }
0x17f2   :  { %v2914_v5 = vsel %vm226_vm2, %v2910_v3, -inf }
0x17f3   :  { %2915 = vmax.xlane.f32.xlu1 %v2914_v5 }
0x1804   :  { %3009 = vrot.lane.b32.xlu1 %v5105_v40, %s5421_s19 }
0x1805   :  { %2933 = vrot.lane.b32.xlu0 %v5107_v43, %s5421_s19 }
0x1808   :  { %3087 = vrot.lane.b32.xlu1 %v5107_v43, %s5422_s1 }
0x180c   :  { %3165 = vrot.lane.b32.xlu1 %v5105_v40, %s5422_s1 }
0x1810   :  { %3163 = vrot.lane.b32.xlu1 %v5105_v40, %s5423_s22 }
0x187c   :  { %v2913_v6 = vpop.xlane.xlu0 %2912 }
0x187d   :  { %v2917_v39 = vsub.f32 %v2909_v62, %v2913_v6 }
0x187f   :  { %v2919_v7 = vmul.f32 1.442695, %v2917_v39 }
0x1880   :  { %v2934_v4 = vpop.permute.xlu0 %2933  ;;  %v2916_v8 = vpop.xlane.xlu1 %2915 }
0x1881   :  { %4631 = vpow2.f32 %v2919_v7  ;;  %v2918_v9 = vsub.f32 %v2910_v3, %v2916_v8  ;;  %4381 = vmatpush3.msra.mxu0 %v2934_v4  ;;  %v4025_v3 = vld [vmem:[%s5383_s6 + $0x38] sm:$0xff] }
0x1882   :  { %4390 = vmatprep.subr.mxu0 %v4659_v36  ;;  %v4514_v5 = vpack.c.bf16 %v4025_v3, %v4024_v2  ;;  %v4045_v2 = vld [vmem:[%s5388_s12 + $0x58] sm:$0xff] }
0x1883   :  { %v2921_v10 = vmul.f32 1.442695, %v2918_v9 }
0x1884   :  { %v3010_v12 = vpop.permute.xlu1 %3009 }
0x1885   :  { %4633 = vpow2.f32 %v2921_v10  ;;  %4386 = vmatpush3.msra.mxu1 %v3010_v12 }
0x1886   :  { %4395 = vmatprep.subr.mxu1 %v4659_v36 }
0x1888   :  { %v3088_v19 = vpop.permute.xlu1 %3087 }
0x188b   :  { %v4632_v14 = vpop.eup %4631 }
0x188c   :  { %v2923_v15 = vsel %vm226_vm2, %v4632_v14, 0.0  ;;  %v3166_v23 = vpop.permute.xlu1 %3165 }
0x188d   :  { %2924 = vadd.xlane.f32.xlu0 %v2923_v15 }
0x188f   :  { %v4634_v41 = vpop.eup %4633 }
0x1890   :  { %v2926_v16 = vsel %vm226_vm2, %v4634_v41, 0.0  ;;  %v3164_v26 = vpop.permute.xlu1 %3163 }
0x1891   :  { %2927 = vadd.xlane.f32.xlu0 %v2926_v16 }
0x18a7   :  { %3085 = vrot.lane.b32.xlu0 %v5107_v43, %s5423_s22 }
0x191a   :  { %v2925_v17 = vpop.xlane.xlu0 %2924 }
0x191b   :  { %4635 = vrcp.f32 %v2925_v17 }
0x191e   :  { %v2928_v18 = vpop.xlane.xlu0 %2927 }
0x191f   :  { %4637 = vrcp.f32 %v2928_v18 }
0x1922   :  { %v3086_v25 = vpop.permute.xlu0 %3085 }
0x1925   :  { %v4636_v20 = vpop.eup %4635 }
0x1926   :  { %v2931_v21 = vmul.f32 %v4636_v20, %v4632_v14 }
0x1928   :  { %4383 = vmatmul.mubr.msk.f32.vlgmr.msra.gmra.mrb[26].mxu0 %vm226_vm2, %v2931_v21 }
0x1929   :  { %v4638_v22 = vpop.eup %4637  ;;  %4391 = vmatpush3.xpose.msk.msra.mxu0 %vm226_vm2, %v3088_v19  ;;  %4392 = vmatprep.mubr.msk.f32.mxu0 %vm4660_vm1, %v4659_v36 }
0x192a   :  { %v2932_v24 = vmul.f32 %v4638_v22, %v4634_v41  ;;  %4400 = vmatprep.subr.mxu0 %v4659_v36 }
0x192c   :  { %4388 = vmatmul.mubr.msk.f32.vlgmr.msra.gmra.mrb[36].mxu1 %vm226_vm2, %v2932_v24  ;;  %4393 = vmatmul.mubr.msk.f32.vlgmr.msra.gmra.mrb[28].mxu0 %vm226_vm2, %v3086_v25 }
0x192d   :  { %4396 = vmatpush3.xpose.msk.msra.mxu1 %vm226_vm2, %v3166_v23  ;;  %4397 = vmatprep.mubr.msk.f32.mxu1 %vm4660_vm1, %v4659_v36 }
0x192e   :  { %4405 = vmatprep.subr.mxu1 %v4659_v36  ;;  %4402 = vmatprep.mubr.msk.f32.mxu0 %vm4660_vm1, %v4659_v36 }
0x1930   :  { %4398 = vmatmul.mubr.msk.f32.vlgmr.msra.gmra.mrb[38].mxu1 %vm226_vm2, %v3164_v26 }
0x1931   :  { %4407 = vmatprep.mubr.msk.f32.mxu1 %vm4660_vm1, %v4659_v36 }
0x19fb   :  { %v3005_v27 = vpop.f32.mrb[26].mxu0 }
0x19fc   :  { %v4384_v28 = vpop.f32.mrb[27].mxu0 }
0x19ff   :  { %v3081_v30 = vpop.f32.mrb[36].mxu1  ;;  %v3159_v37 = vpop.f32.mrb[28].mxu0 }
0x1a00   :  { %v3241_v38 = vmul.f32 0.35355338, %v3159_v37  ;;  %v4389_v42 = vpop.f32.mrb[37].mxu1  ;;  %v4394_v29 = vpop.f32.mrb[29].mxu0 }
0x1a02   :  { %v3243_v44 = vadd.f32 %v3241_v38, %v4839_v54 }
0x1a03   :  { %v3237_v45 = vpop.f32.mrb[38].mxu1 }
0x1a04   :  { %v3242_v46 = vmul.f32 0.35355338, %v3237_v45  ;;  %v4399_v47 = vpop.f32.mrb[39].mxu1  ;;  %v3245_v48 = vsel %vm226_vm2, %v3243_v44, -inf }
0x1a05   :  { %3246 = vmax.xlane.f32.xlu0 %v3245_v48  ;;  %v4035_v47 = vld [vmem:[%s5385_s10 + $0x28] sm:$0xff] }
0x1a06   :  { %v3244_v49 = vadd.f32 %v3242_v46, %v4842_v60 }
0x1a08   :  { %v3248_v32 = vsel %vm226_vm2, %v3244_v49, -inf }
0x1a09   :  { %3249 = vmax.xlane.f32.xlu1 %v3248_v32  ;;  %v4037_v32 = vld [vmem:[%s5385_s10 + $0x38] sm:$0xff] }
0x1a1a   :  { %3343 = vrot.lane.b32.xlu1 %v5105_v40, %s5424_s2 }
0x1a1e   :  { %3421 = vrot.lane.b32.xlu1 %v5201_v56, %s5425_s23 }
0x1a22   :  { %3423 = vrot.lane.b32.xlu1 %v5203_v58, %s5425_s23 }
0x1a26   :  { %3431 = vrot.lane.b32.xlu1 %v3081_v30, %s5426_s24 }
0x1a92   :  { %v3247_v36 = vpop.xlane.xlu0 %3246 }
0x1a93   :  { %v3251_v54 = vsub.f32 %v3243_v44, %v3247_v36 }
0x1a95   :  { %v3253_v50 = vmul.f32 1.442695, %v3251_v54 }
0x1a96   :  { %v3250_v51 = vpop.xlane.xlu1 %3249 }
0x1a97   :  { %4639 = vpow2.f32 %v3253_v50  ;;  %v3252_v60 = vsub.f32 %v3244_v49, %v3250_v51  ;;  %v4036_v49 = vld [vmem:[%s5385_s10 + $0x30] sm:$0xff] }
0x1a98   :  { %v4522_v36 = vpack.c.bf16 %v4037_v32, %v4036_v49 }
0x1a99   :  { %v3255_v52 = vmul.f32 1.442695, %v3252_v60 }
0x1a9a   :  { %v3344_v53 = vpop.permute.xlu1 %3343 }
0x1a9b   :  { %4641 = vpow2.f32 %v3255_v52  ;;  %4406 = vmatpush3.msra.mxu1 %v3344_v53 }
0x1a9e   :  { %v3422_v8 = vpop.permute.xlu1 %3421 }
0x1a9f   :  { %v3443_v12 = vsel %vm226_vm2, %v5161_v11, %v3422_v8  ;;  %v4027_v11 = vld [vmem:[%s5384_s7 + $0x1] ss:$0 sm:$0xff] }
0x1aa1   :  { %v4640_v55 = vpop.eup %4639 }
0x1aa2   :  { %v3257_v40 = vsel %vm226_vm2, %v4640_v55, 0.0  ;;  %v3424_v9 = vpop.permute.xlu1 %3423 }
0x1aa3   :  { %3258 = vadd.xlane.f32.xlu0 %v3257_v40  ;;  %v3444_v17 = vsel %vm226_vm2, %v5163_v13, %v3424_v9  ;;  %v4032_v40 = vld [vmem:[%s5386_s8 + $0x1] ss:$0 sm:$0xff] }
0x1aa4   :  { %v4039_v9 = vld [vmem:[%s5389_s11 + $0x1] ss:$0 sm:$0xff] }
0x1aa5   :  { %v4642_v56 = vpop.eup %4641 }
0x1aa6   :  { %v3260_v57 = vsel %vm226_vm2, %v4642_v56, 0.0  ;;  %v3432_v14 = vpop.permute.xlu1 %3431 }
0x1aa7   :  { %3261 = vadd.xlane.f32.xlu0 %v3260_v57  ;;  %v3446_v18 = vsel %vm1594_vm4, %v3444_v17, %v3432_v14  ;;  %v4033_v57 = vld [vmem:[%s5387_s9 + $0x1] ss:$0 sm:$0xff] }
0x1abd   :  { %3267 = vrot.lane.b32.xlu0 %v5107_v43, %s5424_s2  ;;  %v4022_v43 = vld [vmem:[%s5383_s6 + $0x20] sm:$0xff] }
0x1abe   :  { %v4510_v1 = vpack.c.bf16 %v4023_v0, %v4022_v43  ;;  %v4043_v43 = vld [vmem:[%s5388_s12 + $0x48] sm:$0xff] }
0x1ac1   :  { %3429 = vrot.lane.b32.xlu0 %v3005_v27, %s5426_s24 }
0x1b30   :  { %v3259_v58 = vpop.xlane.xlu0 %3258 }
0x1b31   :  { %4643 = vrcp.f32 %v3259_v58 }
0x1b34   :  { %v3262_v59 = vpop.xlane.xlu0 %3261 }
0x1b35   :  { %4645 = vrcp.f32 %v3262_v59 }
0x1b38   :  { %v3268_v61 = vpop.permute.xlu0 %3267 }
0x1b39   :  { %4401 = vmatpush3.msra.mxu0 %v3268_v61 }
0x1b3a   :  { %4511 = vmatprep.subr.bf16.mxu0 %v4510_v1 }
0x1b3b   :  { %v4644_v35 = vpop.eup %4643 }
0x1b3c   :  { %v3265_v33 = vmul.f32 %v4644_v35, %v4640_v55  ;;  %v3430_v10 = vpop.permute.xlu0 %3429 }
0x1b3d   :  { %v3445_v15 = vsel %vm1594_vm4, %v3443_v12, %v3430_v10 }
0x1b3e   :  { %4403 = vmatmul.mubr.msk.f32.vlgmr.msra.gmra.mrb[30].mxu0 %vm226_vm2, %v3265_v33 }
0x1b3f   :  { %v4646_v62 = vpop.eup %4645  ;;  %4513 = vmatpush3.bf16.msra.mxu0 %v4510_v1  ;;  %v4044_v1 = vld [vmem:[%s5388_s12 + $0x50] sm:$0xff] }
0x1b40   :  { %v3266_v63 = vmul.f32 %v4646_v62, %v4642_v56  ;;  %4515 = vmatprep.subr.bf16.mxu0 %v4514_v5  ;;  %v4530_v3 = vpack.c.bf16 %v4045_v2, %v4044_v1  ;;  %v4056_v1 = vld [vmem:[%s5391_s14 + $0x1] ss:$0 sm:$0xff] }
0x1b42   :  { %4408 = vmatmul.mubr.msk.f32.vlgmr.msra.gmra.mrb[40].mxu1 %vm226_vm2, %v3266_v63  ;;  %v4042_v63 = vld [vmem:[%s5388_s12 + $0x40] sm:$0xff] }
0x1b43   :  { %4517 = vmatpush3.bf16.msra.mxu0 %v4514_v5  ;;  %v4526_v0 = vpack.c.bf16 %v4043_v43, %v4042_v63  ;;  %v4046_v5 = vld [vmem:[%s5388_s12 + $0x60] sm:$0xff] }
0x1b45   :  { %4527 = vmatprep.subr.bf16.mxu0 %v4526_v0 }
0x1c11   :  { %v3339_v6 = vpop.f32.mrb[30].mxu0 }
0x1c12   :  { %3437 = vrot.lane.b32.xlu0 %v3339_v6, %s5427_s4  ;;  %v4404_v39 = vpop.f32.mrb[31].mxu0  ;;  %v4047_v6 = vld [vmem:[%s5388_s12 + $0x68] sm:$0xff] }
0x1c13   :  { %v4534_v39 = vpack.c.bf16 %v4047_v6, %v4046_v5  ;;  %v4057_v6 = vld [vmem:[%s5392_s15 + $0x1] ss:$0 sm:$0xff] }
0x1c15   :  { %v3415_v7 = vpop.f32.mrb[40].mxu1 }
0x1c16   :  { %3439 = vrot.lane.b32.xlu1 %v3415_v7, %s5427_s4  ;;  %v4409_v4 = vpop.f32.mrb[41].mxu1  ;;  %v4048_v7 = vld [vmem:[%s5388_s12 + $0x70] sm:$0xff] }
0x1c17   :  { %v4049_v4 = vld [vmem:[%s5388_s12 + $0x78] sm:$0xff] }
0x1c18   :  { %v4538_v8 = vpack.c.bf16 %v4049_v4, %v4048_v7 }
0x1c84   :  { %v3438_v41 = vpop.permute.xlu0 %3437 }
0x1c85   :  { %v3447_v16 = vsel %vm1597_vm3, %v3445_v15, %v3438_v41 }
0x1c86   :  { %4418 = vmatprep.mubr.msk.f32.mxu0 %vm63_vm0, %v3447_v16 }
0x1c88   :  { %v3440_v19 = vpop.permute.xlu1 %3439 }
0x1c89   :  { %v3448_v20 = vsel %vm1597_vm3, %v3446_v18, %v3440_v19 }
0x1c8a   :  { %4419 = vmatmul.mubr.msk.f32.vlgmr.msra.gmra.mrb[32].mxu0 %vm63_vm0, %v3448_v20 }
0x1c8b   :  { %4529 = vmatpush3.bf16.msra.mxu0 %v4526_v0 }
0x1c8c   :  { %4531 = vmatprep.subr.bf16.mxu0 %v4530_v3 }
0x1c8f   :  { %4533 = vmatpush3.bf16.msra.mxu0 %v4530_v3 }
0x1c90   :  { %4535 = vmatprep.subr.bf16.mxu0 %v4534_v39 }
0x1c93   :  { %4537 = vmatpush3.bf16.msra.mxu0 %v4534_v39 }
0x1c94   :  { %4539 = vmatprep.subr.bf16.mxu0 %v4538_v8 }
0x1c97   :  { %4541 = vmatpush3.bf16.msra.mxu0 %v4538_v8 }
0x1d5d   :  { %v4420_v21 = vpop.f32.mrb[32].mxu0 }
0x1d5e   :  { %v3540_v22 = vadd.f32 %v4420_v21, %v4027_v11  ;;  %v3534_v23 = vpop.f32.mrb[33].mxu0 }
0x1d5f   :  { %v3535_v24 = vadd.f32 %v4027_v11, %v3534_v23 }
0x1d60   :  { %v3544_v25 = vadd.f32 %v3540_v22, %v5094_v34 }
0x1d61   :  { %v3543_v26 = vadd.f32 %v3535_v24, %v5092_v31  ;;  %v4034_v31 = vld [vmem:[%s5385_s10 + $0x20] sm:$0xff] }
0x1d62   :  { %v3552_v13 = vsel %vm63_vm0, %v3544_v25, 0.0  ;;  %v4518_v48 = vpack.c.bf16 %v4035_v47, %v4034_v31 }
0x1d63   :  { %3553 = vadd.xlane.f32.xlu1 %v3552_v13  ;;  %v3549_v27 = vsel %vm63_vm0, %v3543_v26, 0.0 }
0x1d64   :  { %3550 = vadd.xlane.f32.xlu0 %v3549_v27  ;;  %4519 = vmatprep.subr.bf16.mxu1 %v4518_v48 }
0x1d65   :  { %4521 = vmatpush3.bf16.msra.mxu1 %v4518_v48 }
0x1d66   :  { %4523 = vmatprep.subr.bf16.mxu1 %v4522_v36 }
0x1d69   :  { %4525 = vmatpush3.bf16.msra.mxu1 %v4522_v36 }
0x1df0   :  { %v3554_v28 = vpop.xlane.xlu1 %3553 }
0x1df1   :  { %v3556_v30 = vmul.f32 0.03125, %v3554_v28  ;;  %v3551_v37 = vpop.xlane.xlu0 %3550 }
0x1df2   :  { %v3555_v38 = vmul.f32 0.03125, %v3551_v37 }
0x1df3   :  { %v3558_v42 = vsub.f32 %v3544_v25, %v3556_v30 }
0x1df4   :  { %v3557_v29 = vsub.f32 %v3543_v26, %v3555_v38  ;;  %v4051_v38 = vld [vmem:[%s5390_s13 + $0x1] ss:$0 sm:$0xff] }
0x1df5   :  { %v3560_v46 = vmul.f32 %v3558_v42, %v3558_v42 }
0x1df6   :  { %v3559_v44 = vmul.f32 %v3557_v29, %v3557_v29 }
0x1df7   :  { %v3564_v34 = vsel %vm63_vm0, %v3560_v46, 0.0 }
0x1df8   :  { %v3561_v45 = vsel %vm63_vm0, %v3559_v44, 0.0 }
0x1df9   :  { %3562 = vadd.xlane.f32.xlu0 %v3561_v45 }
0x1dfd   :  { %3565 = vadd.xlane.f32.xlu0 %v3564_v34 }
0x1e86   :  { %v3563_v54 = vpop.xlane.xlu0 %3562 }
0x1e87   :  { %v3567_v50 = vmul.f32 0.03125, %v3563_v54 }
0x1e89   :  { %v3569_v51 = vadd.f32 1e-12, %v3567_v50 }
0x1e8a   :  { %v3566_v60 = vpop.xlane.xlu0 %3565 }
0x1e8b   :  { %4647 = vrsqrt.f32 %v3569_v51  ;;  %v3568_v52 = vmul.f32 0.03125, %v3566_v60 }
0x1e8d   :  { %v3570_v53 = vadd.f32 1e-12, %v3568_v52 }
0x1e8f   :  { %4649 = vrsqrt.f32 %v3570_v53 }
0x1e95   :  { %v4648_v55 = vpop.eup %4647 }
0x1e96   :  { %v3573_v56 = vmul.f32 %v4648_v55, %v3557_v29  ;;  %v3849_v55 = vld [vmem:[%s5393_s16] sm:$0xff] }
0x1e98   :  { %v3581_v58 = vmul.f32 %v4032_v40, %v3573_v56 }
0x1e99   :  { %v4650_v59 = vpop.eup %4649 }
0x1e9a   :  { %v3574_v61 = vmul.f32 %v4650_v59, %v3558_v42  ;;  %v3589_v35 = vadd.f32 %v4033_v57, %v3581_v58  ;;  %v3852_v58 = vld [vmem:[%s5393_s16 + $0x18] sm:$0xff] }
0x1e9c   :  { %v3582_v33 = vmul.f32 %v4032_v40, %v3574_v61  ;;  %4429 = vmatprep.mubr.msk.f32.mxu1 %vm63_vm0, %v3589_v35  ;;  %v3850_v40 = vld [vmem:[%s5393_s16 + $0x8] sm:$0xff] }
0x1e9d   :  { %v4542_v56 = vpack.c.bf16 %v3850_v40, %v3849_v55 }
0x1e9e   :  { %v3590_v62 = vadd.f32 %v4033_v57, %v3582_v33  ;;  %v3851_v57 = vld [vmem:[%s5393_s16 + $0x10] sm:$0xff] }
0x1e9f   :  { %4543 = vmatprep.subr.bf16.mxu1 %v4542_v56  ;;  %v4546_v59 = vpack.c.bf16 %v3852_v58, %v3851_v57 }
0x1ea0   :  { %4430 = vmatmul.mubr.msk.f32.vlgmr.msra.gmra.mrb[42].mxu1 %vm63_vm0, %v3590_v62 }
0x1ea1   :  { %4545 = vmatpush3.bf16.msra.mxu1 %v4542_v56 }
0x1ea2   :  { %4547 = vmatprep.subr.bf16.mxu1 %v4546_v59 }
0x1ea5   :  { %4549 = vmatpush3.bf16.msra.mxu1 %v4546_v59 }
0x1f73   :  { %v4431_v10 = vpop.f32.mrb[42].mxu1 }
0x1f74   :  { %v3682_v12 = vadd.f32 %v4431_v10, %v4039_v9  ;;  %v3676_v14 = vpop.f32.mrb[43].mxu1 }
0x1f75   :  { %v3677_v15 = vadd.f32 %v4039_v9, %v3676_v14  ;;  %v4058_v9 = vld [vmem:[%s5394_s17] ss:$0 sm:$0xff] }
0x1f76   :  { %v3688_v41 = vmul.f32 0.044715, %v3682_v12  ;;  %v3686_v28 = vmul.f32 0.5, %v3682_v12 }
0x1f77   :  { %v3687_v16 = vmul.f32 0.044715, %v3677_v15  ;;  %v3685_v13 = vmul.f32 0.5, %v3677_v15 }
0x1f78   :  { %v3690_v17 = vmul.f32 %v3688_v41, %v3682_v12 }
0x1f79   :  { %v3689_v18 = vmul.f32 %v3687_v16, %v3677_v15 }
0x1f7a   :  { %v3692_v19 = vmul.f32 %v3690_v17, %v3682_v12 }
0x1f7b   :  { %v3691_v20 = vmul.f32 %v3689_v18, %v3677_v15 }
0x1f7c   :  { %v3694_v11 = vadd.f32 %v3692_v19, %v3682_v12 }
0x1f7d   :  { %v3693_v21 = vadd.f32 %v3691_v20, %v3677_v15 }
0x1f7e   :  { %v3696_v22 = vmul.f32 0.7978846, %v3694_v11 }
0x1f7f   :  { %v3695_v23 = vmul.f32 0.7978846, %v3693_v21 }
0x1f80   :  { %4651 = vtanh.f32 %v3696_v22 }
0x1f81   :  { %4653 = vtanh.f32 %v3695_v23 }
0x1f8a   :  { %v4652_v24 = vpop.eup %4651 }
0x1f8b   :  { %v4654_v25 = vpop.eup %4653  ;;  %v3700_v26 = vadd.f32 1.0, %v4652_v24 }
0x1f8c   :  { %v3699_v27 = vadd.f32 1.0, %v4654_v25 }
0x1f8d   :  { %v3702_v37 = vmul.f32 %v3700_v26, %v3686_v28 }
0x1f8e   :  { %v3701_v30 = vmul.f32 %v3699_v27, %v3685_v13 }
0x1f90   :  { %4448 = vmatprep.mubr.msk.f32.mxu0 %vm1863_vm5, %v3701_v30 }
0x1f91   :  { %4449 = vmatmul.mubr.msk.f32.vlgmr.msra.gmra.mrb[34].mxu0 %vm1863_vm5, %v3702_v37 }
0x2064   :  { %v4450_v42 = vpop.f32.mrb[34].mxu0 }
0x2065   :  { %v3798_v29 = vadd.f32 %v4450_v42, %v4051_v38  ;;  %v3792_v44 = vpop.f32.mrb[35].mxu0 }
0x2066   :  { %v3793_v45 = vadd.f32 %v4051_v38, %v3792_v44 }
0x2067   :  { %v3802_v46 = vadd.f32 %v3798_v29, %v3590_v62 }
0x2068   :  { %v3801_v34 = vadd.f32 %v3793_v45, %v3589_v35 }
0x2069   :  { %v3810_v31 = vsel %vm63_vm0, %v3802_v46, 0.0 }
0x206a   :  { %3811 = vadd.xlane.f32.xlu1 %v3810_v31  ;;  %v3807_v47 = vsel %vm63_vm0, %v3801_v34, 0.0 }
0x206b   :  { %3808 = vadd.xlane.f32.xlu0 %v3807_v47 }
0x20f7   :  { %v3812_v48 = vpop.xlane.xlu1 %3811 }
0x20f8   :  { %v3814_v49 = vmul.f32 0.03125, %v3812_v48  ;;  %v3809_v32 = vpop.xlane.xlu0 %3808 }
0x20f9   :  { %v3813_v36 = vmul.f32 0.03125, %v3809_v32 }
0x20fa   :  { %v3816_v54 = vsub.f32 %v3802_v46, %v3814_v49 }
0x20fb   :  { %v3815_v50 = vsub.f32 %v3801_v34, %v3813_v36 }
0x20fc   :  { %v3818_v51 = vmul.f32 %v3816_v54, %v3816_v54 }
0x20fd   :  { %v3817_v60 = vmul.f32 %v3815_v50, %v3815_v50 }
0x20fe   :  { %v3822_v52 = vsel %vm63_vm0, %v3818_v51, 0.0 }
0x20ff   :  { %3823 = vadd.xlane.f32.xlu1 %v3822_v52  ;;  %v3819_v53 = vsel %vm63_vm0, %v3817_v60, 0.0 }
0x2100   :  { %3820 = vadd.xlane.f32.xlu0 %v3819_v53 }
0x218c   :  { %v3824_v61 = vpop.xlane.xlu1 %3823 }
0x218d   :  { %v3826_v35 = vmul.f32 0.03125, %v3824_v61  ;;  %v3821_v33 = vpop.xlane.xlu0 %3820 }
0x218e   :  { %v3825_v62 = vmul.f32 0.03125, %v3821_v33 }
0x218f   :  { %v3828_v63 = vadd.f32 1e-12, %v3826_v35 }
0x2190   :  { %v3827_v43 = vadd.f32 1e-12, %v3825_v62 }
0x2191   :  { %4655 = vrsqrt.f32 %v3828_v63 }
0x2192   :  { %4657 = vrsqrt.f32 %v3827_v43 }
0x219b   :  { %v4656_v0 = vpop.eup %4655 }
0x219c   :  { %v4658_v2 = vpop.eup %4657  ;;  %v3832_v3 = vmul.f32 %v4656_v0, %v3816_v54 }
0x219d   :  { %v3831_v5 = vmul.f32 %v4658_v2, %v3815_v50 }
0x219e   :  { %v3840_v39 = vmul.f32 %v4056_v1, %v3832_v3 }
0x219f   :  { %v3839_v7 = vmul.f32 %v4056_v1, %v3831_v5 }
0x21a0   :  { %v3848_v8 = vadd.f32 %v4057_v6, %v3840_v39 }
0x21a1   :  { %v3847_v4 = vadd.f32 %v4057_v6, %v3839_v7 }
0x21a3   :  { %4459 = vmatprep.mubr.msk.f32.mxu1 %vm63_vm0, %v3847_v4 }
0x21a4   :  { %4460 = vmatmul.mubr.msk.f32.vlgmr.msra.gmra.mrb[44].mxu1 %vm63_vm0, %v3848_v8 }
0x2277   :  { %v4461_v10 = vpop.f32.mrb[44].mxu1 }
0x2278   :  { %v3938_v12 = vadd.f32 %v4461_v10, %v4058_v9  ;;  %v3932_v14 = vpop.f32.mrb[45].mxu1 }
0x2279   :  { %v3933_v15 = vadd.f32 %v4058_v9, %v3932_v14 }
0x227a   :  { %3942 = vst [vmem:[%s5395_s18 + $0x8] sm:$0xff] %v3938_v12 }
0x227b   :  { %3941 = vst [vmem:[%s5395_s18] sm:$0xff] %v3933_v15 }

</bundles_post_ra>
